<compile_context>
chip_gen: v5e
topology: v5e:2x2
jax: 0.10.0
libtpu: 0.0.40
codegen_flags: <defaults>
</compile_context>

<pallas_src>
import functools
import numpy as np
import jax
import jax.numpy as jnp
from jax.experimental import pallas as pl
from jax.experimental.pallas import tpu as pltpu


# ----------------------------- small helpers --------------------------------

def _erf(x):
    # Abramowitz-Stegun 7.1.26 rational approximation of erf (|err| < 1.5e-7),
    # built only from exp/mul/add/select so it lowers cleanly in Mosaic.
    a1, a2, a3, a4, a5 = (0.254829592, -0.284496736, 1.421413741,
                          -1.453152027, 1.061405429)
    p = 0.3275911
    sgn = jnp.where(x >= 0.0, 1.0, -1.0)
    ax = jnp.abs(x)
    t = 1.0 / (1.0 + p * ax)
    poly = t * (a1 + t * (a2 + t * (a3 + t * (a4 + t * a5))))
    return sgn * (1.0 - poly * jnp.exp(-ax * ax))


def _gelu(x):
    # PyTorch F.gelu default = exact (erf) variant.
    return 0.5 * x * (1.0 + _erf(x * 0.7071067811865476))


def _layernorm(h, g, b, eps=1e-5):
    mu = jnp.mean(h, axis=-1, keepdims=True)
    var = jnp.mean((h - mu) ** 2, axis=-1, keepdims=True)
    return (h - mu) * jax.lax.rsqrt(var + eps) * g + b


def _vmem_limit_bytes():
    try:
        return int(pltpu.get_tpu_info().vmem_capacity_bytes * 3 // 4)
    except Exception:
        return 48 * 1024 * 1024


_VMEM_LIMIT = _vmem_limit_bytes()


def _cparams(sem):
    return pltpu.CompilerParams(dimension_semantics=sem,
                                vmem_limit_bytes=_VMEM_LIMIT)


def _const_spec(arr, grid_rank):
    """Full-array block, constant index_map (weights / biases)."""
    zeros = (0,) * arr.ndim
    idx = {1: (lambda a: zeros),
           2: (lambda a, b: zeros),
           3: (lambda a, b, c: zeros),
           4: (lambda a, b, c, e: zeros)}[grid_rank]
    return pl.BlockSpec(arr.shape, idx)


def _choose_seq_tile(T, target=256):
    """Largest power-of-two tile <= min(target, T), at least 8 (pad T up)."""
    t = 8
    while t * 2 <= min(target, T):
        t *= 2
    return t


def _div_tile(n, target):
    """Largest power-of-two <= target that divides n (>=128); else full n."""
    best = None
    p = 1
    while p <= min(target, n):
        if n % p == 0:
            best = p
        p *= 2
    if best is None or best < min(128, n):
        return n
    return best


def _choose_head_block(H, d, target=512):
    """Heads per attention grid step; prefer hb*d a multiple of 128."""
    start = max(1, min(H, target // max(d, 1)))
    fallback = None
    for cand in range(start, 0, -1):
        if H % cand:
            continue
        if (cand * d) % 128 == 0:
            return cand
        if fallback is None:
            fallback = cand
    return fallback if fallback is not None else 1


# ----------------------------- Pallas kernels --------------------------------

def conv1_gelu_kernel(xp_ref, w_ref, b_ref, o_ref):
    # xp_ref: (1, T+2, Cin) bf16 padded input (resident across the oc axis)
    # w_ref : (3, Cin, oc) bf16 per-tap weights; b_ref: (1, oc) f32
    T = o_ref.shape[1]
    acc = jnp.dot(xp_ref[0, 0:T, :], w_ref[0], preferred_element_type=jnp.float32)
    acc = acc + jnp.dot(xp_ref[0, 1:T + 1, :], w_ref[1],
                        preferred_element_type=jnp.float32)
    acc = acc + jnp.dot(xp_ref[0, 2:T + 2, :], w_ref[2],
                        preferred_element_type=jnp.float32)
    o_ref[0] = _gelu(acc + b_ref[...]).astype(o_ref.dtype)


def conv2_gelu_pos_kernel(ev_ref, od_ref, w_ref, b_ref, pos_ref, o_ref):
    # stride-2 conv via even/odd split of the padded conv1 output:
    #   out[t] = w0*ev[t] + w1*od[t] + w2*ev[t+1]
    T2 = o_ref.shape[1]
    acc = jnp.dot(ev_ref[0, 0:T2, :], w_ref[0], preferred_element_type=jnp.float32)
    acc = acc + jnp.dot(od_ref[0, 0:T2, :], w_ref[1],
                        preferred_element_type=jnp.float32)
    acc = acc + jnp.dot(ev_ref[0, 1:T2 + 1, :], w_ref[2],
                        preferred_element_type=jnp.float32)
    out = _gelu(acc + b_ref[...]) + pos_ref[...].astype(jnp.float32)
    o_ref[0] = out.astype(o_ref.dtype)


def ln_qkv_kernel(x_ref, g_ref, b_ref, w_ref, bias_ref, o_ref):
    # LayerNorm (fp32 stats) + single fused qkv projection (bf16 MXU, fp32 acc).
    h = _layernorm(x_ref[0].astype(jnp.float32), g_ref[...], b_ref[...])
    y = jnp.dot(h.astype(jnp.bfloat16), w_ref[...],
                preferred_element_type=jnp.float32) + bias_ref[...]
    o_ref[0] = y.astype(o_ref.dtype)


def flash_attn_kernel(q_ref, k_ref, v_ref, o_ref, m_sc, l_sc, acc_sc,
                      *, hb, d, tk, t_real):
    # q_ref: (1, tq, hb*d); k_ref/v_ref: (1, tk, hb*d).  Grid = (B, Hb, Q, K).
    ki = pl.program_id(3)

    @pl.when(ki == 0)
    def _():
        m_sc[...] = jnp.full(m_sc.shape, -jnp.inf, m_sc.dtype)
        l_sc[...] = jnp.zeros(l_sc.shape, l_sc.dtype)
        acc_sc[...] = jnp.zeros(acc_sc.shape, acc_sc.dtype)

    tq = q_ref.shape[1]
    q = q_ref[0].reshape(tq, hb, d)               # in-VMEM head split
    k = k_ref[0].reshape(tk, hb, d)
    v = v_ref[0].reshape(tk, hb, d)

    s = jnp.einsum('qhd,khd->hqk', q, k, preferred_element_type=jnp.float32)
    # mask padded KV columns (sequence was padded up to a tileable length)
    col = ki * tk + jax.lax.broadcasted_iota(jnp.int32, (1, 1, tk), 2)
    s = s + jnp.where(col < t_real, 0.0, -1e30)

    m_prev = m_sc[...]
    m_new = jnp.maximum(m_prev, s.max(axis=-1, keepdims=True))
    alpha = jnp.exp(m_prev - m_new)
    # TODO(synk): on v6e/v7x compute p in bf16 (bf16 EUP); keep fp32 on v5e.
    p = jnp.exp(s - m_new)
    l_sc[...] = alpha * l_sc[...] + p.sum(axis=-1, keepdims=True)
    acc_sc[...] = alpha * acc_sc[...] + jnp.einsum(
        'hqk,khd->hqd', p.astype(v.dtype), v, preferred_element_type=jnp.float32)
    m_sc[...] = m_new

    @pl.when(ki == pl.num_programs(3) - 1)
    def _():
        inv_l = pl.reciprocal(l_sc[...], approx=True)
        out = acc_sc[...] * inv_l                              # (hb, tq, d)
        o_ref[0] = jnp.transpose(out, (1, 0, 2)).reshape(tq, hb * d).astype(
            o_ref.dtype)


def out_proj_residual_kernel(x_ref, a_ref, wo_ref, bo_ref, o_ref):
    # Fused output projection over all (already merged) heads + residual add.
    y = jnp.dot(a_ref[0], wo_ref[...], preferred_element_type=jnp.float32)
    y = y + bo_ref[...]
    o_ref[0] = (x_ref[0].astype(jnp.float32) + y).astype(o_ref.dtype)


def ln_mlp_residual_kernel(x_ref, g_ref, b_ref, w1_ref, b1_ref, w2_ref, b2_ref,
                           o_ref, h_sc, acc_sc):
    # K-tiled MLP: grid axis 2 runs over the 4*C hidden dim; fp32 accumulator.
    hi = pl.program_id(2)

    @pl.when(hi == 0)
    def _():
        xf = x_ref[0].astype(jnp.float32)
        h_sc[...] = _layernorm(xf, g_ref[...], b_ref[...]).astype(h_sc.dtype)
        acc_sc[...] = jnp.zeros(acc_sc.shape, acc_sc.dtype)

    m = jnp.dot(h_sc[...], w1_ref[...],
                preferred_element_type=jnp.float32) + b1_ref[...]
    m = _gelu(m).astype(jnp.bfloat16)
    acc_sc[...] = acc_sc[...] + jnp.dot(m, w2_ref[...],
                                        preferred_element_type=jnp.float32)

    @pl.when(hi == pl.num_programs(2) - 1)
    def _():
        y = acc_sc[...] + b2_ref[...]
        o_ref[0] = (x_ref[0].astype(jnp.float32) + y).astype(o_ref.dtype)


def ln_kernel(x_ref, g_ref, b_ref, o_ref):
    o_ref[0] = _layernorm(x_ref[0].astype(jnp.float32), g_ref[...],
                          b_ref[...]).astype(o_ref.dtype)


# ----------------------------- pallas_call wrappers --------------------------

def conv1_gelu(xp, w, b):
    B, Tp_, Cin = xp.shape
    T = Tp_ - 2
    Cout = w.shape[-1]
    oc = _div_tile(Cout, 256)
    nC = Cout // oc
    return pl.pallas_call(
        conv1_gelu_kernel,
        out_shape=jax.ShapeDtypeStruct((B, T, Cout), jnp.bfloat16),
        grid=(B, nC),
        in_specs=[pl.BlockSpec((1, Tp_, Cin), lambda bb, ci: (bb, 0, 0)),
                  pl.BlockSpec((3, Cin, oc), lambda bb, ci: (0, 0, ci)),
                  pl.BlockSpec((1, oc), lambda bb, ci: (0, ci))],
        out_specs=pl.BlockSpec((1, T, oc), lambda bb, ci: (bb, 0, ci)),
        compiler_params=_cparams(("parallel", "parallel")),
    )(xp, w, b)


def conv2_gelu_pos(ev, od, w, b, pos):
    B, T2p, C = ev.shape
    T2 = T2p - 1
    Cout = w.shape[-1]
    oc = _div_tile(Cout, 256)
    nC = Cout // oc
    in_spec = pl.BlockSpec((1, T2p, C), lambda bb, ci: (bb, 0, 0))
    return pl.pallas_call(
        conv2_gelu_pos_kernel,
        out_shape=jax.ShapeDtypeStruct((B, T2, Cout), jnp.bfloat16),
        grid=(B, nC),
        in_specs=[in_spec, in_spec,
                  pl.BlockSpec((3, C, oc), lambda bb, ci: (0, 0, ci)),
                  pl.BlockSpec((1, oc), lambda bb, ci: (0, ci)),
                  pl.BlockSpec((T2, oc), lambda bb, ci: (0, ci))],
        out_specs=pl.BlockSpec((1, T2, oc), lambda bb, ci: (bb, 0, ci)),
        compiler_params=_cparams(("parallel", "parallel")),
    )(ev, od, w, b, pos)


def ln_qkv(x, p, tq):
    B, T, C = x.shape
    nQ = T // tq
    xspec = pl.BlockSpec((1, tq, C), lambda bb, qi: (bb, qi, 0))
    consts = [p["ln1g"], p["ln1b"], p["wqkv"], p["bqkv"]]
    return pl.pallas_call(
        ln_qkv_kernel,
        out_shape=jax.ShapeDtypeStruct((B, T, 3 * C), jnp.bfloat16),
        grid=(B, nQ),
        in_specs=[xspec] + [_const_spec(a, 2) for a in consts],
        out_specs=pl.BlockSpec((1, tq, 3 * C), lambda bb, qi: (bb, qi, 0)),
        compiler_params=_cparams(("parallel", "parallel")),
    )(x, *consts)


def flash_attention(qkv, n_head, d, tq, tk, t_real):
    B, Tp, C3 = qkv.shape
    C = C3 // 3
    hb = _choose_head_block(n_head, d)
    nHb = n_head // hb
    hbd = hb * d
    nQ, nK = Tp // tq, Tp // tk
    q_spec = pl.BlockSpec((1, tq, hbd), lambda b, hi, qi, ki: (b, qi, hi))
    k_spec = pl.BlockSpec((1, tk, hbd), lambda b, hi, qi, ki: (b, ki, nHb + hi))
    v_spec = pl.BlockSpec((1, tk, hbd),
                          lambda b, hi, qi, ki: (b, ki, 2 * nHb + hi))
    o_spec = pl.BlockSpec((1, tq, hbd), lambda b, hi, qi, ki: (b, qi, hi))
    kernel = functools.partial(flash_attn_kernel, hb=hb, d=d, tk=tk,
                               t_real=t_real)
    return pl.pallas_call(
        kernel,
        out_shape=jax.ShapeDtypeStruct((B, Tp, C), jnp.bfloat16),
        grid=(B, nHb, nQ, nK),
        in_specs=[q_spec, k_spec, v_spec],
        out_specs=o_spec,
        scratch_shapes=[pltpu.VMEM((hb, tq, 1), jnp.float32),
                        pltpu.VMEM((hb, tq, 1), jnp.float32),
                        pltpu.VMEM((hb, tq, d), jnp.float32)],
        compiler_params=_cparams(("parallel", "parallel", "parallel",
                                  "arbitrary")),
    )(qkv, qkv, qkv)


def attn_out_proj_residual(x, attn, wo, bo, tq):
    B, T, C = x.shape
    nQ = T // tq
    aspec = pl.BlockSpec((1, tq, C), lambda bb, qi: (bb, qi, 0))
    return pl.pallas_call(
        out_proj_residual_kernel,
        out_shape=jax.ShapeDtypeStruct((B, T, C), jnp.bfloat16),
        grid=(B, nQ),
        in_specs=[aspec, aspec, _const_spec(wo, 2), _const_spec(bo, 2)],
        out_specs=aspec,
        input_output_aliases={0: 0},
        compiler_params=_cparams(("parallel", "parallel")),
    )(x, attn, wo, bo)


def ln_mlp_residual(x, p, tq):
    B, T, C = x.shape
    nQ = T // tq
    H4 = p["w1"].shape[-1]
    th = _div_tile(H4, 1024)
    nH = H4 // th
    xspec = pl.BlockSpec((1, tq, C), lambda bb, qi, hi: (bb, qi, 0))
    return pl.pallas_call(
        ln_mlp_residual_kernel,
        out_shape=jax.ShapeDtypeStruct((B, T, C), jnp.bfloat16),
        grid=(B, nQ, nH),
        in_specs=[xspec,
                  _const_spec(p["ln2g"], 3), _const_spec(p["ln2b"], 3),
                  pl.BlockSpec((C, th), lambda bb, qi, hi: (0, hi)),
                  pl.BlockSpec((1, th), lambda bb, qi, hi: (0, hi)),
                  pl.BlockSpec((th, C), lambda bb, qi, hi: (hi, 0)),
                  _const_spec(p["b2"], 3)],
        out_specs=pl.BlockSpec((1, tq, C), lambda bb, qi, hi: (bb, qi, 0)),
        scratch_shapes=[pltpu.VMEM((tq, C), jnp.bfloat16),
                        pltpu.VMEM((tq, C), jnp.float32)],
        input_output_aliases={0: 0},
        compiler_params=_cparams(("parallel", "parallel", "arbitrary")),
    )(x, p["ln2g"], p["ln2b"], p["w1"], p["b1"], p["w2"], p["b2"])


def layernorm_post(x, g, b, tq):
    B, T, C = x.shape
    nQ = T // tq
    aspec = pl.BlockSpec((1, tq, C), lambda bb, qi: (bb, qi, 0))
    return pl.pallas_call(
        ln_kernel,
        out_shape=jax.ShapeDtypeStruct((B, T, C), jnp.float32),
        grid=(B, nQ),
        in_specs=[aspec, _const_spec(g, 2), _const_spec(b, 2)],
        out_specs=aspec,
        compiler_params=_cparams(("parallel", "parallel")),
    )(x, g, b)


def residual_block(x, p, n_head, tq, t_real):
    B, Tp, C = x.shape
    d = C // n_head
    qkv = ln_qkv(x, p, tq)                                       # (B,Tp,3C) bf16
    attn = flash_attention(qkv, n_head, d, tq, tq, t_real)       # (B,Tp,C)  bf16
    x1 = attn_out_proj_residual(x, attn, p["wo"], p["bo"], tq)
    return ln_mlp_residual(x1, p, tq)


# ----------------------------- parameter setup (glue) ------------------------

def sinusoids(length, channels, max_timescale=10000):
    assert channels % 2 == 0
    log_inc = np.log(max_timescale) / (channels // 2 - 1)
    inv = jnp.exp(-log_inc * jnp.arange(channels // 2, dtype=jnp.float32))
    t = jnp.arange(length, dtype=jnp.float32)[:, None] * inv[None, :]
    return jnp.concatenate([jnp.sin(t), jnp.cos(t)], axis=1)


def init_params(key, n_mels, n_ctx, n_state, n_head, n_layer):
    ks = iter(jax.random.split(key, 6 + 12 * n_layer))
    s = 0.05
    d = n_state // n_head
    scale = float(d) ** (-0.25)

    def rnd(shape):
        return jax.random.normal(next(ks), shape, jnp.float32) * s

    params = {
        # conv weights stored per-tap, transposed to (K, Cin, Cout) bf16
        "conv1_w": rnd((3, n_mels, n_state)).astype(jnp.bfloat16),
        "conv1_b": rnd((1, n_state)),
        "conv2_w": rnd((3, n_state, n_state)).astype(jnp.bfloat16),
        "conv2_b": rnd((1, n_state)),
        "pos": sinusoids(n_ctx, n_state).astype(jnp.bfloat16),
        "ln_post_g": jnp.ones((1, n_state), jnp.float32),
        "ln_post_b": jnp.zeros((1, n_state), jnp.float32),
        "blocks": [],
    }
    for _ in range(n_layer):
        wq = rnd((n_state, n_state)) * scale
        bq = rnd((1, n_state)) * scale
        wk = rnd((n_state, n_state)) * scale     # key projection has no bias
        wv = rnd((n_state, n_state))
        bv = rnd((1, n_state))
        blk = {
            "ln1g": jnp.ones((1, n_state), jnp.float32),
            "ln1b": jnp.zeros((1, n_state), jnp.float32),
            # fused qkv projection (in, 3*out); d**-0.25 folded into Wq/bq/Wk
            "wqkv": jnp.concatenate([wq, wk, wv], axis=1).astype(jnp.bfloat16),
            "bqkv": jnp.concatenate(
                [bq, jnp.zeros((1, n_state), jnp.float32), bv], axis=1),
            "wo": rnd((n_state, n_state)).astype(jnp.bfloat16),
            "bo": rnd((1, n_state)),
            "ln2g": jnp.ones((1, n_state), jnp.float32),
            "ln2b": jnp.zeros((1, n_state), jnp.float32),
            "w1": rnd((n_state, 4 * n_state)).astype(jnp.bfloat16),
            "b1": rnd((1, 4 * n_state)),
            "w2": rnd((4 * n_state, n_state)).astype(jnp.bfloat16),
            "b2": rnd((1, n_state)),
        }
        params["blocks"].append(blk)
    return params


# ----------------------------- forward ---------------------------------------

def audio_encoder_forward(x, params, n_head):
    """x: (B, n_mels, 2*n_ctx) float32 — same layout as the PyTorch module."""
    B, n_mels, T_in = x.shape

    # conv1: k=3, s=1, p=1 — pad once, 3 shifted-tap GEMMs in-kernel.
    xt = jnp.transpose(x, (0, 2, 1)).astype(jnp.bfloat16)        # (B, T, Cin)
    xp = jnp.pad(xt, ((0, 0), (1, 1), (0, 0)))
    y1 = conv1_gelu(xp, params["conv1_w"], params["conv1_b"])    # (B, T, C)

    # conv2: k=3, s=2, p=1 + positional embedding (fused).
    # TODO(synk): move the even/odd stride-2 split in-kernel with
    # pl.ds(..., stride=2) once strided sublane loads on packed bf16 are
    # confirmed; the glue split is one extra (one-time) HBM round trip.
    T2 = (T_in + 2 - 3) // 2 + 1
    y1p = jnp.pad(y1, ((0, 0), (1, 1), (0, 0)))                  # (B, 2*T2+2, C)
    ev = y1p[:, 0::2, :]                                         # (B, T2+1, C)
    od = y1p[:, 1::2, :]                                         # (B, T2+1, C)
    h = conv2_gelu_pos(ev, od, params["conv2_w"], params["conv2_b"],
                       params["pos"])                            # (B, T2, C)

    # Pad the sequence to a tileable length; padded KV columns are masked in
    # flash attention and padded rows are sliced off at the end.
    tq = _choose_seq_tile(T2)
    Tp = ((T2 + tq - 1) // tq) * tq
    if Tp != T2:
        h = jnp.pad(h, ((0, 0), (0, Tp - T2), (0, 0)))

    # residual attention blocks (dropout p=0 / eval mode -> no-op)
    for blk in params["blocks"]:
        h = residual_block(h, blk, n_head, tq, T2)

    out = layernorm_post(h, params["ln_post_g"], params["ln_post_b"], tq)
    return out[:, :T2, :]


# ----------------------------- main ------------------------------------------

if __name__ == "__main__":
    # Small, lane-aligned toy config (n_state multiple of 128 keeps every
    # block lane-dense; the same code scales to real Whisper shapes).
    B, n_mels, n_ctx, n_state, n_head, n_layer = 2, 16, 8, 128, 4, 2
    T_in = 2 * n_ctx   # conv2 (stride 2) halves the time axis down to n_ctx

    key = jax.random.PRNGKey(0)
    kx, kp = jax.random.split(key)
    x = jax.random.normal(kx, (B, n_mels, T_in), jnp.float32)
    params = init_params(kp, n_mels, n_ctx, n_state, n_head, n_layer)

    fwd = jax.jit(functools.partial(audio_encoder_forward, n_head=n_head))
    out = jax.block_until_ready(fwd(x, params))
    assert out.shape == (B, n_ctx, n_state), out.shape
    assert bool(jnp.all(jnp.isfinite(out)))
    print("KERNEL_OK")
</pallas_src>

<mosaic_0001>
module attributes {stable_mosaic.version = 11 : i64} {
  func.func @conv1_gelu_kernel(%arg0: i32, %arg1: i32, %arg2: memref<1x18x16xbf16, #tpu.memory_space<vmem>>, %arg3: memref<3x16x128xbf16, #tpu.memory_space<vmem>>, %arg4: memref<1x128xf32, #tpu.memory_space<vmem>>, %arg5: memref<1x16x128xbf16, #tpu.memory_space<vmem>>) attributes {dimension_semantics = [#tpu.dimension_semantics<parallel>, #tpu.dimension_semantics<parallel>], iteration_bounds = array<i64: 2, 1>, scalar_prefetch = 0 : i64, scratch_operands = 0 : i64, tpu.core_type = #tpu.core_type<tc>, window_params = [{transform_indices = @transform_0, window_bounds = array<i64: 1, 18, 16>}, {transform_indices = @transform_1, window_bounds = array<i64: 3, 16, 128>}, {transform_indices = @transform_2, window_bounds = array<i64: 1, 128>}, {transform_indices = @transform_3, window_bounds = array<i64: 1, 16, 128>}]} {
    %c0 = arith.constant 0 : index
    %c0_0 = arith.constant 0 : index
    %c0_1 = arith.constant 0 : index
    %0 = vector.load %arg2[%c0, %c0_0, %c0_1] : memref<1x18x16xbf16, #tpu.memory_space<vmem>>, vector<1x16x16xbf16>
    %1 = vector.shape_cast %0 : vector<1x16x16xbf16> to vector<16x16xbf16>
    %c0_2 = arith.constant 0 : index
    %c0_3 = arith.constant 0 : index
    %c0_4 = arith.constant 0 : index
    %2 = vector.load %arg3[%c0_2, %c0_3, %c0_4] : memref<3x16x128xbf16, #tpu.memory_space<vmem>>, vector<1x16x128xbf16>
    %3 = vector.shape_cast %2 : vector<1x16x128xbf16> to vector<16x128xbf16>
    %cst = arith.constant dense<0.000000e+00> : vector<16x128xf32>
    %4 = tpu.matmul %1, %3, %cst {dimension_numbers = #tpu.dot_dimension_numbers<[1], [0], [0], [1], [0, 0, 1, 1], [], []>} : vector<16x16xbf16>, vector<16x128xbf16>, vector<16x128xf32> -> vector<16x128xf32>
    %c0_5 = arith.constant 0 : index
    %c1 = arith.constant 1 : index
    %c0_6 = arith.constant 0 : index
    %5 = vector.load %arg2[%c0_5, %c1, %c0_6] : memref<1x18x16xbf16, #tpu.memory_space<vmem>>, vector<1x16x16xbf16>
    %6 = vector.shape_cast %5 : vector<1x16x16xbf16> to vector<16x16xbf16>
    %c1_7 = arith.constant 1 : index
    %c0_8 = arith.constant 0 : index
    %c0_9 = arith.constant 0 : index
    %7 = vector.load %arg3[%c1_7, %c0_8, %c0_9] : memref<3x16x128xbf16, #tpu.memory_space<vmem>>, vector<1x16x128xbf16>
    %8 = vector.shape_cast %7 : vector<1x16x128xbf16> to vector<16x128xbf16>
    %cst_10 = arith.constant dense<0.000000e+00> : vector<16x128xf32>
    %9 = tpu.matmul %6, %8, %cst_10 {dimension_numbers = #tpu.dot_dimension_numbers<[1], [0], [0], [1], [0, 0, 1, 1], [], []>} : vector<16x16xbf16>, vector<16x128xbf16>, vector<16x128xf32> -> vector<16x128xf32>
    %10 = arith.addf %4, %9 : vector<16x128xf32>
    %c0_11 = arith.constant 0 : index
    %c2 = arith.constant 2 : index
    %c0_12 = arith.constant 0 : index
    %11 = vector.load %arg2[%c0_11, %c2, %c0_12] : memref<1x18x16xbf16, #tpu.memory_space<vmem>>, vector<1x16x16xbf16>
    %12 = vector.shape_cast %11 : vector<1x16x16xbf16> to vector<16x16xbf16>
    %c2_13 = arith.constant 2 : index
    %c0_14 = arith.constant 0 : index
    %c0_15 = arith.constant 0 : index
    %13 = vector.load %arg3[%c2_13, %c0_14, %c0_15] : memref<3x16x128xbf16, #tpu.memory_space<vmem>>, vector<1x16x128xbf16>
    %14 = vector.shape_cast %13 : vector<1x16x128xbf16> to vector<16x128xbf16>
    %cst_16 = arith.constant dense<0.000000e+00> : vector<16x128xf32>
    %15 = tpu.matmul %12, %14, %cst_16 {dimension_numbers = #tpu.dot_dimension_numbers<[1], [0], [0], [1], [0, 0, 1, 1], [], []>} : vector<16x16xbf16>, vector<16x128xbf16>, vector<16x128xf32> -> vector<16x128xf32>
    %16 = arith.addf %10, %15 : vector<16x128xf32>
    %c0_17 = arith.constant 0 : index
    %c0_18 = arith.constant 0 : index
    %17 = vector.load %arg4[%c0_17, %c0_18] : memref<1x128xf32, #tpu.memory_space<vmem>>, vector<1x128xf32>
    %18 = vector.broadcast %17 : vector<1x128xf32> to vector<16x128xf32>
    %19 = arith.addf %16, %18 : vector<16x128xf32>
    %cst_19 = arith.constant 5.000000e-01 : f32
    %20 = vector.broadcast %cst_19 : f32 to vector<16x128xf32>
    %21 = arith.mulf %20, %19 : vector<16x128xf32>
    %cst_20 = arith.constant 0.707106769 : f32
    %22 = vector.broadcast %cst_20 : f32 to vector<16x128xf32>
    %23 = arith.mulf %19, %22 : vector<16x128xf32>
    %cst_21 = arith.constant 0.000000e+00 : f32
    %24 = vector.broadcast %cst_21 : f32 to vector<16x128xf32>
    %25 = arith.cmpf oge, %23, %24 : vector<16x128xf32>
    %cst_22 = arith.constant 1.000000e+00 : f32
    %cst_23 = arith.constant -1.000000e+00 : f32
    %26 = vector.broadcast %cst_22 : f32 to vector<16x128xf32>
    %27 = vector.broadcast %cst_23 : f32 to vector<16x128xf32>
    %28 = arith.select %25, %26, %27 : vector<16x128xi1>, vector<16x128xf32>
    %29 = math.absf %23 : vector<16x128xf32>
    %cst_24 = arith.constant 0.327591091 : f32
    %30 = vector.broadcast %cst_24 : f32 to vector<16x128xf32>
    %31 = arith.mulf %30, %29 : vector<16x128xf32>
    %cst_25 = arith.constant 1.000000e+00 : f32
    %32 = vector.broadcast %cst_25 : f32 to vector<16x128xf32>
    %33 = arith.addf %32, %31 : vector<16x128xf32>
    %cst_26 = arith.constant 1.000000e+00 : f32
    %34 = vector.broadcast %cst_26 : f32 to vector<16x128xf32>
    %35 = arith.divf %34, %33 : vector<16x128xf32>
    %cst_27 = arith.constant 1.06140542 : f32
    %36 = vector.broadcast %cst_27 : f32 to vector<16x128xf32>
    %37 = arith.mulf %35, %36 : vector<16x128xf32>
    %cst_28 = arith.constant -1.45315206 : f32
    %38 = vector.broadcast %cst_28 : f32 to vector<16x128xf32>
    %39 = arith.addf %38, %37 : vector<16x128xf32>
    %40 = arith.mulf %35, %39 : vector<16x128xf32>
    %cst_29 = arith.constant 1.42141378 : f32
    %41 = vector.broadcast %cst_29 : f32 to vector<16x128xf32>
    %42 = arith.addf %41, %40 : vector<16x128xf32>
    %43 = arith.mulf %35, %42 : vector<16x128xf32>
    %cst_30 = arith.constant -0.284496725 : f32
    %44 = vector.broadcast %cst_30 : f32 to vector<16x128xf32>
    %45 = arith.addf %44, %43 : vector<16x128xf32>
    %46 = arith.mulf %35, %45 : vector<16x128xf32>
    %cst_31 = arith.constant 0.254829586 : f32
    %47 = vector.broadcast %cst_31 : f32 to vector<16x128xf32>
    %48 = arith.addf %47, %46 : vector<16x128xf32>
    %49 = arith.mulf %35, %48 : vector<16x128xf32>
    %cst_32 = arith.constant 0.000000e+00 : f32
    %50 = vector.broadcast %cst_32 : f32 to vector<16x128xf32>
    %51 = arith.subf %50, %29 : vector<16x128xf32>
    %52 = arith.mulf %51, %29 : vector<16x128xf32>
    %53 = math.exp %52 : vector<16x128xf32>
    %54 = arith.mulf %49, %53 : vector<16x128xf32>
    %cst_33 = arith.constant 1.000000e+00 : f32
    %55 = vector.broadcast %cst_33 : f32 to vector<16x128xf32>
    %56 = arith.subf %55, %54 : vector<16x128xf32>
    %57 = arith.mulf %28, %56 : vector<16x128xf32>
    %cst_34 = arith.constant 1.000000e+00 : f32
    %58 = vector.broadcast %cst_34 : f32 to vector<16x128xf32>
    %59 = arith.addf %58, %57 : vector<16x128xf32>
    %60 = arith.mulf %21, %59 : vector<16x128xf32>
    %61 = arith.truncf %60 : vector<16x128xf32> to vector<16x128xbf16>
    %c0_35 = arith.constant 0 : index
    %c0_36 = arith.constant 0 : index
    %c0_37 = arith.constant 0 : index
    %62 = vector.load %arg5[%c0_35, %c0_36, %c0_37] : memref<1x16x128xbf16, #tpu.memory_space<vmem>>, vector<1x16x128xbf16>
    %63 = vector.shape_cast %62 : vector<1x16x128xbf16> to vector<16x128xbf16>
    %64 = vector.shape_cast %61 : vector<16x128xbf16> to vector<1x16x128xbf16>
    tpu.vector_store %arg5[%c0_35, %c0_36, %c0_37], %64 {strides = array<i32>} : memref<1x16x128xbf16, #tpu.memory_space<vmem>>, vector<1x16x128xbf16>,
    return
  }
  func.func @transform_0(%arg0: i32, %arg1: i32) -> (i32, i32, i32) {
    %c0_i32 = arith.constant 0 : i32
    %c0_i32_0 = arith.constant 0 : i32
    %c0_i32_1 = arith.constant 0 : i32
    return %arg0, %c0_i32, %c0_i32_0 : i32, i32, i32
  }
  func.func @transform_1(%arg0: i32, %arg1: i32) -> (i32, i32, i32) {
    %c0_i32 = arith.constant 0 : i32
    %c0_i32_0 = arith.constant 0 : i32
    %c0_i32_1 = arith.constant 0 : i32
    return %c0_i32, %c0_i32_0, %arg1 : i32, i32, i32
  }
  func.func @transform_2(%arg0: i32, %arg1: i32) -> (i32, i32) {
    %c0_i32 = arith.constant 0 : i32
    %c0_i32_0 = arith.constant 0 : i32
    return %c0_i32, %arg1 : i32, i32
  }
  func.func @transform_3(%arg0: i32, %arg1: i32) -> (i32, i32, i32) {
    %c0_i32 = arith.constant 0 : i32
    %c0_i32_0 = arith.constant 0 : i32
    return %arg0, %c0_i32, %arg1 : i32, i32, i32
  }
}

module attributes {stable_mosaic.version = 11 : i64} {
  func.func @ln_qkv_kernel(%arg0: i32, %arg1: i32, %arg2: memref<1x8x128xbf16, #tpu.memory_space<vmem>>, %arg3: memref<1x128xf32, #tpu.memory_space<vmem>>, %arg4: memref<1x128xf32, #tpu.memory_space<vmem>>, %arg5: memref<128x384xbf16, #tpu.memory_space<vmem>>, %arg6: memref<1x384xf32, #tpu.memory_space<vmem>>, %arg7: memref<1x8x384xbf16, #tpu.memory_space<vmem>>) attributes {dimension_semantics = [#tpu.dimension_semantics<parallel>, #tpu.dimension_semantics<parallel>], iteration_bounds = array<i64: 2, 1>, scalar_prefetch = 0 : i64, scratch_operands = 0 : i64, tpu.core_type = #tpu.core_type<tc>, window_params = [{transform_indices = @transform_0, window_bounds = array<i64: 1, 8, 128>}, {pipeline_mode = #tpu.pipeline_mode<synchronous>, transform_indices = @transform_1, window_bounds = array<i64: 1, 128>}, {pipeline_mode = #tpu.pipeline_mode<synchronous>, transform_indices = @transform_2, window_bounds = array<i64: 1, 128>}, {pipeline_mode = #tpu.pipeline_mode<synchronous>, transform_indices = @transform_3, window_bounds = array<i64: 128, 384>}, {pipeline_mode = #tpu.pipeline_mode<synchronous>, transform_indices = @transform_4, window_bounds = array<i64: 1, 384>}, {transform_indices = @transform_5, window_bounds = array<i64: 1, 8, 384>}]} {
    %c0 = arith.constant 0 : index
    %c0_0 = arith.constant 0 : index
    %c0_1 = arith.constant 0 : index
    %0 = vector.load %arg2[%c0, %c0_0, %c0_1] : memref<1x8x128xbf16, #tpu.memory_space<vmem>>, vector<1x8x128xbf16>
    %1 = vector.shape_cast %0 : vector<1x8x128xbf16> to vector<8x128xbf16>
    %2 = arith.extf %1 : vector<8x128xbf16> to vector<8x128xf32>
    %c0_2 = arith.constant 0 : index
    %c0_3 = arith.constant 0 : index
    %3 = vector.load %arg3[%c0_2, %c0_3] : memref<1x128xf32, #tpu.memory_space<vmem>>, vector<1x128xf32>
    %c0_4 = arith.constant 0 : index
    %c0_5 = arith.constant 0 : index
    %4 = vector.load %arg4[%c0_4, %c0_5] : memref<1x128xf32, #tpu.memory_space<vmem>>, vector<1x128xf32>
    %cst = arith.constant dense<0.000000e+00> : vector<8xf32>
    %5 = vector.multi_reduction <add>, %2, %cst [1] : vector<8x128xf32> to vector<8xf32>
    %6 = vector.shape_cast %5 : vector<8xf32> to vector<8x1xf32>
    %cst_6 = arith.constant 1.280000e+02 : f32
    %7 = vector.broadcast %cst_6 : f32 to vector<8x1xf32>
    %8 = arith.divf %6, %7 : vector<8x1xf32>
    %9 = vector.broadcast %8 : vector<8x1xf32> to vector<8x128xf32>
    %10 = arith.subf %2, %9 : vector<8x128xf32>
    %11 = arith.mulf %10, %10 : vector<8x128xf32>
    %cst_7 = arith.constant dense<0.000000e+00> : vector<8xf32>
    %12 = vector.multi_reduction <add>, %11, %cst_7 [1] : vector<8x128xf32> to vector<8xf32>
    %13 = vector.shape_cast %12 : vector<8xf32> to vector<8x1xf32>
    %cst_8 = arith.constant 1.280000e+02 : f32
    %14 = vector.broadcast %cst_8 : f32 to vector<8x1xf32>
    %15 = arith.divf %13, %14 : vector<8x1xf32>
    %16 = vector.broadcast %8 : vector<8x1xf32> to vector<8x128xf32>
    %17 = arith.subf %2, %16 : vector<8x128xf32>
    %cst_9 = arith.constant 9.99999974E-6 : f32
    %18 = vector.broadcast %cst_9 : f32 to vector<8x1xf32>
    %19 = arith.addf %15, %18 : vector<8x1xf32>
    %20 = math.rsqrt %19 : vector<8x1xf32>
    %21 = vector.broadcast %20 : vector<8x1xf32> to vector<8x128xf32>
    %22 = arith.mulf %17, %21 : vector<8x128xf32>
    %23 = vector.broadcast %3 : vector<1x128xf32> to vector<8x128xf32>
    %24 = arith.mulf %22, %23 : vector<8x128xf32>
    %25 = vector.broadcast %4 : vector<1x128xf32> to vector<8x128xf32>
    %26 = arith.addf %24, %25 : vector<8x128xf32>
    %27 = arith.truncf %26 : vector<8x128xf32> to vector<8x128xbf16>
    %c0_10 = arith.constant 0 : index
    %c0_11 = arith.constant 0 : index
    %28 = vector.load %arg5[%c0_10, %c0_11] : memref<128x384xbf16, #tpu.memory_space<vmem>>, vector<128x384xbf16>
    %cst_12 = arith.constant dense<0.000000e+00> : vector<8x384xf32>
    %29 = tpu.matmul %27, %28, %cst_12 {dimension_numbers = #tpu.dot_dimension_numbers<[1], [0], [0], [1], [0, 0, 1, 1], [], []>} : vector<8x128xbf16>, vector<128x384xbf16>, vector<8x384xf32> -> vector<8x384xf32>
    %c0_13 = arith.constant 0 : index
    %c0_14 = arith.constant 0 : index
    %30 = vector.load %arg6[%c0_13, %c0_14] : memref<1x384xf32, #tpu.memory_space<vmem>>, vector<1x384xf32>
    %31 = vector.broadcast %30 : vector<1x384xf32> to vector<8x384xf32>
    %32 = arith.addf %29, %31 : vector<8x384xf32>
    %33 = arith.truncf %32 : vector<8x384xf32> to vector<8x384xbf16>
    %c0_15 = arith.constant 0 : index
    %c0_16 = arith.constant 0 : index
    %c0_17 = arith.constant 0 : index
    %34 = vector.load %arg7[%c0_15, %c0_16, %c0_17] : memref<1x8x384xbf16, #tpu.memory_space<vmem>>, vector<1x8x384xbf16>
    %35 = vector.shape_cast %34 : vector<1x8x384xbf16> to vector<8x384xbf16>
    %36 = vector.shape_cast %33 : vector<8x384xbf16> to vector<1x8x384xbf16>
    tpu.vector_store %arg7[%c0_15, %c0_16, %c0_17], %36 {strides = array<i32>} : memref<1x8x384xbf16, #tpu.memory_space<vmem>>, vector<1x8x384xbf16>,
    return
  }
  func.func @transform_0(%arg0: i32, %arg1: i32) -> (i32, i32, i32) {
    %c0_i32 = arith.constant 0 : i32
    %c0_i32_0 = arith.constant 0 : i32
    return %arg0, %arg1, %c0_i32 : i32, i32, i32
  }
  func.func @transform_1(%arg0: i32, %arg1: i32) -> (i32, i32) {
    %c0_i32 = arith.constant 0 : i32
    %c0_i32_0 = arith.constant 0 : i32
    %c0_i32_1 = arith.constant 0 : i32
    return %c0_i32, %c0_i32_0 : i32, i32
  }
  func.func @transform_2(%arg0: i32, %arg1: i32) -> (i32, i32) {
    %c0_i32 = arith.constant 0 : i32
    %c0_i32_0 = arith.constant 0 : i32
    %c0_i32_1 = arith.constant 0 : i32
    return %c0_i32, %c0_i32_0 : i32, i32
  }
  func.func @transform_3(%arg0: i32, %arg1: i32) -> (i32, i32) {
    %c0_i32 = arith.constant 0 : i32
    %c0_i32_0 = arith.constant 0 : i32
    %c0_i32_1 = arith.constant 0 : i32
    return %c0_i32, %c0_i32_0 : i32, i32
  }
  func.func @transform_4(%arg0: i32, %arg1: i32) -> (i32, i32) {
    %c0_i32 = arith.constant 0 : i32
    %c0_i32_0 = arith.constant 0 : i32
    %c0_i32_1 = arith.constant 0 : i32
    return %c0_i32, %c0_i32_0 : i32, i32
  }
  func.func @transform_5(%arg0: i32, %arg1: i32) -> (i32, i32, i32) {
    %c0_i32 = arith.constant 0 : i32
    %c0_i32_0 = arith.constant 0 : i32
    return %arg0, %arg1, %c0_i32 : i32, i32, i32
  }
}

module attributes {stable_mosaic.version = 11 : i64} {
  func.func @conv2_gelu_pos_kernel(%arg0: i32, %arg1: i32, %arg2: memref<1x9x128xbf16, #tpu.memory_space<vmem>>, %arg3: memref<1x9x128xbf16, #tpu.memory_space<vmem>>, %arg4: memref<3x128x128xbf16, #tpu.memory_space<vmem>>, %arg5: memref<1x128xf32, #tpu.memory_space<vmem>>, %arg6: memref<8x128xbf16, #tpu.memory_space<vmem>>, %arg7: memref<1x8x128xbf16, #tpu.memory_space<vmem>>) attributes {dimension_semantics = [#tpu.dimension_semantics<parallel>, #tpu.dimension_semantics<parallel>], iteration_bounds = array<i64: 2, 1>, scalar_prefetch = 0 : i64, scratch_operands = 0 : i64, tpu.core_type = #tpu.core_type<tc>, window_params = [{transform_indices = @transform_0, window_bounds = array<i64: 1, 9, 128>}, {transform_indices = @transform_1, window_bounds = array<i64: 1, 9, 128>}, {transform_indices = @transform_2, window_bounds = array<i64: 3, 128, 128>}, {transform_indices = @transform_3, window_bounds = array<i64: 1, 128>}, {transform_indices = @transform_4, window_bounds = array<i64: 8, 128>}, {transform_indices = @transform_5, window_bounds = array<i64: 1, 8, 128>}]} {
    %c0 = arith.constant 0 : index
    %c0_0 = arith.constant 0 : index
    %c0_1 = arith.constant 0 : index
    %0 = vector.load %arg2[%c0, %c0_0, %c0_1] : memref<1x9x128xbf16, #tpu.memory_space<vmem>>, vector<1x8x128xbf16>
    %1 = vector.shape_cast %0 : vector<1x8x128xbf16> to vector<8x128xbf16>
    %c0_2 = arith.constant 0 : index
    %c0_3 = arith.constant 0 : index
    %c0_4 = arith.constant 0 : index
    %2 = vector.load %arg4[%c0_2, %c0_3, %c0_4] : memref<3x128x128xbf16, #tpu.memory_space<vmem>>, vector<1x128x128xbf16>
    %3 = vector.shape_cast %2 : vector<1x128x128xbf16> to vector<128x128xbf16>
    %cst = arith.constant dense<0.000000e+00> : vector<8x128xf32>
    %4 = tpu.matmul %1, %3, %cst {dimension_numbers = #tpu.dot_dimension_numbers<[1], [0], [0], [1], [0, 0, 1, 1], [], []>} : vector<8x128xbf16>, vector<128x128xbf16>, vector<8x128xf32> -> vector<8x128xf32>
    %c0_5 = arith.constant 0 : index
    %c0_6 = arith.constant 0 : index
    %c0_7 = arith.constant 0 : index
    %5 = vector.load %arg3[%c0_5, %c0_6, %c0_7] : memref<1x9x128xbf16, #tpu.memory_space<vmem>>, vector<1x8x128xbf16>
    %6 = vector.shape_cast %5 : vector<1x8x128xbf16> to vector<8x128xbf16>
    %c1 = arith.constant 1 : index
    %c0_8 = arith.constant 0 : index
    %c0_9 = arith.constant 0 : index
    %7 = vector.load %arg4[%c1, %c0_8, %c0_9] : memref<3x128x128xbf16, #tpu.memory_space<vmem>>, vector<1x128x128xbf16>
    %8 = vector.shape_cast %7 : vector<1x128x128xbf16> to vector<128x128xbf16>
    %cst_10 = arith.constant dense<0.000000e+00> : vector<8x128xf32>
    %9 = tpu.matmul %6, %8, %cst_10 {dimension_numbers = #tpu.dot_dimension_numbers<[1], [0], [0], [1], [0, 0, 1, 1], [], []>} : vector<8x128xbf16>, vector<128x128xbf16>, vector<8x128xf32> -> vector<8x128xf32>
    %10 = arith.addf %4, %9 : vector<8x128xf32>
    %c0_11 = arith.constant 0 : index
    %c1_12 = arith.constant 1 : index
    %c0_13 = arith.constant 0 : index
    %11 = vector.load %arg2[%c0_11, %c1_12, %c0_13] : memref<1x9x128xbf16, #tpu.memory_space<vmem>>, vector<1x8x128xbf16>
    %12 = vector.shape_cast %11 : vector<1x8x128xbf16> to vector<8x128xbf16>
    %c2 = arith.constant 2 : index
    %c0_14 = arith.constant 0 : index
    %c0_15 = arith.constant 0 : index
    %13 = vector.load %arg4[%c2, %c0_14, %c0_15] : memref<3x128x128xbf16, #tpu.memory_space<vmem>>, vector<1x128x128xbf16>
    %14 = vector.shape_cast %13 : vector<1x128x128xbf16> to vector<128x128xbf16>
    %cst_16 = arith.constant dense<0.000000e+00> : vector<8x128xf32>
    %15 = tpu.matmul %12, %14, %cst_16 {dimension_numbers = #tpu.dot_dimension_numbers<[1], [0], [0], [1], [0, 0, 1, 1], [], []>} : vector<8x128xbf16>, vector<128x128xbf16>, vector<8x128xf32> -> vector<8x128xf32>
    %16 = arith.addf %10, %15 : vector<8x128xf32>
    %c0_17 = arith.constant 0 : index
    %c0_18 = arith.constant 0 : index
    %17 = vector.load %arg5[%c0_17, %c0_18] : memref<1x128xf32, #tpu.memory_space<vmem>>, vector<1x128xf32>
    %18 = vector.broadcast %17 : vector<1x128xf32> to vector<8x128xf32>
    %19 = arith.addf %16, %18 : vector<8x128xf32>
    %cst_19 = arith.constant 5.000000e-01 : f32
    %20 = vector.broadcast %cst_19 : f32 to vector<8x128xf32>
    %21 = arith.mulf %20, %19 : vector<8x128xf32>
    %cst_20 = arith.constant 0.707106769 : f32
    %22 = vector.broadcast %cst_20 : f32 to vector<8x128xf32>
    %23 = arith.mulf %19, %22 : vector<8x128xf32>
    %cst_21 = arith.constant 0.000000e+00 : f32
    %24 = vector.broadcast %cst_21 : f32 to vector<8x128xf32>
    %25 = arith.cmpf oge, %23, %24 : vector<8x128xf32>
    %cst_22 = arith.constant 1.000000e+00 : f32
    %cst_23 = arith.constant -1.000000e+00 : f32
    %26 = vector.broadcast %cst_22 : f32 to vector<8x128xf32>
    %27 = vector.broadcast %cst_23 : f32 to vector<8x128xf32>
    %28 = arith.select %25, %26, %27 : vector<8x128xi1>, vector<8x128xf32>
    %29 = math.absf %23 : vector<8x128xf32>
    %cst_24 = arith.constant 0.327591091 : f32
    %30 = vector.broadcast %cst_24 : f32 to vector<8x128xf32>
    %31 = arith.mulf %30, %29 : vector<8x128xf32>
    %cst_25 = arith.constant 1.000000e+00 : f32
    %32 = vector.broadcast %cst_25 : f32 to vector<8x128xf32>
    %33 = arith.addf %32, %31 : vector<8x128xf32>
    %cst_26 = arith.constant 1.000000e+00 : f32
    %34 = vector.broadcast %cst_26 : f32 to vector<8x128xf32>
    %35 = arith.divf %34, %33 : vector<8x128xf32>
    %cst_27 = arith.constant 1.06140542 : f32
    %36 = vector.broadcast %cst_27 : f32 to vector<8x128xf32>
    %37 = arith.mulf %35, %36 : vector<8x128xf32>
    %cst_28 = arith.constant -1.45315206 : f32
    %38 = vector.broadcast %cst_28 : f32 to vector<8x128xf32>
    %39 = arith.addf %38, %37 : vector<8x128xf32>
    %40 = arith.mulf %35, %39 : vector<8x128xf32>
    %cst_29 = arith.constant 1.42141378 : f32
    %41 = vector.broadcast %cst_29 : f32 to vector<8x128xf32>
    %42 = arith.addf %41, %40 : vector<8x128xf32>
    %43 = arith.mulf %35, %42 : vector<8x128xf32>
    %cst_30 = arith.constant -0.284496725 : f32
    %44 = vector.broadcast %cst_30 : f32 to vector<8x128xf32>
    %45 = arith.addf %44, %43 : vector<8x128xf32>
    %46 = arith.mulf %35, %45 : vector<8x128xf32>
    %cst_31 = arith.constant 0.254829586 : f32
    %47 = vector.broadcast %cst_31 : f32 to vector<8x128xf32>
    %48 = arith.addf %47, %46 : vector<8x128xf32>
    %49 = arith.mulf %35, %48 : vector<8x128xf32>
    %cst_32 = arith.constant 0.000000e+00 : f32
    %50 = vector.broadcast %cst_32 : f32 to vector<8x128xf32>
    %51 = arith.subf %50, %29 : vector<8x128xf32>
    %52 = arith.mulf %51, %29 : vector<8x128xf32>
    %53 = math.exp %52 : vector<8x128xf32>
    %54 = arith.mulf %49, %53 : vector<8x128xf32>
    %cst_33 = arith.constant 1.000000e+00 : f32
    %55 = vector.broadcast %cst_33 : f32 to vector<8x128xf32>
    %56 = arith.subf %55, %54 : vector<8x128xf32>
    %57 = arith.mulf %28, %56 : vector<8x128xf32>
    %cst_34 = arith.constant 1.000000e+00 : f32
    %58 = vector.broadcast %cst_34 : f32 to vector<8x128xf32>
    %59 = arith.addf %58, %57 : vector<8x128xf32>
    %60 = arith.mulf %21, %59 : vector<8x128xf32>
    %c0_35 = arith.constant 0 : index
    %c0_36 = arith.constant 0 : index
    %61 = vector.load %arg6[%c0_35, %c0_36] : memref<8x128xbf16, #tpu.memory_space<vmem>>, vector<8x128xbf16>
    %62 = arith.extf %61 : vector<8x128xbf16> to vector<8x128xf32>
    %63 = arith.addf %60, %62 : vector<8x128xf32>
    %64 = arith.truncf %63 : vector<8x128xf32> to vector<8x128xbf16>
    %c0_37 = arith.constant 0 : index
    %c0_38 = arith.constant 0 : index
    %c0_39 = arith.constant 0 : index
    %65 = vector.load %arg7[%c0_37, %c0_38, %c0_39] : memref<1x8x128xbf16, #tpu.memory_space<vmem>>, vector<1x8x128xbf16>
    %66 = vector.shape_cast %65 : vector<1x8x128xbf16> to vector<8x128xbf16>
    %67 = vector.shape_cast %64 : vector<8x128xbf16> to vector<1x8x128xbf16>
    tpu.vector_store %arg7[%c0_37, %c0_38, %c0_39], %67 {strides = array<i32>} : memref<1x8x128xbf16, #tpu.memory_space<vmem>>, vector<1x8x128xbf16>,
    return
  }
  func.func @transform_0(%arg0: i32, %arg1: i32) -> (i32, i32, i32) {
    %c0_i32 = arith.constant 0 : i32
    %c0_i32_0 = arith.constant 0 : i32
    %c0_i32_1 = arith.constant 0 : i32
    return %arg0, %c0_i32, %c0_i32_0 : i32, i32, i32
  }
  func.func @transform_1(%arg0: i32, %arg1: i32) -> (i32, i32, i32) {
    %c0_i32 = arith.constant 0 : i32
    %c0_i32_0 = arith.constant 0 : i32
    %c0_i32_1 = arith.constant 0 : i32
    return %arg0, %c0_i32, %c0_i32_0 : i32, i32, i32
  }
  func.func @transform_2(%arg0: i32, %arg1: i32) -> (i32, i32, i32) {
    %c0_i32 = arith.constant 0 : i32
    %c0_i32_0 = arith.constant 0 : i32
    %c0_i32_1 = arith.constant 0 : i32
    return %c0_i32, %c0_i32_0, %arg1 : i32, i32, i32
  }
  func.func @transform_3(%arg0: i32, %arg1: i32) -> (i32, i32) {
    %c0_i32 = arith.constant 0 : i32
    %c0_i32_0 = arith.constant 0 : i32
    return %c0_i32, %arg1 : i32, i32
  }
  func.func @transform_4(%arg0: i32, %arg1: i32) -> (i32, i32) {
    %c0_i32 = arith.constant 0 : i32
    %c0_i32_0 = arith.constant 0 : i32
    return %c0_i32, %arg1 : i32, i32
  }
  func.func @transform_5(%arg0: i32, %arg1: i32) -> (i32, i32, i32) {
    %c0_i32 = arith.constant 0 : i32
    %c0_i32_0 = arith.constant 0 : i32
    return %arg0, %c0_i32, %arg1 : i32, i32, i32
  }
}

module attributes {stable_mosaic.version = 11 : i64} {
  func.func @flash_attn_kernel(%arg0: i32, %arg1: i32, %arg2: i32, %arg3: i32, %arg4: memref<1x8x128xbf16, #tpu.memory_space<vmem>>, %arg5: memref<1x8x128xbf16, #tpu.memory_space<vmem>>, %arg6: memref<1x8x128xbf16, #tpu.memory_space<vmem>>, %arg7: memref<1x8x128xbf16, #tpu.memory_space<vmem>>, %arg8: memref<4x8x1xf32, #tpu.memory_space<vmem>>, %arg9: memref<4x8x1xf32, #tpu.memory_space<vmem>>, %arg10: memref<4x8x32xf32, #tpu.memory_space<vmem>>) attributes {dimension_semantics = [#tpu.dimension_semantics<parallel>, #tpu.dimension_semantics<parallel>, #tpu.dimension_semantics<parallel>, #tpu.dimension_semantics<arbitrary>], iteration_bounds = array<i64: 2, 1, 1, 1>, scalar_prefetch = 0 : i64, scratch_operands = 3 : i64, tpu.core_type = #tpu.core_type<tc>, window_params = [{transform_indices = @transform_0, window_bounds = array<i64: 1, 8, 128>}, {transform_indices = @transform_1, window_bounds = array<i64: 1, 8, 128>}, {transform_indices = @transform_2, window_bounds = array<i64: 1, 8, 128>}, {transform_indices = @transform_3, window_bounds = array<i64: 1, 8, 128>}]} {
    %c0_i32 = arith.constant 0 : i32
    %0 = arith.cmpi eq, %arg3, %c0_i32 : i32
    %1 = arith.extui %0 : i1 to i32
    %c0_i32_0 = arith.constant 0 : i32
    %2 = arith.cmpi ne, %1, %c0_i32_0 : i32
    scf.if %2 {
      %cst_35 = arith.constant 0xFF800000 : f32
      %50 = vector.broadcast %cst_35 : f32 to vector<4x8x1xf32>
      %c0_36 = arith.constant 0 : index
      %c0_37 = arith.constant 0 : index
      %c0_38 = arith.constant 0 : index
      %51 = vector.load %arg8[%c0_36, %c0_37, %c0_38] : memref<4x8x1xf32, #tpu.memory_space<vmem>>, vector<4x8x1xf32>
      tpu.vector_store %arg8[%c0_36, %c0_37, %c0_38], %50 {strides = array<i32>} : memref<4x8x1xf32, #tpu.memory_space<vmem>>, vector<4x8x1xf32>,
      %cst_39 = arith.constant 0.000000e+00 : f32
      %52 = vector.broadcast %cst_39 : f32 to vector<4x8x1xf32>
      %c0_40 = arith.constant 0 : index
      %c0_41 = arith.constant 0 : index
      %c0_42 = arith.constant 0 : index
      %53 = vector.load %arg9[%c0_40, %c0_41, %c0_42] : memref<4x8x1xf32, #tpu.memory_space<vmem>>, vector<4x8x1xf32>
      tpu.vector_store %arg9[%c0_40, %c0_41, %c0_42], %52 {strides = array<i32>} : memref<4x8x1xf32, #tpu.memory_space<vmem>>, vector<4x8x1xf32>,
      %cst_43 = arith.constant 0.000000e+00 : f32
      %54 = vector.broadcast %cst_43 : f32 to vector<4x8x32xf32>
      %c0_44 = arith.constant 0 : index
      %c0_45 = arith.constant 0 : index
      %c0_46 = arith.constant 0 : index
      %55 = vector.load %arg10[%c0_44, %c0_45, %c0_46] : memref<4x8x32xf32, #tpu.memory_space<vmem>>, vector<4x8x32xf32>
      tpu.vector_store %arg10[%c0_44, %c0_45, %c0_46], %54 {strides = array<i32>} : memref<4x8x32xf32, #tpu.memory_space<vmem>>, vector<4x8x32xf32>,
    } else {
    }
    %c0 = arith.constant 0 : index
    %c0_1 = arith.constant 0 : index
    %c0_2 = arith.constant 0 : index
    %3 = vector.load %arg4[%c0, %c0_1, %c0_2] : memref<1x8x128xbf16, #tpu.memory_space<vmem>>, vector<1x8x128xbf16>
    %4 = vector.shape_cast %3 : vector<1x8x128xbf16> to vector<8x128xbf16>
    %5 = vector.shape_cast %4 : vector<8x128xbf16> to vector<8x4x32xbf16>
    %c0_3 = arith.constant 0 : index
    %c0_4 = arith.constant 0 : index
    %c0_5 = arith.constant 0 : index
    %6 = vector.load %arg5[%c0_3, %c0_4, %c0_5] : memref<1x8x128xbf16, #tpu.memory_space<vmem>>, vector<1x8x128xbf16>
    %7 = vector.shape_cast %6 : vector<1x8x128xbf16> to vector<8x128xbf16>
    %8 = vector.shape_cast %7 : vector<8x128xbf16> to vector<8x4x32xbf16>
    %c0_6 = arith.constant 0 : index
    %c0_7 = arith.constant 0 : index
    %c0_8 = arith.constant 0 : index
    %9 = vector.load %arg6[%c0_6, %c0_7, %c0_8] : memref<1x8x128xbf16, #tpu.memory_space<vmem>>, vector<1x8x128xbf16>
    %10 = vector.shape_cast %9 : vector<1x8x128xbf16> to vector<8x128xbf16>
    %11 = vector.shape_cast %10 : vector<8x128xbf16> to vector<8x4x32xbf16>
    "tpu.trace_start"() <{level = 10 : i32, message = "qhd,khd->hqk"}> : () -> ()
    %cst = arith.constant dense<0.000000e+00> : vector<4x8x8xf32>
    %12 = tpu.matmul %5, %8, %cst {dimension_numbers = #tpu.dot_dimension_numbers<[2], [2], [0], [0], [0, 1, 0, 0, 1, 0], [1], [1]>} : vector<8x4x32xbf16>, vector<8x4x32xbf16>, vector<4x8x8xf32> -> vector<4x8x8xf32>
    "tpu.trace_stop"() : () -> ()
    %c8_i32 = arith.constant 8 : i32
    %13 = arith.muli %arg3, %c8_i32 : i32
    %14 = tpu.iota {dimensions = array<i32: 2>} : vector<1x1x8xi32>
    %15 = vector.broadcast %13 : i32 to vector<1x1x8xi32>
    %16 = arith.addi %15, %14 : vector<1x1x8xi32>
    %c8_i32_9 = arith.constant 8 : i32
    %17 = vector.broadcast %c8_i32_9 : i32 to vector<1x1x8xi32>
    %18 = arith.cmpi slt, %16, %17 : vector<1x1x8xi32>
    %cst_10 = arith.constant 0.000000e+00 : f32
    %cst_11 = arith.constant -1.000000e+30 : f32
    %19 = vector.broadcast %cst_10 : f32 to vector<1x1x8xf32>
    %20 = vector.broadcast %cst_11 : f32 to vector<1x1x8xf32>
    %21 = arith.select %18, %19, %20 : vector<1x1x8xi1>, vector<1x1x8xf32>
    %22 = vector.broadcast %21 : vector<1x1x8xf32> to vector<4x8x8xf32>
    %23 = arith.addf %12, %22 : vector<4x8x8xf32>
    %c0_12 = arith.constant 0 : index
    %c0_13 = arith.constant 0 : index
    %c0_14 = arith.constant 0 : index
    %24 = vector.load %arg8[%c0_12, %c0_13, %c0_14] : memref<4x8x1xf32, #tpu.memory_space<vmem>>, vector<4x8x1xf32>
    %cst_15 = arith.constant dense<0xFF800000> : vector<4x8xf32>
    %25 = vector.multi_reduction <maximumf>, %23, %cst_15 [2] : vector<4x8x8xf32> to vector<4x8xf32>
    %26 = vector.shape_cast %25 : vector<4x8xf32> to vector<4x8x1xf32>
    %27 = arith.maximumf %24, %26 : vector<4x8x1xf32>
    %28 = arith.subf %24, %27 : vector<4x8x1xf32>
    %29 = math.exp %28 : vector<4x8x1xf32>
    %30 = vector.broadcast %27 : vector<4x8x1xf32> to vector<4x8x8xf32>
    %31 = arith.subf %23, %30 : vector<4x8x8xf32>
    %32 = math.exp %31 : vector<4x8x8xf32>
    %c0_16 = arith.constant 0 : index
    %c0_17 = arith.constant 0 : index
    %c0_18 = arith.constant 0 : index
    %33 = vector.load %arg9[%c0_16, %c0_17, %c0_18] : memref<4x8x1xf32, #tpu.memory_space<vmem>>, vector<4x8x1xf32>
    %34 = arith.mulf %29, %33 : vector<4x8x1xf32>
    %cst_19 = arith.constant dense<0.000000e+00> : vector<4x8xf32>
    %35 = vector.multi_reduction <add>, %32, %cst_19 [2] : vector<4x8x8xf32> to vector<4x8xf32>
    %36 = vector.shape_cast %35 : vector<4x8xf32> to vector<4x8x1xf32>
    %37 = arith.addf %34, %36 : vector<4x8x1xf32>
    %c0_20 = arith.constant 0 : index
    %c0_21 = arith.constant 0 : index
    %c0_22 = arith.constant 0 : index
    %38 = vector.load %arg9[%c0_20, %c0_21, %c0_22] : memref<4x8x1xf32, #tpu.memory_space<vmem>>, vector<4x8x1xf32>
    tpu.vector_store %arg9[%c0_20, %c0_21, %c0_22], %37 {strides = array<i32>} : memref<4x8x1xf32, #tpu.memory_space<vmem>>, vector<4x8x1xf32>,
    %c0_23 = arith.constant 0 : index
    %c0_24 = arith.constant 0 : index
    %c0_25 = arith.constant 0 : index
    %39 = vector.load %arg10[%c0_23, %c0_24, %c0_25] : memref<4x8x32xf32, #tpu.memory_space<vmem>>, vector<4x8x32xf32>
    %40 = vector.broadcast %29 : vector<4x8x1xf32> to vector<4x8x32xf32>
    %41 = arith.mulf %40, %39 : vector<4x8x32xf32>
    %42 = arith.truncf %32 : vector<4x8x8xf32> to vector<4x8x8xbf16>
    "tpu.trace_start"() <{level = 10 : i32, message = "hqk,khd->hqd"}> : () -> ()
    %cst_26 = arith.constant dense<0.000000e+00> : vector<4x8x32xf32>
    %43 = tpu.matmul %42, %11, %cst_26 {dimension_numbers = #tpu.dot_dimension_numbers<[2], [0], [1], [2], [0, 0, 0, 1, 1, 2], [0], [1]>} : vector<4x8x8xbf16>, vector<8x4x32xbf16>, vector<4x8x32xf32> -> vector<4x8x32xf32>
    "tpu.trace_stop"() : () -> ()
    %44 = arith.addf %41, %43 : vector<4x8x32xf32>
    %c0_27 = arith.constant 0 : index
    %c0_28 = arith.constant 0 : index
    %c0_29 = arith.constant 0 : index
    %45 = vector.load %arg10[%c0_27, %c0_28, %c0_29] : memref<4x8x32xf32, #tpu.memory_space<vmem>>, vector<4x8x32xf32>
    tpu.vector_store %arg10[%c0_27, %c0_28, %c0_29], %44 {strides = array<i32>} : memref<4x8x32xf32, #tpu.memory_space<vmem>>, vector<4x8x32xf32>,
    %c0_30 = arith.constant 0 : index
    %c0_31 = arith.constant 0 : index
    %c0_32 = arith.constant 0 : index
    %46 = vector.load %arg8[%c0_30, %c0_31, %c0_32] : memref<4x8x1xf32, #tpu.memory_space<vmem>>, vector<4x8x1xf32>
    tpu.vector_store %arg8[%c0_30, %c0_31, %c0_32], %27 {strides = array<i32>} : memref<4x8x1xf32, #tpu.memory_space<vmem>>, vector<4x8x1xf32>,
    %c0_i32_33 = arith.constant 0 : i32
    %47 = arith.cmpi eq, %arg3, %c0_i32_33 : i32
    %48 = arith.extui %47 : i1 to i32
    %c0_i32_34 = arith.constant 0 : i32
    %49 = arith.cmpi ne, %48, %c0_i32_34 : i32
    scf.if %49 {
      %c0_35 = arith.constant 0 : index
      %c0_36 = arith.constant 0 : index
      %c0_37 = arith.constant 0 : index
      %50 = vector.load %arg9[%c0_35, %c0_36, %c0_37] : memref<4x8x1xf32, #tpu.memory_space<vmem>>, vector<4x8x1xf32>
      %51 = tpu.reciprocal %50 {approx = true} : vector<4x8x1xf32> -> vector<4x8x1xf32>
      %c0_38 = arith.constant 0 : index
      %c0_39 = arith.constant 0 : index
      %c0_40 = arith.constant 0 : index
      %52 = vector.load %arg10[%c0_38, %c0_39, %c0_40] : memref<4x8x32xf32, #tpu.memory_space<vmem>>, vector<4x8x32xf32>
      %53 = vector.broadcast %51 : vector<4x8x1xf32> to vector<4x8x32xf32>
      %54 = arith.mulf %52, %53 : vector<4x8x32xf32>
      %55 = tpu.transpose %54, [1, 0, 2] : vector<4x8x32xf32> -> vector<8x4x32xf32>
      %56 = vector.shape_cast %55 : vector<8x4x32xf32> to vector<8x128xf32>
      %57 = arith.truncf %56 : vector<8x128xf32> to vector<8x128xbf16>
      %c0_41 = arith.constant 0 : index
      %c0_42 = arith.constant 0 : index
      %c0_43 = arith.constant 0 : index
      %58 = vector.load %arg7[%c0_41, %c0_42, %c0_43] : memref<1x8x128xbf16, #tpu.memory_space<vmem>>, vector<1x8x128xbf16>
      %59 = vector.shape_cast %58 : vector<1x8x128xbf16> to vector<8x128xbf16>
      %60 = vector.shape_cast %57 : vector<8x128xbf16> to vector<1x8x128xbf16>
      tpu.vector_store %arg7[%c0_41, %c0_42, %c0_43], %60 {strides = array<i32>} : memref<1x8x128xbf16, #tpu.memory_space<vmem>>, vector<1x8x128xbf16>,
    } else {
    }
    return
  }
  func.func @transform_0(%arg0: i32, %arg1: i32, %arg2: i32, %arg3: i32) -> (i32, i32, i32) {
    %c0_i32 = arith.constant 0 : i32
    return %arg0, %arg2, %arg1 : i32, i32, i32
  }
  func.func @transform_1(%arg0: i32, %arg1: i32, %arg2: i32, %arg3: i32) -> (i32, i32, i32) {
    %c1_i32 = arith.constant 1 : i32
    %0 = arith.addi %c1_i32, %arg1 : i32
    %c0_i32 = arith.constant 0 : i32
    return %arg0, %arg3, %0 : i32, i32, i32
  }
  func.func @transform_2(%arg0: i32, %arg1: i32, %arg2: i32, %arg3: i32) -> (i32, i32, i32) {
    %c2_i32 = arith.constant 2 : i32
    %0 = arith.addi %c2_i32, %arg1 : i32
    %c0_i32 = arith.constant 0 : i32
    return %arg0, %arg3, %0 : i32, i32, i32
  }
  func.func @transform_3(%arg0: i32, %arg1: i32, %arg2: i32, %arg3: i32) -> (i32, i32, i32) {
    %c0_i32 = arith.constant 0 : i32
    return %arg0, %arg2, %arg1 : i32, i32, i32
  }
}

module attributes {stable_mosaic.version = 11 : i64} {
  func.func @out_proj_residual_kernel(%arg0: i32, %arg1: i32, %arg2: memref<1x8x128xbf16, #tpu.memory_space<vmem>>, %arg3: memref<1x8x128xbf16, #tpu.memory_space<vmem>>, %arg4: memref<128x128xbf16, #tpu.memory_space<vmem>>, %arg5: memref<1x128xf32, #tpu.memory_space<vmem>>, %arg6: memref<1x8x128xbf16, #tpu.memory_space<vmem>>) attributes {dimension_semantics = [#tpu.dimension_semantics<parallel>, #tpu.dimension_semantics<parallel>], iteration_bounds = array<i64: 2, 1>, scalar_prefetch = 0 : i64, scratch_operands = 0 : i64, tpu.core_type = #tpu.core_type<tc>, window_params = [{transform_indices = @transform_0, window_bounds = array<i64: 1, 8, 128>}, {transform_indices = @transform_1, window_bounds = array<i64: 1, 8, 128>}, {pipeline_mode = #tpu.pipeline_mode<synchronous>, transform_indices = @transform_2, window_bounds = array<i64: 128, 128>}, {pipeline_mode = #tpu.pipeline_mode<synchronous>, transform_indices = @transform_3, window_bounds = array<i64: 1, 128>}, {transform_indices = @transform_4, window_bounds = array<i64: 1, 8, 128>}]} {
    %c0 = arith.constant 0 : index
    %c0_0 = arith.constant 0 : index
    %c0_1 = arith.constant 0 : index
    %0 = vector.load %arg3[%c0, %c0_0, %c0_1] : memref<1x8x128xbf16, #tpu.memory_space<vmem>>, vector<1x8x128xbf16>
    %1 = vector.shape_cast %0 : vector<1x8x128xbf16> to vector<8x128xbf16>
    %c0_2 = arith.constant 0 : index
    %c0_3 = arith.constant 0 : index
    %2 = vector.load %arg4[%c0_2, %c0_3] : memref<128x128xbf16, #tpu.memory_space<vmem>>, vector<128x128xbf16>
    %cst = arith.constant dense<0.000000e+00> : vector<8x128xf32>
    %3 = tpu.matmul %1, %2, %cst {dimension_numbers = #tpu.dot_dimension_numbers<[1], [0], [0], [1], [0, 0, 1, 1], [], []>} : vector<8x128xbf16>, vector<128x128xbf16>, vector<8x128xf32> -> vector<8x128xf32>
    %c0_4 = arith.constant 0 : index
    %c0_5 = arith.constant 0 : index
    %4 = vector.load %arg5[%c0_4, %c0_5] : memref<1x128xf32, #tpu.memory_space<vmem>>, vector<1x128xf32>
    %5 = vector.broadcast %4 : vector<1x128xf32> to vector<8x128xf32>
    %6 = arith.addf %3, %5 : vector<8x128xf32>
    %c0_6 = arith.constant 0 : index
    %c0_7 = arith.constant 0 : index
    %c0_8 = arith.constant 0 : index
    %7 = vector.load %arg2[%c0_6, %c0_7, %c0_8] : memref<1x8x128xbf16, #tpu.memory_space<vmem>>, vector<1x8x128xbf16>
    %8 = vector.shape_cast %7 : vector<1x8x128xbf16> to vector<8x128xbf16>
    %9 = arith.extf %8 : vector<8x128xbf16> to vector<8x128xf32>
    %10 = arith.addf %9, %6 : vector<8x128xf32>
    %11 = arith.truncf %10 : vector<8x128xf32> to vector<8x128xbf16>
    %c0_9 = arith.constant 0 : index
    %c0_10 = arith.constant 0 : index
    %c0_11 = arith.constant 0 : index
    %12 = vector.load %arg6[%c0_9, %c0_10, %c0_11] : memref<1x8x128xbf16, #tpu.memory_space<vmem>>, vector<1x8x128xbf16>
    %13 = vector.shape_cast %12 : vector<1x8x128xbf16> to vector<8x128xbf16>
    %14 = vector.shape_cast %11 : vector<8x128xbf16> to vector<1x8x128xbf16>
    tpu.vector_store %arg6[%c0_9, %c0_10, %c0_11], %14 {strides = array<i32>} : memref<1x8x128xbf16, #tpu.memory_space<vmem>>, vector<1x8x128xbf16>,
    return
  }
  func.func @transform_0(%arg0: i32, %arg1: i32) -> (i32, i32, i32) {
    %c0_i32 = arith.constant 0 : i32
    %c0_i32_0 = arith.constant 0 : i32
    return %arg0, %arg1, %c0_i32 : i32, i32, i32
  }
  func.func @transform_1(%arg0: i32, %arg1: i32) -> (i32, i32, i32) {
    %c0_i32 = arith.constant 0 : i32
    %c0_i32_0 = arith.constant 0 : i32
    return %arg0, %arg1, %c0_i32 : i32, i32, i32
  }
  func.func @transform_2(%arg0: i32, %arg1: i32) -> (i32, i32) {
    %c0_i32 = arith.constant 0 : i32
    %c0_i32_0 = arith.constant 0 : i32
    %c0_i32_1 = arith.constant 0 : i32
    return %c0_i32, %c0_i32_0 : i32, i32
  }
  func.func @transform_3(%arg0: i32, %arg1: i32) -> (i32, i32) {
    %c0_i32 = arith.constant 0 : i32
    %c0_i32_0 = arith.constant 0 : i32
    %c0_i32_1 = arith.constant 0 : i32
    return %c0_i32, %c0_i32_0 : i32, i32
  }
  func.func @transform_4(%arg0: i32, %arg1: i32) -> (i32, i32, i32) {
    %c0_i32 = arith.constant 0 : i32
    %c0_i32_0 = arith.constant 0 : i32
    return %arg0, %arg1, %c0_i32 : i32, i32, i32
  }
}

module attributes {stable_mosaic.version = 11 : i64} {
  func.func @ln_kernel(%arg0: i32, %arg1: i32, %arg2: memref<1x8x128xbf16, #tpu.memory_space<vmem>>, %arg3: memref<1x128xf32, #tpu.memory_space<vmem>>, %arg4: memref<1x128xf32, #tpu.memory_space<vmem>>, %arg5: memref<1x8x128xf32, #tpu.memory_space<vmem>>) attributes {dimension_semantics = [#tpu.dimension_semantics<parallel>, #tpu.dimension_semantics<parallel>], iteration_bounds = array<i64: 2, 1>, scalar_prefetch = 0 : i64, scratch_operands = 0 : i64, tpu.core_type = #tpu.core_type<tc>, window_params = [{transform_indices = @transform_0, window_bounds = array<i64: 1, 8, 128>}, {pipeline_mode = #tpu.pipeline_mode<synchronous>, transform_indices = @transform_1, window_bounds = array<i64: 1, 128>}, {pipeline_mode = #tpu.pipeline_mode<synchronous>, transform_indices = @transform_2, window_bounds = array<i64: 1, 128>}, {transform_indices = @transform_3, window_bounds = array<i64: 1, 8, 128>}]} {
    %c0 = arith.constant 0 : index
    %c0_0 = arith.constant 0 : index
    %c0_1 = arith.constant 0 : index
    %0 = vector.load %arg2[%c0, %c0_0, %c0_1] : memref<1x8x128xbf16, #tpu.memory_space<vmem>>, vector<1x8x128xbf16>
    %1 = vector.shape_cast %0 : vector<1x8x128xbf16> to vector<8x128xbf16>
    %2 = arith.extf %1 : vector<8x128xbf16> to vector<8x128xf32>
    %c0_2 = arith.constant 0 : index
    %c0_3 = arith.constant 0 : index
    %3 = vector.load %arg3[%c0_2, %c0_3] : memref<1x128xf32, #tpu.memory_space<vmem>>, vector<1x128xf32>
    %c0_4 = arith.constant 0 : index
    %c0_5 = arith.constant 0 : index
    %4 = vector.load %arg4[%c0_4, %c0_5] : memref<1x128xf32, #tpu.memory_space<vmem>>, vector<1x128xf32>
    %cst = arith.constant dense<0.000000e+00> : vector<8xf32>
    %5 = vector.multi_reduction <add>, %2, %cst [1] : vector<8x128xf32> to vector<8xf32>
    %6 = vector.shape_cast %5 : vector<8xf32> to vector<8x1xf32>
    %cst_6 = arith.constant 1.280000e+02 : f32
    %7 = vector.broadcast %cst_6 : f32 to vector<8x1xf32>
    %8 = arith.divf %6, %7 : vector<8x1xf32>
    %9 = vector.broadcast %8 : vector<8x1xf32> to vector<8x128xf32>
    %10 = arith.subf %2, %9 : vector<8x128xf32>
    %11 = arith.mulf %10, %10 : vector<8x128xf32>
    %cst_7 = arith.constant dense<0.000000e+00> : vector<8xf32>
    %12 = vector.multi_reduction <add>, %11, %cst_7 [1] : vector<8x128xf32> to vector<8xf32>
    %13 = vector.shape_cast %12 : vector<8xf32> to vector<8x1xf32>
    %cst_8 = arith.constant 1.280000e+02 : f32
    %14 = vector.broadcast %cst_8 : f32 to vector<8x1xf32>
    %15 = arith.divf %13, %14 : vector<8x1xf32>
    %16 = vector.broadcast %8 : vector<8x1xf32> to vector<8x128xf32>
    %17 = arith.subf %2, %16 : vector<8x128xf32>
    %cst_9 = arith.constant 9.99999974E-6 : f32
    %18 = vector.broadcast %cst_9 : f32 to vector<8x1xf32>
    %19 = arith.addf %15, %18 : vector<8x1xf32>
    %20 = math.rsqrt %19 : vector<8x1xf32>
    %21 = vector.broadcast %20 : vector<8x1xf32> to vector<8x128xf32>
    %22 = arith.mulf %17, %21 : vector<8x128xf32>
    %23 = vector.broadcast %3 : vector<1x128xf32> to vector<8x128xf32>
    %24 = arith.mulf %22, %23 : vector<8x128xf32>
    %25 = vector.broadcast %4 : vector<1x128xf32> to vector<8x128xf32>
    %26 = arith.addf %24, %25 : vector<8x128xf32>
    %c0_10 = arith.constant 0 : index
    %c0_11 = arith.constant 0 : index
    %c0_12 = arith.constant 0 : index
    %27 = vector.load %arg5[%c0_10, %c0_11, %c0_12] : memref<1x8x128xf32, #tpu.memory_space<vmem>>, vector<1x8x128xf32>
    %28 = vector.shape_cast %27 : vector<1x8x128xf32> to vector<8x128xf32>
    %29 = vector.shape_cast %26 : vector<8x128xf32> to vector<1x8x128xf32>
    tpu.vector_store %arg5[%c0_10, %c0_11, %c0_12], %29 {strides = array<i32>} : memref<1x8x128xf32, #tpu.memory_space<vmem>>, vector<1x8x128xf32>,
    return
  }
  func.func @transform_0(%arg0: i32, %arg1: i32) -> (i32, i32, i32) {
    %c0_i32 = arith.constant 0 : i32
    %c0_i32_0 = arith.constant 0 : i32
    return %arg0, %arg1, %c0_i32 : i32, i32, i32
  }
  func.func @transform_1(%arg0: i32, %arg1: i32) -> (i32, i32) {
    %c0_i32 = arith.constant 0 : i32
    %c0_i32_0 = arith.constant 0 : i32
    %c0_i32_1 = arith.constant 0 : i32
    return %c0_i32, %c0_i32_0 : i32, i32
  }
  func.func @transform_2(%arg0: i32, %arg1: i32) -> (i32, i32) {
    %c0_i32 = arith.constant 0 : i32
    %c0_i32_0 = arith.constant 0 : i32
    %c0_i32_1 = arith.constant 0 : i32
    return %c0_i32, %c0_i32_0 : i32, i32
  }
  func.func @transform_3(%arg0: i32, %arg1: i32) -> (i32, i32, i32) {
    %c0_i32 = arith.constant 0 : i32
    %c0_i32_0 = arith.constant 0 : i32
    return %arg0, %arg1, %c0_i32 : i32, i32, i32
  }
}

module attributes {stable_mosaic.version = 11 : i64} {
  func.func @ln_mlp_residual_kernel(%arg0: i32, %arg1: i32, %arg2: i32, %arg3: memref<1x8x128xbf16, #tpu.memory_space<vmem>>, %arg4: memref<1x128xf32, #tpu.memory_space<vmem>>, %arg5: memref<1x128xf32, #tpu.memory_space<vmem>>, %arg6: memref<128x512xbf16, #tpu.memory_space<vmem>>, %arg7: memref<1x512xf32, #tpu.memory_space<vmem>>, %arg8: memref<512x128xbf16, #tpu.memory_space<vmem>>, %arg9: memref<1x128xf32, #tpu.memory_space<vmem>>, %arg10: memref<1x8x128xbf16, #tpu.memory_space<vmem>>, %arg11: memref<8x128xbf16, #tpu.memory_space<vmem>>, %arg12: memref<8x128xf32, #tpu.memory_space<vmem>>) attributes {dimension_semantics = [#tpu.dimension_semantics<parallel>, #tpu.dimension_semantics<parallel>, #tpu.dimension_semantics<arbitrary>], iteration_bounds = array<i64: 2, 1, 1>, scalar_prefetch = 0 : i64, scratch_operands = 2 : i64, tpu.core_type = #tpu.core_type<tc>, window_params = [{transform_indices = @transform_0, window_bounds = array<i64: 1, 8, 128>}, {pipeline_mode = #tpu.pipeline_mode<synchronous>, transform_indices = @transform_1, window_bounds = array<i64: 1, 128>}, {pipeline_mode = #tpu.pipeline_mode<synchronous>, transform_indices = @transform_2, window_bounds = array<i64: 1, 128>}, {transform_indices = @transform_3, window_bounds = array<i64: 128, 512>}, {transform_indices = @transform_4, window_bounds = array<i64: 1, 512>}, {transform_indices = @transform_5, window_bounds = array<i64: 512, 128>}, {pipeline_mode = #tpu.pipeline_mode<synchronous>, transform_indices = @transform_6, window_bounds = array<i64: 1, 128>}, {transform_indices = @transform_7, window_bounds = array<i64: 1, 8, 128>}]} {
    %c0_i32 = arith.constant 0 : i32
    %0 = arith.cmpi eq, %arg2, %c0_i32 : i32
    %1 = arith.extui %0 : i1 to i32
    %c0_i32_0 = arith.constant 0 : i32
    %2 = arith.cmpi ne, %1, %c0_i32_0 : i32
    scf.if %2 {
      %c0_31 = arith.constant 0 : index
      %c0_32 = arith.constant 0 : index
      %c0_33 = arith.constant 0 : index
      %59 = vector.load %arg3[%c0_31, %c0_32, %c0_33] : memref<1x8x128xbf16, #tpu.memory_space<vmem>>, vector<1x8x128xbf16>
      %60 = vector.shape_cast %59 : vector<1x8x128xbf16> to vector<8x128xbf16>
      %61 = arith.extf %60 : vector<8x128xbf16> to vector<8x128xf32>
      %c0_34 = arith.constant 0 : index
      %c0_35 = arith.constant 0 : index
      %62 = vector.load %arg4[%c0_34, %c0_35] : memref<1x128xf32, #tpu.memory_space<vmem>>, vector<1x128xf32>
      %c0_36 = arith.constant 0 : index
      %c0_37 = arith.constant 0 : index
      %63 = vector.load %arg5[%c0_36, %c0_37] : memref<1x128xf32, #tpu.memory_space<vmem>>, vector<1x128xf32>
      %cst_38 = arith.constant dense<0.000000e+00> : vector<8xf32>
      %64 = vector.multi_reduction <add>, %61, %cst_38 [1] : vector<8x128xf32> to vector<8xf32>
      %65 = vector.shape_cast %64 : vector<8xf32> to vector<8x1xf32>
      %cst_39 = arith.constant 1.280000e+02 : f32
      %66 = vector.broadcast %cst_39 : f32 to vector<8x1xf32>
      %67 = arith.divf %65, %66 : vector<8x1xf32>
      %68 = vector.broadcast %67 : vector<8x1xf32> to vector<8x128xf32>
      %69 = arith.subf %61, %68 : vector<8x128xf32>
      %70 = arith.mulf %69, %69 : vector<8x128xf32>
      %cst_40 = arith.constant dense<0.000000e+00> : vector<8xf32>
      %71 = vector.multi_reduction <add>, %70, %cst_40 [1] : vector<8x128xf32> to vector<8xf32>
      %72 = vector.shape_cast %71 : vector<8xf32> to vector<8x1xf32>
      %cst_41 = arith.constant 1.280000e+02 : f32
      %73 = vector.broadcast %cst_41 : f32 to vector<8x1xf32>
      %74 = arith.divf %72, %73 : vector<8x1xf32>
      %75 = vector.broadcast %67 : vector<8x1xf32> to vector<8x128xf32>
      %76 = arith.subf %61, %75 : vector<8x128xf32>
      %cst_42 = arith.constant 9.99999974E-6 : f32
      %77 = vector.broadcast %cst_42 : f32 to vector<8x1xf32>
      %78 = arith.addf %74, %77 : vector<8x1xf32>
      %79 = math.rsqrt %78 : vector<8x1xf32>
      %80 = vector.broadcast %79 : vector<8x1xf32> to vector<8x128xf32>
      %81 = arith.mulf %76, %80 : vector<8x128xf32>
      %82 = vector.broadcast %62 : vector<1x128xf32> to vector<8x128xf32>
      %83 = arith.mulf %81, %82 : vector<8x128xf32>
      %84 = vector.broadcast %63 : vector<1x128xf32> to vector<8x128xf32>
      %85 = arith.addf %83, %84 : vector<8x128xf32>
      %86 = arith.truncf %85 : vector<8x128xf32> to vector<8x128xbf16>
      %c0_43 = arith.constant 0 : index
      %c0_44 = arith.constant 0 : index
      %87 = vector.load %arg11[%c0_43, %c0_44] : memref<8x128xbf16, #tpu.memory_space<vmem>>, vector<8x128xbf16>
      tpu.vector_store %arg11[%c0_43, %c0_44], %86 {strides = array<i32>} : memref<8x128xbf16, #tpu.memory_space<vmem>>, vector<8x128xbf16>,
      %cst_45 = arith.constant 0.000000e+00 : f32
      %88 = vector.broadcast %cst_45 : f32 to vector<8x128xf32>
      %c0_46 = arith.constant 0 : index
      %c0_47 = arith.constant 0 : index
      %89 = vector.load %arg12[%c0_46, %c0_47] : memref<8x128xf32, #tpu.memory_space<vmem>>, vector<8x128xf32>
      tpu.vector_store %arg12[%c0_46, %c0_47], %88 {strides = array<i32>} : memref<8x128xf32, #tpu.memory_space<vmem>>, vector<8x128xf32>,
    } else {
    }
    %c0 = arith.constant 0 : index
    %c0_1 = arith.constant 0 : index
    %3 = vector.load %arg11[%c0, %c0_1] : memref<8x128xbf16, #tpu.memory_space<vmem>>, vector<8x128xbf16>
    %c0_2 = arith.constant 0 : index
    %c0_3 = arith.constant 0 : index
    %4 = vector.load %arg6[%c0_2, %c0_3] : memref<128x512xbf16, #tpu.memory_space<vmem>>, vector<128x512xbf16>
    %cst = arith.constant dense<0.000000e+00> : vector<8x512xf32>
    %5 = tpu.matmul %3, %4, %cst {dimension_numbers = #tpu.dot_dimension_numbers<[1], [0], [0], [1], [0, 0, 1, 1], [], []>} : vector<8x128xbf16>, vector<128x512xbf16>, vector<8x512xf32> -> vector<8x512xf32>
    %c0_4 = arith.constant 0 : index
    %c0_5 = arith.constant 0 : index
    %6 = vector.load %arg7[%c0_4, %c0_5] : memref<1x512xf32, #tpu.memory_space<vmem>>, vector<1x512xf32>
    %7 = vector.broadcast %6 : vector<1x512xf32> to vector<8x512xf32>
    %8 = arith.addf %5, %7 : vector<8x512xf32>
    %cst_6 = arith.constant 5.000000e-01 : f32
    %9 = vector.broadcast %cst_6 : f32 to vector<8x512xf32>
    %10 = arith.mulf %9, %8 : vector<8x512xf32>
    %cst_7 = arith.constant 0.707106769 : f32
    %11 = vector.broadcast %cst_7 : f32 to vector<8x512xf32>
    %12 = arith.mulf %8, %11 : vector<8x512xf32>
    %cst_8 = arith.constant 0.000000e+00 : f32
    %13 = vector.broadcast %cst_8 : f32 to vector<8x512xf32>
    %14 = arith.cmpf oge, %12, %13 : vector<8x512xf32>
    %cst_9 = arith.constant 1.000000e+00 : f32
    %cst_10 = arith.constant -1.000000e+00 : f32
    %15 = vector.broadcast %cst_9 : f32 to vector<8x512xf32>
    %16 = vector.broadcast %cst_10 : f32 to vector<8x512xf32>
    %17 = arith.select %14, %15, %16 : vector<8x512xi1>, vector<8x512xf32>
    %18 = math.absf %12 : vector<8x512xf32>
    %cst_11 = arith.constant 0.327591091 : f32
    %19 = vector.broadcast %cst_11 : f32 to vector<8x512xf32>
    %20 = arith.mulf %19, %18 : vector<8x512xf32>
    %cst_12 = arith.constant 1.000000e+00 : f32
    %21 = vector.broadcast %cst_12 : f32 to vector<8x512xf32>
    %22 = arith.addf %21, %20 : vector<8x512xf32>
    %cst_13 = arith.constant 1.000000e+00 : f32
    %23 = vector.broadcast %cst_13 : f32 to vector<8x512xf32>
    %24 = arith.divf %23, %22 : vector<8x512xf32>
    %cst_14 = arith.constant 1.06140542 : f32
    %25 = vector.broadcast %cst_14 : f32 to vector<8x512xf32>
    %26 = arith.mulf %24, %25 : vector<8x512xf32>
    %cst_15 = arith.constant -1.45315206 : f32
    %27 = vector.broadcast %cst_15 : f32 to vector<8x512xf32>
    %28 = arith.addf %27, %26 : vector<8x512xf32>
    %29 = arith.mulf %24, %28 : vector<8x512xf32>
    %cst_16 = arith.constant 1.42141378 : f32
    %30 = vector.broadcast %cst_16 : f32 to vector<8x512xf32>
    %31 = arith.addf %30, %29 : vector<8x512xf32>
    %32 = arith.mulf %24, %31 : vector<8x512xf32>
    %cst_17 = arith.constant -0.284496725 : f32
    %33 = vector.broadcast %cst_17 : f32 to vector<8x512xf32>
    %34 = arith.addf %33, %32 : vector<8x512xf32>
    %35 = arith.mulf %24, %34 : vector<8x512xf32>
    %cst_18 = arith.constant 0.254829586 : f32
    %36 = vector.broadcast %cst_18 : f32 to vector<8x512xf32>
    %37 = arith.addf %36, %35 : vector<8x512xf32>
    %38 = arith.mulf %24, %37 : vector<8x512xf32>
    %cst_19 = arith.constant 0.000000e+00 : f32
    %39 = vector.broadcast %cst_19 : f32 to vector<8x512xf32>
    %40 = arith.subf %39, %18 : vector<8x512xf32>
    %41 = arith.mulf %40, %18 : vector<8x512xf32>
    %42 = math.exp %41 : vector<8x512xf32>
    %43 = arith.mulf %38, %42 : vector<8x512xf32>
    %cst_20 = arith.constant 1.000000e+00 : f32
    %44 = vector.broadcast %cst_20 : f32 to vector<8x512xf32>
    %45 = arith.subf %44, %43 : vector<8x512xf32>
    %46 = arith.mulf %17, %45 : vector<8x512xf32>
    %cst_21 = arith.constant 1.000000e+00 : f32
    %47 = vector.broadcast %cst_21 : f32 to vector<8x512xf32>
    %48 = arith.addf %47, %46 : vector<8x512xf32>
    %49 = arith.mulf %10, %48 : vector<8x512xf32>
    %50 = arith.truncf %49 : vector<8x512xf32> to vector<8x512xbf16>
    %c0_22 = arith.constant 0 : index
    %c0_23 = arith.constant 0 : index
    %51 = vector.load %arg12[%c0_22, %c0_23] : memref<8x128xf32, #tpu.memory_space<vmem>>, vector<8x128xf32>
    %c0_24 = arith.constant 0 : index
    %c0_25 = arith.constant 0 : index
    %52 = vector.load %arg8[%c0_24, %c0_25] : memref<512x128xbf16, #tpu.memory_space<vmem>>, vector<512x128xbf16>
    %cst_26 = arith.constant dense<0.000000e+00> : vector<8x128xf32>
    %53 = tpu.matmul %50, %52, %cst_26 {dimension_numbers = #tpu.dot_dimension_numbers<[1], [0], [0], [1], [0, 0, 1, 1], [], []>} : vector<8x512xbf16>, vector<512x128xbf16>, vector<8x128xf32> -> vector<8x128xf32>
    %54 = arith.addf %51, %53 : vector<8x128xf32>
    %c0_27 = arith.constant 0 : index
    %c0_28 = arith.constant 0 : index
    %55 = vector.load %arg12[%c0_27, %c0_28] : memref<8x128xf32, #tpu.memory_space<vmem>>, vector<8x128xf32>
    tpu.vector_store %arg12[%c0_27, %c0_28], %54 {strides = array<i32>} : memref<8x128xf32, #tpu.memory_space<vmem>>, vector<8x128xf32>,
    %c0_i32_29 = arith.constant 0 : i32
    %56 = arith.cmpi eq, %arg2, %c0_i32_29 : i32
    %57 = arith.extui %56 : i1 to i32
    %c0_i32_30 = arith.constant 0 : i32
    %58 = arith.cmpi ne, %57, %c0_i32_30 : i32
    scf.if %58 {
      %c0_31 = arith.constant 0 : index
      %c0_32 = arith.constant 0 : index
      %59 = vector.load %arg12[%c0_31, %c0_32] : memref<8x128xf32, #tpu.memory_space<vmem>>, vector<8x128xf32>
      %c0_33 = arith.constant 0 : index
      %c0_34 = arith.constant 0 : index
      %60 = vector.load %arg9[%c0_33, %c0_34] : memref<1x128xf32, #tpu.memory_space<vmem>>, vector<1x128xf32>
      %61 = vector.broadcast %60 : vector<1x128xf32> to vector<8x128xf32>
      %62 = arith.addf %59, %61 : vector<8x128xf32>
      %c0_35 = arith.constant 0 : index
      %c0_36 = arith.constant 0 : index
      %c0_37 = arith.constant 0 : index
      %63 = vector.load %arg3[%c0_35, %c0_36, %c0_37] : memref<1x8x128xbf16, #tpu.memory_space<vmem>>, vector<1x8x128xbf16>
      %64 = vector.shape_cast %63 : vector<1x8x128xbf16> to vector<8x128xbf16>
      %65 = arith.extf %64 : vector<8x128xbf16> to vector<8x128xf32>
      %66 = arith.addf %65, %62 : vector<8x128xf32>
      %67 = arith.truncf %66 : vector<8x128xf32> to vector<8x128xbf16>
      %c0_38 = arith.constant 0 : index
      %c0_39 = arith.constant 0 : index
      %c0_40 = arith.constant 0 : index
      %68 = vector.load %arg10[%c0_38, %c0_39, %c0_40] : memref<1x8x128xbf16, #tpu.memory_space<vmem>>, vector<1x8x128xbf16>
      %69 = vector.shape_cast %68 : vector<1x8x128xbf16> to vector<8x128xbf16>
      %70 = vector.shape_cast %67 : vector<8x128xbf16> to vector<1x8x128xbf16>
      tpu.vector_store %arg10[%c0_38, %c0_39, %c0_40], %70 {strides = array<i32>} : memref<1x8x128xbf16, #tpu.memory_space<vmem>>, vector<1x8x128xbf16>,
    } else {
    }
    return
  }
  func.func @transform_0(%arg0: i32, %arg1: i32, %arg2: i32) -> (i32, i32, i32) {
    %c0_i32 = arith.constant 0 : i32
    %c0_i32_0 = arith.constant 0 : i32
    return %arg0, %arg1, %c0_i32 : i32, i32, i32
  }
  func.func @transform_1(%arg0: i32, %arg1: i32, %arg2: i32) -> (i32, i32) {
    %c0_i32 = arith.constant 0 : i32
    %c0_i32_0 = arith.constant 0 : i32
    %c0_i32_1 = arith.constant 0 : i32
    return %c0_i32, %c0_i32_0 : i32, i32
  }
  func.func @transform_2(%arg0: i32, %arg1: i32, %arg2: i32) -> (i32, i32) {
    %c0_i32 = arith.constant 0 : i32
    %c0_i32_0 = arith.constant 0 : i32
    %c0_i32_1 = arith.constant 0 : i32
    return %c0_i32, %c0_i32_0 : i32, i32
  }
  func.func @transform_3(%arg0: i32, %arg1: i32, %arg2: i32) -> (i32, i32) {
    %c0_i32 = arith.constant 0 : i32
    %c0_i32_0 = arith.constant 0 : i32
    return %c0_i32, %arg2 : i32, i32
  }
  func.func @transform_4(%arg0: i32, %arg1: i32, %arg2: i32) -> (i32, i32) {
    %c0_i32 = arith.constant 0 : i32
    %c0_i32_0 = arith.constant 0 : i32
    return %c0_i32, %arg2 : i32, i32
  }
  func.func @transform_5(%arg0: i32, %arg1: i32, %arg2: i32) -> (i32, i32) {
    %c0_i32 = arith.constant 0 : i32
    %c0_i32_0 = arith.constant 0 : i32
    return %arg2, %c0_i32 : i32, i32
  }
  func.func @transform_6(%arg0: i32, %arg1: i32, %arg2: i32) -> (i32, i32) {
    %c0_i32 = arith.constant 0 : i32
    %c0_i32_0 = arith.constant 0 : i32
    %c0_i32_1 = arith.constant 0 : i32
    return %c0_i32, %c0_i32_0 : i32, i32
  }
  func.func @transform_7(%arg0: i32, %arg1: i32, %arg2: i32) -> (i32, i32, i32) {
    %c0_i32 = arith.constant 0 : i32
    %c0_i32_0 = arith.constant 0 : i32
    return %arg0, %arg1, %c0_i32 : i32, i32, i32
  }
}

</mosaic_0001>

<bundles_post_ra>
// kernel: audio_encoder_forward.11
= control target key start
LH: loop header
LB: loop body
LE: loop exit
PB: predicated region body
PF: predicated region fallthrough
CT: control target
= control target key end

     0   :  { %8 = vsyncpa [#allocation3], 0  ;;  %s850_s0 = inlined_call_operand.vmem [shape: bf16[2,18,16], index: 0, kind: input, shape index: {}]   ;;  %s851_s1 = inlined_call_operand.hbm [shape: bf16[3,16,128], index: 1, kind: input, shape index: {}]   ;;  %s852_s2 = inlined_call_operand.hbm [shape: f32[1,128], index: 2, kind: input, shape index: {}]   ;;  %s853_s3 = inlined_call_operand.vmem [shape: bf16[2,16,128], index: 3, kind: output, shape index: {}]  }
   0x1   :  { %9 = vsyncpa [#allocation5], 0  ;;  %s761_s12 = smov 0   ;;  %s763_s13 = smov 0  }
   0x2   :  { %s765_s14 = smov 0  }
   0x3 LB: > { %s541_s15 = sadd.s32 4294967295, %s734_s14   ;;  %s27_s16 = sadd.s32 1, %s730_s13  ;;  %s734_s14 = sphi %s765_s14, %s15_s14   ;;  %s730_s13 = sphi %s763_s13, %s857_s13   ;;  %s726_s12 = sphi %s761_s12, %s856_s12  }
   0x4   : > { %p29_p0 = scmp.ge.s32.totalorder %s27_s16, 2  ;;  %p543_p1 = scmp.ge.s32.totalorder %s734_s14, 1 }
   0x5   : > { %p138_p2 = scmp.lt.s32.totalorder %s734_s14, 3  ;;  %p786_p4 = scmp.eq.s32.totalorder %s541_s15, 0 }
   0x6   : > { %s859_s16 = smov (%p29_p0, %s27_s16), 0  ;;  %s151_s21 = sshll.u32 %s851_s1, 4  ;;  %s152_s21 = int_to_ptr.hbm [resolvable:$true] %s151_s21 }
   0x7   : > { %p782_p3 = pnand %p543_p1, %p138_p2  ;;  %s736_s22 = smov [#allocation2]  }
   0x8   : > { %s153_s23 = sshll.u32 %s736_s22, 4  ;;  %s167_s26 = sshll.u32 %s852_s2, 4  ;;  %s154_s23 = int_to_ptr.vmem [resolvable:$true] %s153_s23  ;;  %s168_s26 = int_to_ptr.hbm [resolvable:$true] %s167_s26 }
   0x9   : > { %p595_p5 = pneg %p782_p3  ;;  %s737_s27 = smov 64  }
   0xa   : > { %s738_s28 = smov 4   ;;  %s739_s29 = smov [#allocation4]  }
   0xb   : > { %p596_p6 = pnand %p786_p4, %p595_p5  ;;  %s169_s30 = sshll.u32 %s739_s29, 4  ;;  %s170_s30 = int_to_ptr.vmem [resolvable:$true] %s169_s30 }
   0xc   : > { %190 = sbr.rel (%p782_p3) target bundleno = 234 (0xea), region = 32 }
   0xd   : > { %598 = dma.hbm_to_vmem [thread:$0]  (!%p596_p6), %s152_s21, 384, %s154_s23, [#allocation3], %s737_s27, %s737_s27, %s738_s28  }
   0xe   : > { %601 = dma.hbm_to_vmem [thread:$0]  (!%p596_p6), %s168_s26, 16, %s170_s30, [#allocation5]  }
  0x11   : > { %717 = dma.done.wait (%p786_p4), [#allocation3], 384  }
  0x12   : > { %719 = vsyncadd (%p786_p4), [#allocation3], 4294966912 }
  0x13   : > { %721 = dma.done.wait (%p786_p4), [#allocation5], 16  }
  0x14   : > { %723 = vsyncadd (%p786_p4), [#allocation5], 4294967280  ;;  %p223_p7 = scmp.lt.s32.totalorder %s726_s12, 1  ;;  %v571_v0 = vld [vmem:[#allocation2] sm:$0xff]  ;;  %v573_v1 = vld [vmem:[#allocation2 + $0x10] sm:$0xff]  ;;  %vm272_vm0 = vcmask 130048  }
  0x15   : > { %v572_v4 = vld [vmem:[#allocation2 + $0x8] sm:$0xff]  ;;  %305 = vmatpush.bf16.msra.mxu1 %v571_v0  ;;  %339 = vmatpush.bf16.msra.mxu2 %v573_v1  ;;  %vm319_vm1 = vcmask 1046528   ;;  %vm253_vm2 = vsmask.f32 7424  ;;  %v635_v23 = vld [vmem:[#allocation4] ss:$0 sm:$0xff] }
  0x16   : > { %s861_s12 = smov (!%p223_p7, %s726_s12), 1  ;;  %283 = vmatpush.bf16.msra.mxu0 %v572_v4 }
  0x17   : > { %s586_s4 = smul.u32 12, %s861_s12  ;;  %s570_s8 = sshll.u32 %s861_s12, 3 }
  0x18   : > { %s235_s11 = scalar_lea.vmem %s853_s3, %s570_s8 }
  0x19   : > { %s227_s7 = scalar_lea.vmem %s850_s0, %s586_s4 }
  0x1a   : > { %v575_v2 = vld [vmem:[%s227_s7] sm:$0xff]   ;;  %v241_v6 = vld [vmem:[%s227_s7 + $0x8] sm:$0x1] }
  0x1b   : > { %v257_v3 = vshll.u32 %v575_v2, 16  ;;  %v583_v5 = vld [vmem:[%s227_s7] sm:$0xf0]  ;;  %v584_v7 = vld [vmem:[%s227_s7] sm:$0xe]  ;;  %v255_v8 = vshrl.u32 %v575_v2, 16  ;;  %v250_v10 = vunpack.c.l.b16 %v241_v6  ;;  %562 = vmatmul.msk.bf16.vlgmr.msra.gmra.mxu1 %vm272_vm0, %v575_v2 }
  0x1c   : > { %v585_v11 = vor.u32 %v584_v7, %v583_v5 }
  0x1d   : > { %v259_v9 = vrot.slane %v257_v3, 1  ;;  %v252_v12 = vpack.c.b16 %v250_v10, %v250_v10 }
  0x1e   : > { %v320_v13 = vrot.slane %v585_v11, 1 }
  0x1f   : > { %v260_v14 = vor.u32 %v259_v9, %v255_v8  ;;  %v321_v15 = vrot.slane %v252_v12, 1  ;;  %v262_v16 = vshll.u32 %v252_v12, 16 }
  0x21   : > { %v322_v17 = vsel %vm319_vm1, %v320_v13, %v321_v15  ;;  %v264_v18 = vrot.slane %v262_v16, 1 }
  0x22   : > { %567 = vmatmul.msk.bf16.vlgmr.msra.gmra.mxu2 %vm272_vm0, %v322_v17 }
  0x23   : > { %v265_v19 = vsel %vm253_vm2, %v260_v14, %v264_v18 }
  0x24   : > { %557 = vmatmul.msk.bf16.vlgmr.msra.gmra.mxu0 %vm272_vm0, %v265_v19 }
  0x98   : > { %v307_v20 = vpop.f32.mrf.mxu1 }
  0xa0   : > { %v309_v29 = vpop.f32.mrf.mxu1 }
  0xa1   : > { %v285_v21 = vpop.f32.mrf.mxu0 }
  0xa2   : > { %v308_v22 = vadd.f32 %v307_v20, %v285_v21 }
  0xa5   : > { %v341_v24 = vpop.f32.mrf.mxu2 }
  0xa6   : > { %v346_v25 = vadd.f32 %v341_v24, %v308_v22 }
  0xa8   : > { %v821_v26 = vadd.f32 %v635_v23, %v346_v25  ;;  %v740_v25 = vmov -1.0  }
  0xa9   : > { %v287_v27 = vpop.f32.mrf.mxu0 }
  0xaa   : > { %v824_v28 = vmul.f32 0.70710677, %v821_v26  ;;  %v310_v31 = vadd.f32 %v309_v29, %v287_v27 }
  0xac   : > { %v362_v30 = vand.u32 2147483647, %v824_v28  ;;  %vm358_vm11 = vcmp.ge.f32.partialorder %v824_v28, 0.0 }
  0xad   : > { %v343_v32 = vpop.f32.mrf.mxu2  ;;  %v360_v27 = vsel %vm358_vm11, 1.0, %v740_v25 }
  0xae   : > { %v364_v33 = vmul.f32 0.3275911, %v362_v30  ;;  %v347_v34 = vadd.f32 %v343_v32, %v310_v31  ;;  %v416_v54 = vsub.f32 0.0, %v362_v30 }
  0xb0   : > { %v366_v35 = vadd.f32 1.0, %v364_v33  ;;  %v827_v36 = vadd.f32 %v635_v23, %v347_v34  ;;  %v418_v61 = vmul.f32 %v416_v54, %v362_v30 }
  0xb2   : > { %636 = vrcp.f32 %v366_v35  ;;  %v830_v37 = vmul.f32 0.70710677, %v827_v36  ;;  %v379_v44 = vand.u32 2147483648, %v366_v35  ;;  %v377_v46 = vand.u32 2147483647, %v366_v35 }
  0xb3   : > { %vm373_vm4 = vweird.f32 %v366_v35  ;;  %v420_v3 = vmul.f32 1.442695, %v418_v61 }
  0xb4   : > { %v363_v38 = vand.u32 2147483647, %v830_v37  ;;  %v380_v48 = vor.u32 1.1754944e-38, %v379_v44  ;;  %vm378_vm6 = vcmp.eq.f32.partialorder %v377_v46, 8.507059e+37  ;;  %vm359_vm12 = vcmp.ge.f32.partialorder %v830_v37, 0.0 }
  0xb5   : > { %v361_v32 = vsel %vm359_vm12, 1.0, %v740_v25 }
  0xb6   : > { %v365_v39 = vmul.f32 0.3275911, %v363_v38  ;;  %v417_v5 = vsub.f32 0.0, %v363_v38 }
  0xb8   : > { %v637_v40 = vpop.eup %636  ;;  %v367_v42 = vadd.f32 1.0, %v365_v39  ;;  %v419_v10 = vmul.f32 %v417_v5, %v363_v38  ;;  %v355_v38 = vmul.f32 0.5, %v827_v36 }
  0xb9   : > { %v369_v41 = vmul.f32 %v637_v40, %v366_v35  ;;  %vm374_vm3 = vweird.f32 %v637_v40  ;;  %v354_v35 = vmul.f32 0.5, %v821_v26 }
  0xba   : > { %638 = vrcp.f32 %v367_v42  ;;  %vm375_vm5 = vmor %vm373_vm4, %vm374_vm3  ;;  %v394_v57 = vand.u32 2147483648, %v367_v42  ;;  %v392_v59 = vand.u32 2147483647, %v367_v42  ;;  %vm388_vm8 = vweird.f32 %v367_v42 }
  0xbb   : > { %v370_v43 = vsub.f32 1.0, %v369_v41  ;;  %640 = vpow2.f32 %v420_v3  ;;  %v422_v15 = vmul.f32 1.442695, %v419_v10 }
  0xbc   : > { %v395_v0 = vor.u32 1.1754944e-38, %v394_v57  ;;  %vm393_vm10 = vcmp.eq.f32.partialorder %v392_v59, 8.507059e+37 }
  0xbd   : > { %v371_v45 = vmul.f32 %v637_v40, %v370_v43  ;;  %642 = vpow2.f32 %v422_v15 }
  0xbf   : > { %v372_v47 = vadd.f32 %v637_v40, %v371_v45 }
  0xc0   : > { %v639_v49 = vpop.eup %638 }
  0xc1   : > { %v376_v50 = vsel %vm375_vm5, %v637_v40, %v372_v47  ;;  %v384_v52 = vmul.f32 %v639_v49, %v367_v42  ;;  %vm389_vm7 = vweird.f32 %v639_v49  ;;  %v641_v17 = vpop.eup %640 }
  0xc2   : > { %v381_v51 = vsel %vm378_vm6, %v380_v48, %v376_v50  ;;  %vm390_vm9 = vmor %vm388_vm8, %vm389_vm7 }
  0xc3   : > { %v398_v53 = vmul.f32 1.0614054, %v381_v51  ;;  %v385_v55 = vsub.f32 1.0, %v384_v52  ;;  %v643_v24 = vpop.eup %642 }
  0xc5   : > { %v400_v56 = vadd.f32 -1.4531521, %v398_v53  ;;  %v386_v58 = vmul.f32 %v639_v49, %v385_v55 }
  0xc7   : > { %v402_v60 = vmul.f32 %v400_v56, %v381_v51  ;;  %v387_v62 = vadd.f32 %v639_v49, %v386_v58 }
  0xc9   : > { %v404_v63 = vadd.f32 1.4214138, %v402_v60  ;;  %v391_v1 = vsel %vm390_vm9, %v639_v49, %v387_v62 }
  0xca   : > { %v396_v4 = vsel %vm393_vm10, %v395_v0, %v391_v1 }
  0xcb   : > { %v406_v2 = vmul.f32 %v404_v63, %v381_v51  ;;  %v399_v6 = vmul.f32 1.0614054, %v396_v4 }
  0xcd   : > { %v408_v7 = vadd.f32 -0.28449672, %v406_v2  ;;  %v401_v8 = vadd.f32 -1.4531521, %v399_v6 }
  0xcf   : > { %v410_v9 = vmul.f32 %v408_v7, %v381_v51  ;;  %v403_v11 = vmul.f32 %v401_v8, %v396_v4 }
  0xd1   : > { %v412_v12 = vadd.f32 0.2548296, %v410_v9  ;;  %v405_v13 = vadd.f32 1.4214138, %v403_v11 }
  0xd3   : > { %v414_v14 = vmul.f32 %v412_v12, %v381_v51  ;;  %v407_v16 = vmul.f32 %v405_v13, %v396_v4 }
  0xd5   : > { %v424_v18 = vmul.f32 %v641_v17, %v414_v14  ;;  %v409_v19 = vadd.f32 -0.28449672, %v407_v16 }
  0xd7   : > { %v411_v20 = vmul.f32 %v409_v19, %v396_v4  ;;  %v426_v21 = vsub.f32 1.0, %v424_v18 }
  0xd9   : > { %v413_v22 = vadd.f32 0.2548296, %v411_v20  ;;  %v428_v29 = vmul.f32 %v426_v21, %v360_v27 }
  0xdb   : > { %v415_v23 = vmul.f32 %v413_v22, %v396_v4  ;;  %v430_v33 = vadd.f32 1.0, %v428_v29 }
  0xdd   : > { %v425_v30 = vmul.f32 %v643_v24, %v415_v23  ;;  %v432_v39 = vmul.f32 %v430_v33, %v354_v35 }
  0xdf   : > { %v427_v31 = vsub.f32 1.0, %v425_v30 }
  0xe1   : > { %v429_v34 = vmul.f32 %v427_v31, %v361_v32 }
  0xe3   : > { %v431_v28 = vadd.f32 1.0, %v429_v34 }
  0xe5   : > { %v433_v40 = vmul.f32 %v431_v28, %v355_v38 }
  0xe7   : > { %v581_v41 = vpack.c.bf16 %v433_v40, %v432_v39 }
  0xe9   : > { %582 = vst [vmem:[%s235_s11] sm:$0xff] %v581_v41  }
  0xea PF: > { %s15_s14 = sadd.s32 1, %s734_s14   ;;  %s856_s12 = smov %s730_s13 }
  0xeb   : > { %p12_p8 = scmp.ge.s32.totalorder %s15_s14, 4   ;;  %s857_s13 = smov %s859_s16 }
  0xed   :  { %14 = sbr.rel (!%p12_p8) target bundleno = 3 (0x3), region = 75 }
  0xf2   :  { %465 = vsyncpa [#allocation3], 1 }
  0xf3   :  { %467 = vsyncpa [#allocation3 + $0x1], 1 }
  0xf4   :  { %468 = vsyncpa [#allocation5], 1 }

// kernel: audio_encoder_forward.13
= control target key start
LH: loop header
LB: loop body
LE: loop exit
PB: predicated region body
PF: predicated region fallthrough
CT: control target
= control target key end

     0   :  { %10 = vsyncpa [#allocation3], 0  ;;  %s890_s18 = smov 0   ;;  %s892_s19 = smov 0   ;;  %s949_s0 = inlined_call_operand.vmem [shape: bf16[2,8,128], index: 0, kind: input, shape index: {}]   ;;  %s950_s1 = inlined_call_operand.vmem [shape: f32[1,128], index: 1, kind: input, shape index: {}]   ;;  %s951_s2 = inlined_call_operand.vmem [shape: f32[1,128], index: 2, kind: input, shape index: {}]   ;;  %s952_s3 = inlined_call_operand.hbm [shape: bf16[128,384], index: 3, kind: input, shape index: {}]   ;;  %s953_s4 = inlined_call_operand.vmem [shape: f32[1,384], index: 4, kind: input, shape index: {}]   ;;  %s954_s5 = inlined_call_operand.vmem [shape: bf16[2,8,384], index: 5, kind: output, shape index: {}]  }
   0x1   :  { %s894_s20 = smov 0  }
   0x2 LB: > { %s622_s21 = sadd.s32 4294967295, %s854_s20   ;;  %s28_s22 = sadd.s32 1, %s850_s19  ;;  %s854_s20 = sphi %s894_s20, %s16_s20   ;;  %s850_s19 = sphi %s892_s19, %s956_s19   ;;  %s846_s18 = sphi %s890_s18, %s955_s18  }
   0x3   : > { %p30_p0 = scmp.ge.s32.totalorder %s28_s22, 2  ;;  %p624_p1 = scmp.ge.s32.totalorder %s854_s20, 1 }
   0x4   : > { %p173_p2 = scmp.lt.s32.totalorder %s854_s20, 3  ;;  %p762_p4 = scmp.eq.s32.totalorder %s622_s21, 0 }
   0x5   : > { %s958_s22 = smov (%p30_p0, %s28_s22), 0  ;;  %s190_s25 = sshll.u32 %s952_s3, 4  ;;  %s191_s25 = int_to_ptr.hbm [resolvable:$true] %s190_s25 }
   0x6   : > { %p174_p3 = pnand %p624_p1, %p173_p2  ;;  %s856_s26 = smov [#allocation2]  }
   0x7   : > { %s192_s27 = sshll.u32 %s856_s26, 4  ;;  %s857_s28 = smov 192   ;;  %s193_s27 = int_to_ptr.vmem [resolvable:$true] %s192_s27 }
   0x8   : > { %p758_p5 = pneg %p174_p3  ;;  %s858_s29 = smov 12  }
   0x9   : > { %221 = sbr.rel (%p174_p3) target bundleno = 432 (0x1b0), region = 40 }
   0xa   : > { %p759_p6 = pnand %p762_p4, %p758_p5 }
   0xc   : > { %761 = dma.hbm_to_vmem [thread:$0]  (!%p759_p6), %s191_s25, 3072, %s193_s27, [#allocation3], %s857_s28, %s857_s28, %s858_s29  }
   0xe   : > { %841 = dma.done.wait (%p762_p4), [#allocation3], 3072  }
   0xf   : > { %843 = vsyncadd (%p762_p4), [#allocation3], 4294964224  ;;  %p256_p7 = scmp.lt.s32.totalorder %s846_s18, 1  ;;  %v859_v2 = vmov 128.0   ;;  %v717_v3 = vld [vmem:[#allocation2 + $0xa8] sm:$0xf] }
  0x10   : > { %794 = vrcp.f32 %v859_v2  ;;  %v751_v4 = vld [vmem:[#allocation2 + $0xb0] sm:$0xf0]  ;;  %v750_v5 = vld [vmem:[#allocation2 + $0xac] sm:$0xf]  ;;  %v719_v7 = vld [vmem:[#allocation2 + $0xb4] sm:$0xf0] }
  0x11   : > { %s960_s18 = smov (!%p256_p7, %s846_s18), 1  ;;  %v718_v6 = vor.u32 %v751_v4, %v717_v3  ;;  %v725_v8 = vld [vmem:[#allocation2 + $0xb0] sm:$0xf]  ;;  %v752_v9 = vld [vmem:[#allocation2 + $0xb8] sm:$0xf0]  ;;  %v722_v10 = vor.u32 %v750_v5, %v719_v7 }
  0x12   : > { %s629_s30 = sshll.u32 %s960_s18, 2  ;;  %v726_v11 = vor.u32 %v752_v9, %v725_v8  ;;  %v705_v22 = vld [vmem:[#allocation2 + $0x90] sm:$0xf]  ;;  %v748_v23 = vld [vmem:[#allocation2 + $0x98] sm:$0xf0]  ;;  %s753_s15 = smul.u32 12, %s960_s18 }
  0x13   : > { %s262_s8 = scalar_lea.vmem %s949_s0, %s629_s30  ;;  %480 = vmatpush.bf16.msra.mxu0 %v718_v6  ;;  %493 = vmatpush.bf16.msra.mxu1 %v722_v10  ;;  %v747_v24 = vld [vmem:[#allocation2 + $0x94] sm:$0xf]  ;;  %v706_v25 = vor.u32 %v748_v23, %v705_v22  ;;  %v707_v26 = vld [vmem:[#allocation2 + $0x9c] sm:$0xf0]  ;;  %v713_v27 = vld [vmem:[#allocation2 + $0x98] sm:$0xf] }
  0x14   : > { %v272_v0 = vld [vmem:[%s262_s8] sm:$0xf]  ;;  %506 = vmatpush.bf16.msra.mxu2 %v726_v11  ;;  %v749_v28 = vld [vmem:[#allocation2 + $0xa0] sm:$0xf0]  ;;  %v710_v29 = vor.u32 %v747_v24, %v707_v26  ;;  %v693_v31 = vld [vmem:[#allocation2 + $0x78] sm:$0xf]  ;;  %s271_s21 = scalar_lea.vmem %s954_s5, %s753_s15 }
  0x15   : > { %v273_v1 = vunpack.c.l.bf16 %v272_v0  ;;  %v714_v30 = vor.u32 %v749_v28, %v713_v27  ;;  %v745_v32 = vld [vmem:[#allocation2 + $0x80] sm:$0xf0]  ;;  %v744_v33 = vld [vmem:[#allocation2 + $0x7c] sm:$0xf]  ;;  %v695_v35 = vld [vmem:[#allocation2 + $0x84] sm:$0xf0] }
  0x16   : > { %v795_v12 = vpop.eup %794  ;;  %v694_v34 = vor.u32 %v745_v32, %v693_v31  ;;  %v701_v36 = vld [vmem:[#allocation2 + $0x80] sm:$0xf]  ;;  %v746_v37 = vld [vmem:[#allocation2 + $0x88] sm:$0xf0]  ;;  %v698_v38 = vor.u32 %v744_v33, %v695_v35  ;;  %v741_v42 = vld [vmem:[#allocation2 + $0x64] sm:$0xf] }
  0x17   : > { %276 = vadd.xlane.f32.xlu0 %v273_v1  ;;  %v279_v13 = vmul.f32 128.0, %v795_v12  ;;  %vm283_vm0 = vweird.f32 %v795_v12  ;;  %481 = vmatpush.bf16.msra.mxu0 %v706_v25  ;;  %v702_v39 = vor.u32 %v746_v37, %v701_v36  ;;  %v681_v40 = vld [vmem:[#allocation2 + $0x60] sm:$0xf]  ;;  %v742_v41 = vld [vmem:[#allocation2 + $0x68] sm:$0xf0] }
  0x18   : > { %494 = vmatpush.bf16.msra.mxu1 %v710_v29  ;;  %507 = vmatpush.bf16.msra.mxu2 %v714_v30  ;;  %v682_v43 = vor.u32 %v742_v41, %v681_v40  ;;  %v683_v44 = vld [vmem:[#allocation2 + $0x6c] sm:$0xf0]  ;;  %v689_v45 = vld [vmem:[#allocation2 + $0x68] sm:$0xf]  ;;  %v743_v46 = vld [vmem:[#allocation2 + $0x70] sm:$0xf0] }
  0x19   : > { %v280_v14 = vsub.f32 1.0, %v279_v13  ;;  %v686_v47 = vor.u32 %v741_v42, %v683_v44  ;;  %v690_v48 = vor.u32 %v743_v46, %v689_v45  ;;  %v669_v49 = vld [vmem:[#allocation2 + $0x48] sm:$0xf]  ;;  %v739_v50 = vld [vmem:[#allocation2 + $0x50] sm:$0xf0] }
  0x1a   : > { %v738_v51 = vld [vmem:[#allocation2 + $0x4c] sm:$0xf]  ;;  %v670_v52 = vor.u32 %v739_v50, %v669_v49  ;;  %v671_v53 = vld [vmem:[#allocation2 + $0x54] sm:$0xf0]  ;;  %v677_v54 = vld [vmem:[#allocation2 + $0x50] sm:$0xf] }
  0x1b   : > { %v281_v15 = vmul.f32 %v795_v12, %v280_v14  ;;  %482 = vmatpush.bf16.msra.mxu0 %v694_v34  ;;  %v740_v55 = vld [vmem:[#allocation2 + $0x58] sm:$0xf0]  ;;  %v674_v56 = vor.u32 %v738_v51, %v671_v53  ;;  %v657_v58 = vld [vmem:[#allocation2 + $0x30] sm:$0xf]  ;;  %v735_v60 = vld [vmem:[#allocation2 + $0x34] sm:$0xf] }
  0x1c   : > { %495 = vmatpush.bf16.msra.mxu1 %v698_v38  ;;  %508 = vmatpush.bf16.msra.mxu2 %v702_v39  ;;  %v678_v57 = vor.u32 %v740_v55, %v677_v54  ;;  %v736_v59 = vld [vmem:[#allocation2 + $0x38] sm:$0xf0]  ;;  %v659_v62 = vld [vmem:[#allocation2 + $0x3c] sm:$0xf0]  ;;  %v665_v63 = vld [vmem:[#allocation2 + $0x38] sm:$0xf] }
  0x1d   : > { %v282_v16 = vadd.f32 %v795_v12, %v281_v15  ;;  %v658_v61 = vor.u32 %v736_v59, %v657_v58  ;;  %v737_v0 = vld [vmem:[#allocation2 + $0x40] sm:$0xf0]  ;;  %v645_v3 = vld [vmem:[#allocation2 + $0x18] sm:$0xf]  ;;  %v732_v5 = vld [vmem:[#allocation2 + $0x1c] sm:$0xf] }
  0x1e   : > { %v666_v2 = vor.u32 %v737_v0, %v665_v63  ;;  %v733_v4 = vld [vmem:[#allocation2 + $0x20] sm:$0xf0]  ;;  %v647_v7 = vld [vmem:[#allocation2 + $0x24] sm:$0xf0]  ;;  %v653_v8 = vld [vmem:[#allocation2 + $0x20] sm:$0xf] }
  0x1f   : > { %v918_v17 = vsel %vm283_vm0, %v795_v12, %v282_v16  ;;  %483 = vmatpush.bf16.msra.mxu0 %v682_v43  ;;  %v646_v6 = vor.u32 %v733_v4, %v645_v3  ;;  %v734_v9 = vld [vmem:[#allocation2 + $0x28] sm:$0xf0]  ;;  %v650_v10 = vor.u32 %v732_v5, %v647_v7  ;;  %v633_v12 = vld [vmem:[#allocation2] sm:$0xf]  ;;  %v729_v14 = vld [vmem:[#allocation2 + $0x4] sm:$0xf] }
  0x20   : > { %496 = vmatpush.bf16.msra.mxu1 %v686_v47  ;;  %509 = vmatpush.bf16.msra.mxu2 %v690_v48  ;;  %v654_v11 = vor.u32 %v734_v9, %v653_v8  ;;  %v730_v13 = vld [vmem:[#allocation2 + $0x8] sm:$0xf0]  ;;  %v635_v16 = vld [vmem:[#allocation2 + $0xc] sm:$0xf0]  ;;  %v792_v32 = vld [vmem:[%s950_s1] ss:$0 sm:$0xff] }
  0x21   : > { %v634_v15 = vor.u32 %v730_v13, %v633_v12  ;;  %v344_v38 = vld [vmem:[%s953_s4] sm:$0x7] }
  0x22   : > { %v346_v39 = vperm.slane %v344_v38, 0  ;;  %v347_v40 = vperm.slane %v344_v38, 1  ;;  %v348_v45 = vperm.slane %v344_v38, 2 }
  0x23   : > { %484 = vmatpush.bf16.msra.mxu0 %v670_v52 }
  0x24   : > { %497 = vmatpush.bf16.msra.mxu1 %v674_v56  ;;  %510 = vmatpush.bf16.msra.mxu2 %v678_v57 }
  0x27   : > { %485 = vmatpush.bf16.msra.mxu0 %v658_v61 }
  0x28   : > { %511 = vmatpush.bf16.msra.mxu2 %v666_v2 }
  0x2b   : > { %486 = vmatpush.bf16.msra.mxu0 %v646_v6 }
  0x2c   : > { %512 = vmatpush.bf16.msra.mxu2 %v654_v11 }
  0x2f   : > { %487 = vmatpush.bf16.msra.mxu0 %v634_v15 }
  0x8a   : > { %v277_v18 = vpop.xlane.xlu0 %276 }
  0x8b   : > { %v285_v19 = vmul.f32 %v918_v17, %v277_v18  ;;  %v641_v18 = vld [vmem:[#allocation2 + $0x8] sm:$0xf] }
  0x8d   : > { %v921_v20 = vsub.f32 %v273_v1, %v285_v19  ;;  %v662_v1 = vor.u32 %v735_v60, %v659_v62  ;;  %v731_v19 = vld [vmem:[#allocation2 + $0x10] sm:$0xf0] }
  0x8e   : > { %v642_v22 = vor.u32 %v731_v19, %v641_v18 }
  0x8f   : > { %v287_v21 = vmul.f32 %v921_v20, %v921_v20  ;;  %498 = vmatpush.bf16.msra.mxu1 %v662_v1 }
  0x90   : > { %513 = vmatpush.bf16.msra.mxu2 %v642_v22 }
  0x91   : > { %288 = vadd.xlane.f32.xlu0 %v287_v21  ;;  %v638_v21 = vor.u32 %v729_v14, %v635_v16 }
  0x93   : > { %499 = vmatpush.bf16.msra.mxu1 %v650_v10 }
  0x97   : > { %500 = vmatpush.bf16.msra.mxu1 %v638_v21 }
 0x104   : > { %v289_v23 = vpop.xlane.xlu0 %288 }
 0x105   : > { %v290_v24 = vmul.f32 %v289_v23, %v918_v17  ;;  %v793_v17 = vld [vmem:[%s951_s2] ss:$0 sm:$0xff] }
 0x107   : > { %v291_v25 = vadd.f32 1e-05, %v290_v24 }
 0x109   : > { %796 = vrsqrt.f32 %v291_v25  ;;  %vm298_vm2 = vweird.f32 %v291_v25 }
 0x10f   : > { %v797_v26 = vpop.eup %796 }
 0x110   : > { %v293_v27 = vmul.f32 %v797_v26, %v291_v25  ;;  %vm299_vm1 = vweird.f32 %v797_v26 }
 0x111   : > { %vm300_vm3 = vmor %vm298_vm2, %vm299_vm1 }
 0x112   : > { %v294_v28 = vmul.f32 %v797_v26, %v293_v27 }
 0x114   : > { %v295_v29 = vmul.f32 0.5, %v294_v28 }
 0x116   : > { %v296_v30 = vsub.f32 1.5, %v295_v29 }
 0x118   : > { %v297_v31 = vmul.f32 %v797_v26, %v296_v30 }
 0x11a   : > { %v301_v33 = vsel %vm300_vm3, %v797_v26, %v297_v31 }
 0x11b   : > { %v302_v34 = vmul.f32 %v301_v33, %v921_v20 }
 0x11d   : > { %v306_v35 = vmul.f32 %v792_v32, %v302_v34 }
 0x11f   : > { %v310_v36 = vadd.f32 %v793_v17, %v306_v35 }
 0x121   : > { %v311_v37 = vpack.c.bf16 %v310_v36, %v310_v36 }
 0x123   : > { %488 = vmatmul.bf16.vlgmr.msra.gmra.mxu0 %v311_v37  ;;  %501 = vmatmul.bf16.vlgmr.msra.gmra.mxu1 %v311_v37 }
 0x124   : > { %514 = vmatmul.bf16.vlgmr.msra.gmra.mxu2 %v311_v37 }
 0x1a0   : > { %v489_v41 = vpop.f32.mrf.mxu0  ;;  %v502_v42 = vpop.f32.mrf.mxu1 }
 0x1a1   : > { %v490_v20 = vadd.f32 %v489_v41, %v346_v39  ;;  %v503_v43 = vadd.f32 %v502_v42, %v347_v40 }
 0x1a3   : > { %v519_v44 = vpack.c.bf16 %v503_v43, %v490_v20 }
 0x1a5   : > { %521 = vst [vmem:[%s271_s21] sm:$0xff] %v519_v44 }
 0x1a7   : > { %v515_v46 = vpop.f32.mrf.mxu2 }
 0x1a8   : > { %v516_v47 = vadd.f32 %v515_v46, %v348_v45  ;;  %v491_v48 = vpop.f32.mrf.mxu0  ;;  %v504_v49 = vpop.f32.mrf.mxu1 }
 0x1aa   : > { %v520_v50 = vpack.c.bf16 %v516_v47, %v516_v47 }
 0x1ac   : > { %522 = vst [vmem:[%s271_s21 + $0x8] sm:$0xf] %v520_v50 }
 0x1af   : > { %v517_v51 = vpop.f32.mrf.mxu2 }
 0x1b0 PF: > { %s16_s20 = sadd.s32 1, %s854_s20   ;;  %s955_s18 = smov %s850_s19 }
 0x1b1   : > { %p13_p8 = scmp.ge.s32.totalorder %s16_s20, 4   ;;  %s956_s19 = smov %s958_s22 }
 0x1b3   :  { %15 = sbr.rel (!%p13_p8) target bundleno = 2 (0x2), region = 75 }
 0x1b8   :  { %552 = vsyncpa [#allocation3], 1 }
 0x1b9   :  { %554 = vsyncpa [#allocation3 + $0x1], 1 }

// kernel: audio_encoder_forward.12
= control target key start
LH: loop header
LB: loop body
LE: loop exit
PB: predicated region body
PF: predicated region fallthrough
CT: control target
= control target key end

     0   :  { %s997_s18 = smov 0   ;;  %s999_s19 = smov 0   ;;  %s1124_s0 = inlined_call_operand.vmem [shape: bf16[2,9,128], index: 0, kind: input, shape index: {}]   ;;  %s1125_s1 = inlined_call_operand.vmem [shape: bf16[2,9,128], index: 1, kind: input, shape index: {}]   ;;  %s1126_s2 = inlined_call_operand.vmem [shape: bf16[3,128,128], index: 2, kind: input, shape index: {}]   ;;  %s1127_s3 = inlined_call_operand.vmem [shape: f32[1,128], index: 3, kind: input, shape index: {}]   ;;  %s1128_s4 = inlined_call_operand.vmem [shape: bf16[8,128], index: 4, kind: input, shape index: {}]   ;;  %s1129_s5 = inlined_call_operand.vmem [shape: bf16[2,8,128], index: 5, kind: output, shape index: {}]  }
   0x1   :  { %s1001_s20 = smov 0  }
   0x2 LB: > { %s27_s21 = sadd.s32 1, %s960_s19  ;;  %p745_p0 = scmp.ge.s32.totalorder %s964_s20, 1  ;;  %s964_s20 = sphi %s1001_s20, %s15_s20   ;;  %s960_s19 = sphi %s999_s19, %s1131_s19   ;;  %s956_s18 = sphi %s997_s18, %s1130_s18  }
   0x3   : > { %p29_p1 = scmp.ge.s32.totalorder %s27_s21, 2  ;;  %p237_p2 = scmp.lt.s32.totalorder %s964_s20, 3 }
   0x5   : > { %s1133_s21 = smov (%p29_p1, %s27_s21), 0  ;;  %p238_p3 = pnand %p745_p0, %p237_p2 }
   0x6   : > { %p283_p4 = scmp.lt.s32.totalorder (!%p238_p3), %s956_s18, 1 }
   0x7   : > { %241 = sbr.rel (%p238_p3) target bundleno = 240 (0xf0), region = 40 }
   0xc   : > { %v902_v0 = vld [vmem:[%s1126_s2 + $0x78] sm:$0xff]  ;;  %v901_v3 = vld [vmem:[%s1126_s2 + $0x70] sm:$0xff]  ;;  %s1135_s18 = smov (!%p283_p4, %s956_s18), 1  ;;  %v900_v6 = vld [vmem:[%s1126_s2 + $0x68] sm:$0xff] }
   0xd   : > { %v894_v1 = vld [vmem:[%s1126_s2 + $0x38] sm:$0xff]  ;;  %394 = vmatpush.bf16.msra.mxu0 %v902_v0  ;;  %v893_v4 = vld [vmem:[%s1126_s2 + $0x30] sm:$0xff]  ;;  %v892_v7 = vld [vmem:[%s1126_s2 + $0x28] sm:$0xff]  ;;  %s885_s15 = sshll.u32 %s1135_s18, 3  ;;  %s750_s14 = sshll.u32 %s1135_s18, 2 }
   0xe   : > { %v911_v2 = vld [vmem:[%s1126_s2 + $0xb8] sm:$0xff]  ;;  %455 = vmatpush.bf16.msra.mxu1 %v894_v1  ;;  %v910_v5 = vld [vmem:[%s1126_s2 + $0xb0] sm:$0xff]  ;;  %v909_v8 = vld [vmem:[%s1126_s2 + $0xa8] sm:$0xff]  ;;  %s1059_s28 = scalar_lea.vmem %s1124_s0, %s885_s15  ;;  %s292_s11 = scalar_lea.vmem %s1125_s1, %s885_s15 }
   0xf   : > { %548 = vmatpush.bf16.msra.mxu2 %v911_v2  ;;  %v899_v9 = vld [vmem:[%s1126_s2 + $0x60] sm:$0xff]  ;;  %v898_v12 = vld [vmem:[%s1126_s2 + $0x58] sm:$0xff]  ;;  %v897_v17 = vld [vmem:[%s1126_s2 + $0x50] sm:$0xff]  ;;  %s310_s22 = scalar_lea.vmem %s1129_s5, %s750_s14 }
  0x10   : > { %v891_v10 = vld [vmem:[%s1126_s2 + $0x20] sm:$0xff]  ;;  %v890_v13 = vld [vmem:[%s1126_s2 + $0x18] sm:$0xff]  ;;  %v889_v18 = vld [vmem:[%s1126_s2 + $0x10] sm:$0xff] }
  0x11   : > { %395 = vmatpush.bf16.msra.mxu0 %v901_v3  ;;  %v908_v11 = vld [vmem:[%s1126_s2 + $0xa0] sm:$0xff]  ;;  %v907_v14 = vld [vmem:[%s1126_s2 + $0x98] sm:$0xff]  ;;  %v906_v20 = vld [vmem:[%s1126_s2 + $0x90] sm:$0xff] }
  0x12   : > { %456 = vmatpush.bf16.msra.mxu1 %v893_v4  ;;  %v849_v15 = vld [vmem:[%s1059_s28] sm:$0xf]  ;;  %v903_v16 = vld [vmem:[%s1059_s28] sm:$0x10]  ;;  %v896_v21 = vld [vmem:[%s1126_s2 + $0x48] sm:$0xff] }
  0x13   : > { %549 = vmatpush.bf16.msra.mxu2 %v910_v5  ;;  %v850_v19 = vor.u32 %v903_v16, %v849_v15  ;;  %v888_v22 = vld [vmem:[%s1126_s2 + $0x8] sm:$0xff]  ;;  %v895_v25 = vld [vmem:[%s1126_s2 + $0x40] sm:$0xff] }
  0x14   : > { %v905_v24 = vld [vmem:[%s1126_s2 + $0x88] sm:$0xff]  ;;  %v887_v26 = vld [vmem:[%s1126_s2] sm:$0xff] }
  0x15   : > { %396 = vmatpush.bf16.msra.mxu0 %v900_v6  ;;  %v495_v23 = vshll.u32 %v850_v19, 16  ;;  %v493_v27 = vshrl.u32 %v850_v19, 16  ;;  %v904_v29 = vld [vmem:[%s1126_s2 + $0x80] sm:$0xff] }
  0x16   : > { %457 = vmatpush.bf16.msra.mxu1 %v892_v7  ;;  %v328_v30 = vld [vmem:[%s292_s11] sm:$0xf] }
  0x17   : > { %550 = vmatpush.bf16.msra.mxu2 %v909_v8  ;;  %v497_v28 = vrot.slane %v495_v23, 1  ;;  %v311_v31 = vld [vmem:[%s1059_s28] sm:$0xf]  ;;  %v966_v8 = vmov -1.0  }
  0x18   : > { %v937_v36 = vld [vmem:[%s1127_s3] ss:$0 sm:$0xff] }
  0x19   : > { %397 = vmatpush.bf16.msra.mxu0 %v899_v9  ;;  %v498_v32 = vor.u32 %v497_v28, %v493_v27 }
  0x1a   : > { %458 = vmatpush.bf16.msra.mxu1 %v891_v10  ;;  %v607_v10 = vld [vmem:[%s1128_s4] sm:$0xf] }
  0x1b   : > { %551 = vmatpush.bf16.msra.mxu2 %v908_v11 }
  0x1d   : > { %398 = vmatpush.bf16.msra.mxu0 %v898_v12 }
  0x1e   : > { %459 = vmatpush.bf16.msra.mxu1 %v890_v13 }
  0x1f   : > { %552 = vmatpush.bf16.msra.mxu2 %v907_v14  ;;  %v608_v14 = vunpack.c.l.bf16 %v607_v10 }
  0x21   : > { %399 = vmatpush.bf16.msra.mxu0 %v897_v17 }
  0x22   : > { %460 = vmatpush.bf16.msra.mxu1 %v889_v18 }
  0x23   : > { %553 = vmatpush.bf16.msra.mxu2 %v906_v20 }
  0x25   : > { %400 = vmatpush.bf16.msra.mxu0 %v896_v21 }
  0x26   : > { %461 = vmatpush.bf16.msra.mxu1 %v888_v22 }
  0x27   : > { %554 = vmatpush.bf16.msra.mxu2 %v905_v24 }
  0x29   : > { %401 = vmatpush.bf16.msra.mxu0 %v895_v25 }
  0x2a   : > { %462 = vmatpush.bf16.msra.mxu1 %v887_v26 }
  0x2b   : > { %555 = vmatpush.bf16.msra.mxu2 %v904_v29 }
  0x2c   : > { %402 = vmatmul.bf16.vlgmr.msra.gmra.mxu0 %v328_v30 }
  0x2d   : > { %463 = vmatmul.bf16.vlgmr.msra.gmra.mxu1 %v311_v31 }
  0x2e   : > { %556 = vmatmul.bf16.vlgmr.msra.gmra.mxu2 %v498_v32 }
  0xa9   : > { %v403_v33 = vpop.f32.mrf.mxu0 }
  0xaa   : > { %v464_v34 = vpop.f32.mrf.mxu1 }
  0xab   : > { %v465_v35 = vadd.f32 %v464_v34, %v403_v33 }
  0xb1   : > { %v557_v37 = vpop.f32.mrf.mxu2  ;;  %v405_v39 = vpop.f32.mrf.mxu0 }
  0xb2   : > { %v561_v38 = vadd.f32 %v557_v37, %v465_v35  ;;  %v466_v40 = vpop.f32.mrf.mxu1 }
  0xb4   : > { %v566_v41 = vadd.f32 %v937_v36, %v561_v38 }
  0xb6   : > { %v568_v42 = vmul.f32 0.70710677, %v566_v41  ;;  %v567_v12 = vmul.f32 0.5, %v566_v41 }
  0xb8   : > { %v571_v43 = vand.u32 2147483647, %v568_v42  ;;  %vm569_vm4 = vcmp.ge.f32.partialorder %v568_v42, 0.0 }
  0xb9   : > { %v559_v44 = vpop.f32.mrf.mxu2  ;;  %v570_v9 = vsel %vm569_vm4, 1.0, %v966_v8 }
  0xba   : > { %v572_v45 = vmul.f32 0.3275911, %v571_v43  ;;  %v598_v57 = vsub.f32 0.0, %v571_v43 }
  0xbc   : > { %v573_v46 = vadd.f32 1.0, %v572_v45  ;;  %v599_v60 = vmul.f32 %v598_v57, %v571_v43 }
  0xbe   : > { %938 = vrcp.f32 %v573_v46  ;;  %v585_v50 = vand.u32 2147483648, %v573_v46  ;;  %v583_v52 = vand.u32 2147483647, %v573_v46  ;;  %vm579_vm1 = vweird.f32 %v573_v46 }
  0xbf   : > { %v600_v63 = vmul.f32 1.442695, %v599_v60 }
  0xc0   : > { %v586_v54 = vor.u32 1.1754944e-38, %v585_v50  ;;  %vm584_vm3 = vcmp.eq.f32.partialorder %v583_v52, 8.507059e+37 }
  0xc1   : > { %940 = vpow2.f32 %v600_v63 }
  0xc4   : > { %v939_v47 = vpop.eup %938 }
  0xc5   : > { %v575_v48 = vmul.f32 %v939_v47, %v573_v46  ;;  %vm580_vm0 = vweird.f32 %v939_v47 }
  0xc6   : > { %vm581_vm2 = vmor %vm579_vm1, %vm580_vm0 }
  0xc7   : > { %v576_v49 = vsub.f32 1.0, %v575_v48  ;;  %v941_v5 = vpop.eup %940 }
  0xc9   : > { %v577_v51 = vmul.f32 %v939_v47, %v576_v49 }
  0xcb   : > { %v578_v53 = vadd.f32 %v939_v47, %v577_v51 }
  0xcd   : > { %v582_v55 = vsel %vm581_vm2, %v939_v47, %v578_v53 }
  0xce   : > { %v587_v56 = vsel %vm584_vm3, %v586_v54, %v582_v55 }
  0xcf   : > { %v589_v58 = vmul.f32 1.0614054, %v587_v56 }
  0xd1   : > { %v590_v59 = vadd.f32 -1.4531521, %v589_v58 }
  0xd3   : > { %v591_v61 = vmul.f32 %v590_v59, %v587_v56 }
  0xd5   : > { %v592_v62 = vadd.f32 1.4214138, %v591_v61 }
  0xd7   : > { %v593_v0 = vmul.f32 %v592_v62, %v587_v56 }
  0xd9   : > { %v594_v1 = vadd.f32 -0.28449672, %v593_v0 }
  0xdb   : > { %v595_v2 = vmul.f32 %v594_v1, %v587_v56 }
  0xdd   : > { %v596_v3 = vadd.f32 0.2548296, %v595_v2 }
  0xdf   : > { %v597_v4 = vmul.f32 %v596_v3, %v587_v56 }
  0xe1   : > { %v602_v6 = vmul.f32 %v941_v5, %v597_v4 }
  0xe3   : > { %v603_v7 = vsub.f32 1.0, %v602_v6 }
  0xe5   : > { %v604_v11 = vmul.f32 %v603_v7, %v570_v9 }
  0xe7   : > { %v605_v13 = vadd.f32 1.0, %v604_v11 }
  0xe9   : > { %v606_v15 = vmul.f32 %v605_v13, %v567_v12 }
  0xeb   : > { %v609_v16 = vadd.f32 %v608_v14, %v606_v15 }
  0xed   : > { %v610_v17 = vpack.c.bf16 %v609_v16, %v609_v16 }
  0xef   : > { %611 = vst [vmem:[%s310_s22] sm:$0xf] %v610_v17 }
  0xf0 PF: > { %s15_s20 = sadd.s32 1, %s964_s20   ;;  %s1130_s18 = smov %s960_s19 }
  0xf1   : > { %p12_p5 = scmp.ge.s32.totalorder %s15_s20, 4   ;;  %s1131_s19 = smov %s1133_s21 }
  0xf3   :  { %14 = sbr.rel (!%p12_p5) target bundleno = 2 (0x2), region = 84 }

// kernel: audio_encoder_forward.15
= control target key start
LH: loop header
LB: loop body
LE: loop exit
PB: predicated region body
PF: predicated region fallthrough
CT: control target
= control target key end

     0   :  { %9 = vsyncpa [#allocation3], 0  ;;  %s634_s15 = smov 0   ;;  %s636_s16 = smov 0   ;;  %s681_s0 = inlined_call_operand.vmem [shape: bf16[2,8,128], index: 0, kind: input, shape index: {}, may-alias: {0,4}]   ;;  %s682_s1 = inlined_call_operand.vmem [shape: bf16[2,8,128], index: 1, kind: input, shape index: {}]   ;;  %s683_s2 = inlined_call_operand.hbm [shape: bf16[128,128], index: 2, kind: input, shape index: {}]   ;;  %s684_s3 = inlined_call_operand.vmem [shape: f32[1,128], index: 3, kind: input, shape index: {}]   ;;  %s685_s4 = inlined_call_operand.vmem [shape: bf16[2,8,128], index: 4, kind: output, shape index: {}, may-alias: {0,4}]  }
   0x1   :  { %s638_s17 = smov 0  }
   0x2 LB: > { %s458_s18 = sadd.s32 4294967295, %s604_s17   ;;  %s27_s19 = sadd.s32 1, %s600_s16  ;;  %s604_s17 = sphi %s638_s17, %s15_s17   ;;  %s600_s16 = sphi %s636_s16, %s687_s16   ;;  %s596_s15 = sphi %s634_s15, %s686_s15  }
   0x3   : > { %p29_p0 = scmp.ge.s32.totalorder %s27_s19, 2  ;;  %p460_p1 = scmp.ge.s32.totalorder %s604_s17, 1 }
   0x4   : > { %p158_p2 = scmp.lt.s32.totalorder %s604_s17, 3  ;;  %p518_p4 = scmp.eq.s32.totalorder %s458_s18, 0 }
   0x5   : > { %s689_s19 = smov (%p29_p0, %s27_s19), 0  ;;  %s169_s22 = sshll.u32 %s683_s2, 4  ;;  %s170_s22 = int_to_ptr.hbm [resolvable:$true] %s169_s22 }
   0x6   : > { %p159_p3 = pnand %p460_p1, %p158_p2  ;;  %s606_s23 = smov [#allocation2]  }
   0x7   : > { %s171_s24 = sshll.u32 %s606_s23, 4  ;;  %s607_s25 = smov 64   ;;  %s172_s24 = int_to_ptr.vmem [resolvable:$true] %s171_s24 }
   0x8   : > { %p514_p5 = pneg %p159_p3  ;;  %s608_s26 = smov 4  }
   0x9   : > { %210 = sbr.rel (%p159_p3) target bundleno = 181 (0xb5), region = 36 }
   0xa   : > { %p515_p6 = pnand %p518_p4, %p514_p5 }
   0xc   : > { %517 = dma.hbm_to_vmem [thread:$0]  (!%p515_p6), %s170_s22, 1024, %s172_s24, [#allocation3], %s607_s25, %s607_s25, %s608_s26  }
   0xe   : > { %591 = dma.done.wait (%p518_p4), [#allocation3], 1024  }
   0xf   : > { %593 = vsyncadd (%p518_p4), [#allocation3], 4294966272  ;;  %v509_v0 = vld [vmem:[#allocation2 + $0x38] sm:$0xff]  ;;  %v508_v1 = vld [vmem:[#allocation2 + $0x30] sm:$0xff]  ;;  %p248_p7 = scmp.lt.s32.totalorder %s596_s15, 1 }
  0x10   : > { %338 = vmatpush.bf16.msra.mxu0 %v509_v0  ;;  %v507_v2 = vld [vmem:[#allocation2 + $0x28] sm:$0xff]  ;;  %v506_v3 = vld [vmem:[#allocation2 + $0x20] sm:$0xff]  ;;  %v505_v4 = vld [vmem:[#allocation2 + $0x18] sm:$0xff] }
  0x11   : > { %v504_v5 = vld [vmem:[#allocation2 + $0x10] sm:$0xff]  ;;  %s691_s15 = smov (!%p248_p7, %s596_s15), 1  ;;  %v503_v6 = vld [vmem:[#allocation2 + $0x8] sm:$0xff]  ;;  %v502_v7 = vld [vmem:[#allocation2] sm:$0xff] }
  0x12   : > { %s465_s27 = sshll.u32 %s691_s15, 2  ;;  %v547_v10 = vld [vmem:[%s684_s3] ss:$0 sm:$0xff] }
  0x13   : > { %s261_s30 = scalar_lea.vmem %s682_s1, %s465_s27  ;;  %s254_s7 = scalar_lea.vmem %s681_s0, %s465_s27 }
  0x14   : > { %339 = vmatpush.bf16.msra.mxu0 %v508_v1  ;;  %v269_v8 = vld [vmem:[%s261_s30] sm:$0xf]  ;;  %s268_s12 = scalar_lea.vmem %s685_s4, %s465_s27 }
  0x15   : > { %v351_v9 = vld [vmem:[%s254_s7] sm:$0xf] }
  0x16   : > { %v352_v11 = vunpack.c.l.bf16 %v351_v9 }
  0x18   : > { %340 = vmatpush.bf16.msra.mxu0 %v507_v2 }
  0x1c   : > { %341 = vmatpush.bf16.msra.mxu0 %v506_v3 }
  0x20   : > { %342 = vmatpush.bf16.msra.mxu0 %v505_v4 }
  0x24   : > { %343 = vmatpush.bf16.msra.mxu0 %v504_v5 }
  0x28   : > { %344 = vmatpush.bf16.msra.mxu0 %v503_v6 }
  0x2c   : > { %345 = vmatpush.bf16.msra.mxu0 %v502_v7 }
  0x2f   : > { %346 = vmatmul.bf16.vlgmr.msra.gmra.mxu0 %v269_v8 }
  0xac   : > { %v347_v12 = vpop.f32.mrf.mxu0 }
  0xad   : > { %v348_v13 = vadd.f32 %v547_v10, %v347_v12 }
  0xaf   : > { %v353_v14 = vadd.f32 %v352_v11, %v348_v13 }
  0xb1   : > { %v354_v15 = vpack.c.bf16 %v353_v14, %v353_v14 }
  0xb3   : > { %355 = vst [vmem:[%s268_s12] sm:$0xf] %v354_v15 }
  0xb4   : > { %v349_v16 = vpop.f32.mrf.mxu0 }
  0xb5 PF: > { %s15_s17 = sadd.s32 1, %s604_s17   ;;  %s686_s15 = smov %s600_s16 }
  0xb6   : > { %p12_p8 = scmp.ge.s32.totalorder %s15_s17, 4   ;;  %s687_s16 = smov %s689_s19 }
  0xb8   :  { %14 = sbr.rel (!%p12_p8) target bundleno = 2 (0x2), region = 74 }
  0xbd   :  { %381 = vsyncpa [#allocation3], 1 }
  0xbe   :  { %383 = vsyncpa [#allocation3 + $0x1], 1 }

// kernel: audio_encoder_forward.21
= control target key start
LH: loop header
LB: loop body
LE: loop exit
PB: predicated region body
PF: predicated region fallthrough
CT: control target
= control target key end

     0   :  { %8 = vsyncpa [#allocation3], 0  ;;  %s596_s0 = inlined_call_operand.vmem [shape: bf16[2,8,128], index: 0, kind: input, shape index: {}]   ;;  %s597_s1 = inlined_call_operand.vmem [shape: f32[1,128], index: 1, kind: input, shape index: {}]   ;;  %s598_s2 = inlined_call_operand.vmem [shape: f32[1,128], index: 2, kind: input, shape index: {}]   ;;  %s599_s3 = inlined_call_operand.hbm [shape: f32[2,8,128], index: 3, kind: output, shape index: {}]  }
   0x1   :  { %10 = vsyncpa [#allocation3 + $0x1], 0  ;;  %s493_s12 = smov 0   ;;  %s495_s13 = smov 0  }
   0x2   :  { %s497_s14 = smov 0   ;;  %s499_s15 = smov 0  }
   0x3   :  { %s501_s16 = smov 0   ;;  %s503_s17 = smov 0  }
   0x4 LB: > { %s319_s18 = sadd.s32 4294967295, %s470_s17   ;;  %s320_s19 = sadd.s32 4294967294, %s470_s17   ;;  %s470_s17 = sphi %s503_s17, %s16_s17   ;;  %s466_s16 = sphi %s501_s16, %s606_s16   ;;  %s462_s15 = sphi %s499_s15, %s605_s15   ;;  %s458_s14 = sphi %s497_s14, %s604_s14   ;;  %s454_s13 = sphi %s495_s13, %s603_s13   ;;  %s450_s12 = sphi %s493_s12, %s602_s12  }
   0x5   : > { %s28_s20 = sadd.s32 1, %s466_s16  ;;  %s107_s21 = sadd.s32 1, %s458_s14 }
   0x6   : > { %p30_p0 = scmp.ge.s32.totalorder %s28_s20, 2  ;;  %p117_p1 = scmp.ne.s32.totalorder %s458_s14, %s454_s13 }
   0x7   : > { %p118_p2 = scmp.eq.s32.totalorder %s319_s18, 1  ;;  %p123_p3 = scmp.ne.s32.totalorder %s454_s13, %s450_s12 }
   0x8   : > { %s608_s20 = smov (%p30_p0, %s28_s20), 0  ;;  %p124_p5 = scmp.eq.s32.totalorder %s320_s19, 1 }
   0x9   : > { %p533_p4 = por %p118_p2, %p117_p1  ;;  %s102_s23 = ssub.s32 %s466_s16, %s608_s20 }
   0xa   : > { %p323_p6 = scmp.ge.s32.totalorder %s470_s17, 1  ;;  %p105_p7 = scmp.eq.s32.totalorder %s102_s23, 0 }
   0xb   : > { %p540_p8 = por %p124_p5, %p123_p3  ;;  %p158_p9 = scmp.lt.s32.totalorder %s470_s17, 3 }
   0xc   : > { %s546_s25 = scalar_select %p105_p7, %s458_s14, %s107_s21  }
   0xd   : > { %p159_p10 = pnand %p323_p6, %p158_p9 }
   0xe   : > { %p184_p11 = scmp.lt.s32.totalorder (!%p159_p10), %s462_s15, 1  ;;  %s181_s4 = sand.u32 (!%p159_p10), 1, %s454_s13  }
   0xf   : > { %162 = sbr.rel (%p159_p10) target bundleno = 296 (0x128), region = 32  ;;  %s324_s5 = sshll.u32 (!%p159_p10), %s181_s4, 3 }
  0x10   : > { %s327_s6 = sshll.u32 (!%p159_p10), %s462_s15, 3  ;;  %s183_s21 = scalar_lea.vmem (!%p159_p10), [#allocation2], %s324_s5 }
  0x11   : > { %s243_s11 = scalar_lea.hbm (!%p159_p10), %s599_s3, %s327_s6  ;;  %s412_s6 = scalar_lea.hbm (!%p159_p10), %s599_s3, 16 }
  0x12   : > { %s247_s23 = sshll.u32 (!%p159_p10), %s243_s11, 4  ;;  %s248_s23 = int_to_ptr.hbm [resolvable:$true] %s247_s23 }
  0x14   : > { %s185_s26 = scalar_select %p184_p11, %s462_s15, 1  ;;  %v472_v2 = vmov 128.0   ;;  %v386_v22 = vld [vmem:[%s597_s1] ss:$0 sm:$0xff] }
  0x15   : > { %388 = vrcp.f32 %v472_v2  ;;  %v387_v25 = vld [vmem:[%s598_s2] ss:$0 sm:$0xff]  ;;  %s245_s15 = sshll.u32 %s183_s21, 4  ;;  %s246_s15 = int_to_ptr.vmem [resolvable:$true] %s245_s15 }
  0x16   : > { %s325_s27 = sshll.u32 %s185_s26, 2  ;;  %s232_s26 = scalar_lea.sflag [#allocation3], %s181_s4 }
  0x17   : > { %s190_s30 = scalar_lea.vmem %s596_s0, %s325_s27  ;;  %s406_s27 = sshra.s32 %s248_s23, 4  ;;  %s407_s27 = int_to_ptr.hbm [resolvable:$true] %s406_s27 }
  0x18   : > { %v191_v0 = vld [vmem:[%s190_s30] sm:$0xf]  ;;  %s408_s28 = scalar_lea.hbm %s407_s27, 8  ;;  %p413_p1 = scmp.lt.s32.totalorder %s407_s27, %s599_s3 }
  0x19   : > { %v192_v1 = vunpack.c.l.bf16 %v191_v0  ;;  %p409_p12 = scmp.ne.s32.totalorder %s407_s27, %s408_s28  ;;  %p414_p2 = scmp.lt.s32.totalorder %s412_s6, %s408_s28 }
  0x1b   : > { %195 = vadd.xlane.f32.xlu0 %v192_v1  ;;  %v389_v3 = vpop.eup %388  ;;  %p410_p13 = pnand %p409_p12, %p533_p4  ;;  %p415_p3 = por %p414_p2, %p413_p1 }
  0x1c   : > { %v198_v4 = vmul.f32 128.0, %v389_v3  ;;  %vm202_vm0 = vweird.f32 %v389_v3 }
  0x1d   : > { %p411_p0 = pneg %p410_p13 }
  0x1e   : > { %v199_v5 = vsub.f32 1.0, %v198_v4 }
  0x1f   : > { %p416_p5 = pnand %p415_p3, %p411_p0 }
  0x20   : > { %v200_v6 = vmul.f32 %v389_v3, %v199_v5 }
  0x22   : > { %v201_v7 = vadd.f32 %v389_v3, %v200_v6 }
  0x24   : > { %v203_v8 = vsel %vm202_vm0, %v389_v3, %v201_v7 }
  0x8e   : > { %v196_v9 = vpop.xlane.xlu0 %195 }
  0x8f   : > { %v204_v10 = vmul.f32 %v203_v8, %v196_v9 }
  0x91   : > { %v205_v11 = vsub.f32 %v192_v1, %v204_v10 }
  0x93   : > { %v206_v12 = vmul.f32 %v205_v11, %v205_v11 }
  0x95   : > { %207 = vadd.xlane.f32.xlu0 %v206_v12 }
 0x108   : > { %v208_v13 = vpop.xlane.xlu0 %207 }
 0x109   : > { %v209_v14 = vmul.f32 %v208_v13, %v203_v8 }
 0x10b   : > { %v210_v15 = vadd.f32 1e-05, %v209_v14 }
 0x10d   : > { %390 = vrsqrt.f32 %v210_v15  ;;  %vm217_vm2 = vweird.f32 %v210_v15 }
 0x113   : > { %v391_v16 = vpop.eup %390 }
 0x114   : > { %v212_v17 = vmul.f32 %v391_v16, %v210_v15  ;;  %vm218_vm1 = vweird.f32 %v391_v16 }
 0x115   : > { %vm219_vm3 = vmor %vm217_vm2, %vm218_vm1 }
 0x116   : > { %v213_v18 = vmul.f32 %v391_v16, %v212_v17 }
 0x118   : > { %v214_v19 = vmul.f32 0.5, %v213_v18 }
 0x11a   : > { %v215_v20 = vsub.f32 1.5, %v214_v19 }
 0x11c   : > { %v216_v21 = vmul.f32 %v391_v16, %v215_v20 }
 0x11e   : > { %v220_v23 = vsel %vm219_vm3, %v391_v16, %v216_v21 }
 0x11f   : > { %v221_v24 = vmul.f32 %v220_v23, %v205_v11 }
 0x121   : > { %v225_v26 = vmul.f32 %v386_v22, %v221_v24 }
 0x123   : > { %v229_v27 = vadd.f32 %v387_v25, %v225_v26 }
 0x125   : > { %230 = vst [vmem:[%s183_s21] sm:$0xff] %v229_v27 }
 0x126   : > { %419 = shalt.err (!%p416_p5)
}
 0x127   : > { %330 = dma.vmem_to_hbm [thread:$0]  (%p533_p4), %s246_s15, 128, %s248_s23, %s232_s26  }
 0x128 PF: > { %p336_p6 = scmp.ge.s32.totalorder %s470_s17, 2  ;;  %s259_s4 = sand.u32 1, %s450_s12  }
 0x129   : > { %s260_s8 = scalar_lea.sflag [#allocation3], %s259_s4 }
 0x12a   : > { %p333_p7 = pnand %p336_p6, %p540_p8 }
 0x12c   : > { %p334_p9 = pneg %p333_p7 }
 0x12e   : > { %445 = dma.done.wait (%p334_p9), %s260_s8, 128  }
 0x12f   : > { %447 = vsyncadd (%p334_p9), %s260_s8, 4294967168  ;;  %s16_s17 = sadd.s32 1, %s470_s17   ;;  %s602_s12 = smov %s454_s13 }
 0x130   : > { %p13_p10 = scmp.ge.s32.totalorder %s16_s17, 4   ;;  %s603_s13 = smov %s458_s14 }
 0x131   : > { %s604_s14 = smov %s546_s25  ;;  %s605_s15 = smov %s466_s16 }
 0x132   : > { %s606_s16 = smov %s608_s20  ;;  %15 = sbr.rel (!%p13_p10) target bundleno = 4 (0x4), region = 67 }
 0x137   :  { %266 = vsyncpa [#allocation3], 1 }
 0x138   :  { %268 = vsyncpa [#allocation3 + $0x1], 1 }

// kernel: audio_encoder_forward.14
= control target key start
LH: loop header
LB: loop body
LE: loop exit
PB: predicated region body
PF: predicated region fallthrough
CT: control target
= control target key end

     0   :  { %s2606_s12 = smov 0   ;;  %s2608_s13 = smov 0   ;;  %s3182_s0 = inlined_call_operand.vmem [shape: bf16[2,8,384], index: 0, kind: input, shape index: {}, may-alias: {0,1,2}]   ;;  %s3183_s1 = inlined_call_operand.vmem [shape: bf16[2,8,384], index: 1, kind: input, shape index: {}, may-alias: {0,1,2}]   ;;  %s3184_s2 = inlined_call_operand.vmem [shape: bf16[2,8,384], index: 2, kind: input, shape index: {}, may-alias: {0,1,2}]   ;;  %s3185_s3 = inlined_call_operand.vmem [shape: bf16[2,8,128], index: 3, kind: output, shape index: {}]  }
   0x1   :  { %s2610_s14 = smov 0  }
   0x2 LB: > { %s39_s15 = sadd.s32 1, %s2571_s13  ;;  %p2403_p0 = scmp.ge.s32.totalorder %s2575_s14, 1  ;;  %s2575_s14 = sphi %s2610_s14, %s13_s14   ;;  %s2571_s13 = sphi %s2608_s13, %s3187_s13   ;;  %s2567_s12 = sphi %s2606_s12, %s3186_s12  }
   0x3   : > { %p41_p1 = scmp.ge.s32.totalorder %s39_s15, 2  ;;  %p228_p2 = scmp.lt.s32.totalorder %s2575_s14, 3 }
   0x5   : > { %s3189_s15 = smov (%p41_p1, %s39_s15), 0  ;;  %p229_p3 = pnand %p2403_p0, %p228_p2 }
   0x6   : > { %p290_p4 = scmp.lt.s32.totalorder (!%p229_p3), %s2567_s12, 1  ;;  %s2577_s24 = smov (!%p229_p3), 96  }
   0x7   : > { %232 = sbr.rel (%p229_p3) target bundleno = 1431 (0x597), region = 32  ;;  %s2578_s25 = smov (!%p229_p3), 32  }
   0x8   : > { %s2579_s26 = smov (!%p229_p3), 64  }
   0xc   : > { %s3191_s12 = smov (!%p290_p4, %s2567_s12), 1  ;;  %v2580_v2 = vmov 1983009808   ;;  %v2581_v14 = vmov 1934713408   ;;  %vm390_vm0 = vcmask 1047556  }
   0xd   : > { %s2627_s16 = smul.u32 12, %s3191_s12  ;;  %v381_v3 = vunpack.c.l.s4 %v2580_v2  ;;  %v395_v15 = vunpack.c.l.s4 %v2581_v14  ;;  %vm354_vm1 = vcmask 261120   ;;  %vm1822_vm3 = vcmask 64512   ;;  %s2407_s4 = sshll.u32 %s3191_s12, 2 }
   0xe   : > { %vm345_vm4 = vcmask 7168   ;;  %vm1997_vm5 = vcmask 1043456   ;;  %vm2246_vm6 = vcmask 523264   ;;  %vm2248_vm7 = vcmask 785408   ;;  %s339_s7 = scalar_lea.vmem %s3185_s3, %s2407_s4 }
   0xf   : > { %s2419_s17 = sadd.s32 4, %s2627_s16  ;;  %s301_s20 = scalar_lea.vmem %s3182_s0, %s2627_s16  ;;  %v2648_v7 = vunpack.c.0.s8 %v381_v3  ;;  %v2653_v22 = vunpack.c.0.s8 %v395_v15 }
  0x10   : > { %s314_s23 = scalar_lea.vmem %s3183_s1, %s2419_s17  ;;  %v2637_v0 = vld [vmem:[%s301_s20] sm:$0xf]  ;;  %s2421_s27 = sadd.s32 8, %s2627_s16 }
  0x11   : > { %v432_v1 = vld [vmem:[%s314_s23] sm:$0xf]  ;;  %361 = vrot.lane.b32.xlu2 %v2637_v0, %s2577_s24  ;;  %s328_s30 = scalar_lea.vmem %s3184_s2, %s2421_s27 }
  0x12   : > { %434 = vrot.lane.b32.xlu0 %v432_v1, %s2577_s24  ;;  %438 = vrot.lane.b32.xlu1 %v432_v1, %s2578_s25  ;;  %v443_v5 = vshrl.u32 %v432_v1, 16 }
  0x1a   : > { %436 = vrot.lane.b32.xlu0 %v432_v1, %s2579_s26  ;;  %365 = vrot.lane.b32.xlu1 %v2637_v0, %s2578_s25 }
  0x22   : > { %363 = vrot.lane.b32.xlu0 %v2637_v0, %s2579_s26 }
  0x6b   : > { %v2668_v43 = vpop.permute.xlu2 %361 }
  0x84   : > { %v435_v4 = vpop.permute.xlu0 %434  ;;  %v439_v9 = vpop.permute.xlu1 %438 }
  0x85   : > { %v444_v6 = vshrl.u32 %v435_v4, 16  ;;  %v442_v8 = vpack.i.b16 %v435_v4, %v432_v1  ;;  %v450_v12 = vshrl.u32 %v439_v9, 16 }
  0x87   : > { %v445_v10 = vpack.i.b16 %v444_v6, %v443_v5  ;;  %v456_v11 = vperm.slane %v442_v8, %v2648_v7 }
  0x89   : > { %v482_v16 = vperm.slane %v445_v10, %v2648_v7  ;;  %v464_v19 = vrot.slane %v456_v11, 4 }
  0x8b   : > { %v490_v23 = vrot.slane %v482_v16, 4 }
  0x8c   : > { %v437_v13 = vpop.permute.xlu0 %436  ;;  %v2670_v45 = vpop.permute.xlu1 %365 }
  0x8d   : > { %v448_v17 = vpack.i.b16 %v439_v9, %v437_v13  ;;  %v449_v18 = vshrl.u32 %v437_v13, 16 }
  0x8f   : > { %v451_v20 = vpack.i.b16 %v450_v12, %v449_v18  ;;  %v461_v21 = vperm.slane %v448_v17, %v2648_v7 }
  0x91   : > { %v462_v24 = vrot.slane %v461_v21, 4  ;;  %v487_v25 = vperm.slane %v451_v20, %v2648_v7  ;;  %v465_v26 = vsel %vm390_vm0, %v461_v21, %v464_v19 }
  0x92   : > { %v473_v30 = vperm.slane %v465_v26, %v2653_v22 }
  0x93   : > { %v488_v27 = vrot.slane %v487_v25, 4  ;;  %v491_v28 = vsel %vm390_vm0, %v487_v25, %v490_v23  ;;  %v463_v29 = vsel %vm390_vm0, %v462_v24, %v456_v11 }
  0x94   : > { %v499_v31 = vperm.slane %v491_v28, %v2653_v22  ;;  %v469_v32 = vperm.slane %v463_v29, %v2653_v22  ;;  %v476_v39 = vrot.slane %v473_v30, 4  ;;  %v2672_v48 = vpop.permute.xlu0 %363 }
  0x95   : > { %v489_v33 = vsel %vm390_vm0, %v488_v27, %v482_v16 }
  0x96   : > { %2473 = vxpose.binary.xlu1.c.b16.start.end [1/2] (short) (narrow) %v499_v31, %v473_v30, 32  ;;  %v495_v34 = vperm.slane %v489_v33, %v2653_v22  ;;  %v474_v35 = vrot.slane %v469_v32, 4  ;;  %v502_v40 = vrot.slane %v499_v31, 4  ;;  %v477_v41 = vsel %vm390_vm0, 0, %v476_v39 }
  0x98   : > { %2458 = vxpose.binary.xlu2.c.b16.start.end [1/2] (short) (narrow) %v495_v34, %v469_v32, 32  ;;  %v500_v36 = vrot.slane %v495_v34, 4  ;;  %v475_v37 = vsel %vm390_vm0, 0, %v474_v35  ;;  %v503_v42 = vsel %vm390_vm0, 0, %v502_v40 }
  0x9a   : > { %v501_v38 = vsel %vm390_vm0, 0, %v500_v36 }
  0x9b   : > { %2468 = vxpose.binary.xlu0.c.b16.start.end [1/2] (short) (narrow) %v501_v38, %v475_v37, 32 }
  0xb8   : > { %2463 = vxpose.binary.xlu2.c.b16.start.end [1/2] (short) (narrow) %v503_v42, %v477_v41, 32 }
 0x139   : > { %v2459_v44 = vpop.trf.xlu2 }
 0x13a   : > { %v765_v62 = vshrl.u32 %v2459_v44, 16 }
 0x141   : > { %v2460_v46 = vpop.trf.xlu2 }
 0x142   : > { %v2474_v47 = vpop.trf.xlu1  ;;  %v766_v59 = vshrl.u32 %v2460_v46, 16  ;;  %v2680_v1 = vpack.i.b16 %v2460_v46, %v2459_v44 }
 0x143   : > { %v781_v53 = vshrl.u32 %v2474_v47, 16 }
 0x144   : > { %v2682_v2 = vpack.i.b16 %v766_v59, %v765_v62 }
 0x147   : > { %v2469_v52 = vpop.trf.xlu0 }
 0x148   : > { %v773_v5 = vshrl.u32 %v2469_v52, 16 }
 0x149   : > { %v2461_v49 = vpop.trf.xlu2 }
 0x14a   : > { %v2475_v50 = vpop.trf.xlu1  ;;  %v797_v41 = vshrl.u32 %v2461_v49, 16 }
 0x14b   : > { %v782_v54 = vshrl.u32 %v2475_v50, 16  ;;  %v2674_v55 = vpack.i.b16 %v2475_v50, %v2474_v47 }
 0x14d   : > { %v2676_v56 = vpack.i.b16 %v782_v54, %v781_v53  ;;  %v825_v61 = vrot.slane %v2674_v55, 4 }
 0x14f   : > { %v2470_v60 = vpop.trf.xlu0  ;;  %v881_v63 = vrot.slane %v2676_v56, 4  ;;  %v826_v3 = vsel %vm390_vm0, %v825_v61, %v2680_v1 }
 0x150   : > { %v774_v9 = vshrl.u32 %v2470_v60, 16  ;;  %v2691_v12 = vperm.slane %v826_v3, %v2648_v7  ;;  %v2693_v14 = vpack.i.b16 %v2470_v60, %v2469_v52 }
 0x151   : > { %v2462_v51 = vpop.trf.xlu2  ;;  %v882_v4 = vsel %vm390_vm0, %v881_v63, %v2682_v2 }
 0x152   : > { %v2476_v58 = vpop.trf.xlu1  ;;  %v2699_v17 = vperm.slane %v882_v4, %v2648_v7  ;;  %v2701_v19 = vpack.i.b16 %v774_v9, %v773_v5  ;;  %v851_v26 = vrot.slane %v2691_v12, 4  ;;  %v798_v38 = vshrl.u32 %v2462_v51, 16 }
 0x153   : > { %v813_v23 = vshrl.u32 %v2476_v58, 16  ;;  %v795_v42 = vpack.i.b16 %v2462_v51, %v2461_v49 }
 0x154   : > { %v907_v32 = vrot.slane %v2699_v17, 4  ;;  %v799_v52 = vpack.i.b16 %v798_v38, %v797_v41 }
 0x157   : > { %v2471_v18 = vpop.trf.xlu0 }
 0x158   : > { %v805_v54 = vshrl.u32 %v2471_v18, 16 }
 0x159   : > { %v2464_v57 = vpop.trf.xlu2 }
 0x15a   : > { %v789_v8 = vshrl.u32 %v2464_v57, 16  ;;  %v2477_v13 = vpop.trf.xlu1 }
 0x15b   : > { %v814_v24 = vshrl.u32 %v2477_v13, 16  ;;  %v2712_v28 = vpack.i.b16 %v2477_v13, %v2476_v58 }
 0x15d   : > { %v815_v34 = vpack.i.b16 %v814_v24, %v813_v23  ;;  %v937_v39 = vrot.slane %v2712_v28, 4 }
 0x15f   : > { %v993_v44 = vrot.slane %v815_v34, 4  ;;  %v2472_v46 = vpop.trf.xlu0  ;;  %v938_v53 = vsel %vm390_vm0, %v937_v39, %v795_v42 }
 0x160   : > { %v806_v59 = vshrl.u32 %v2472_v46, 16  ;;  %v803_v63 = vpack.i.b16 %v2472_v46, %v2471_v18  ;;  %v944_v3 = vperm.slane %v938_v53, %v2648_v7 }
 0x161   : > { %v2465_v6 = vpop.trf.xlu2  ;;  %v994_v62 = vsel %vm390_vm0, %v993_v44, %v799_v52 }
 0x162   : > { %v2688_v10 = vpack.i.b16 %v2465_v6, %v2464_v57  ;;  %v790_v11 = vshrl.u32 %v2465_v6, 16  ;;  %v807_v4 = vpack.i.b16 %v806_v59, %v805_v54  ;;  %v951_v13 = vrot.slane %v803_v63, 4 }
 0x163   : > { %v963_v18 = vrot.slane %v944_v3, 4 }
 0x164   : > { %v2695_v15 = vpack.i.b16 %v790_v11, %v789_v8  ;;  %v837_v16 = vrot.slane %v2688_v10, 4  ;;  %v1000_v8 = vperm.slane %v994_v62, %v2648_v7 }
 0x166   : > { %v838_v20 = vsel %vm390_vm0, %v837_v16, %v2693_v14  ;;  %v893_v21 = vrot.slane %v2695_v15, 4  ;;  %v1019_v23 = vrot.slane %v1000_v8, 4 }
 0x167   : > { %v2707_v25 = vperm.slane %v838_v20, %v2648_v7 }
 0x168   : > { %v894_v27 = vsel %vm390_vm0, %v893_v21, %v2701_v19  ;;  %v1007_v21 = vrot.slane %v807_v4, 4 }
 0x169   : > { %v2466_v29 = vpop.trf.xlu2  ;;  %v852_v30 = vsel %vm390_vm0, %v2707_v25, %v851_v26  ;;  %v2717_v31 = vperm.slane %v894_v27, %v2648_v7 }
 0x16a   : > { %v2721_v33 = vperm.slane %v852_v30, %v2653_v22  ;;  %v821_v58 = vshrl.u32 %v2466_v29, 16 }
 0x16b   : > { %v908_v35 = vsel %vm390_vm0, %v2717_v31, %v907_v32 }
 0x16c   : > { %v875_v36 = vrot.slane %v2721_v33, 4  ;;  %v2727_v37 = vperm.slane %v908_v35, %v2653_v22 }
 0x16e   : > { %v931_v40 = vrot.slane %v2727_v37, 4  ;;  %v876_v47 = vsel %vm390_vm0, 0, %v875_v36 }
 0x170   : > { %v932_v50 = vsel %vm390_vm0, 0, %v931_v40 }
 0x171   : > { %2478 = vxpose.binary.xlu0.c.b16.start.end [1/2] (short) (narrow) %v932_v50, %v876_v47, 16  ;;  %v2467_v57 = vpop.trf.xlu2  ;;  %v939_v47 = vrot.slane %v795_v42, 4  ;;  %v995_v50 = vrot.slane %v799_v52, 4  ;;  %v827_v52 = vrot.slane %v2680_v1, 4 }
 0x172   : > { %v819_v60 = vpack.i.b16 %v2467_v57, %v2466_v29  ;;  %v822_v61 = vshrl.u32 %v2467_v57, 16 }
 0x173   : > { %v940_v54 = vsel %vm390_vm0, %v2712_v28, %v939_v47  ;;  %v996_v57 = vsel %vm390_vm0, %v815_v34, %v995_v50  ;;  %v828_v34 = vsel %vm390_vm0, %v2674_v55, %v827_v52 }
 0x174   : > { %v823_v49 = vpack.i.b16 %v822_v61, %v821_v58  ;;  %v949_v51 = vrot.slane %v819_v60, 4  ;;  %v952_v24 = vsel %vm390_vm0, %v819_v60, %v951_v13  ;;  %v948_v62 = vperm.slane %v940_v54, %v2648_v7 }
 0x175   : > { %v960_v40 = vperm.slane %v952_v24, %v2648_v7  ;;  %v1004_v42 = vperm.slane %v996_v57, %v2648_v7  ;;  %v849_v54 = vrot.slane %v2707_v25, 4  ;;  %v905_v57 = vrot.slane %v2717_v31, 4 }
 0x176   : > { %v950_v5 = vsel %vm390_vm0, %v949_v51, %v803_v63  ;;  %v1005_v6 = vrot.slane %v823_v49, 4  ;;  %v1008_v29 = vsel %vm390_vm0, %v823_v49, %v1007_v21  ;;  %v883_v63 = vrot.slane %v2682_v2, 4 }
 0x177   : > { %v956_v9 = vperm.slane %v950_v5, %v2648_v7  ;;  %v1016_v41 = vperm.slane %v1008_v29, %v2648_v7  ;;  %v973_v60 = vrot.slane %v960_v40, 4 }
 0x178   : > { %v1006_v11 = vsel %vm390_vm0, %v1005_v6, %v807_v4  ;;  %v884_v51 = vsel %vm390_vm0, %v2676_v56, %v883_v63  ;;  %v1031_v4 = vrot.slane %v1004_v42, 4  ;;  %v836_v56 = vperm.slane %v828_v34, %v2648_v7 }
 0x179   : > { %v1012_v16 = vperm.slane %v1006_v11, %v2648_v7  ;;  %v961_v20 = vrot.slane %v956_v9, 4  ;;  %v964_v32 = vsel %vm390_vm0, %v956_v9, %v963_v18  ;;  %v1029_v61 = vrot.slane %v1016_v41, 4 }
 0x17a   : > { %v972_v44 = vperm.slane %v964_v32, %v2653_v22  ;;  %v974_v49 = vsel %vm390_vm0, %v973_v60, %v948_v62  ;;  %v895_v9 = vrot.slane %v2701_v19, 4  ;;  %v1032_v55 = vsel %vm390_vm0, %v1016_v41, %v1031_v4 }
 0x17b   : > { %v962_v26 = vsel %vm390_vm0, %v961_v20, %v944_v3  ;;  %v1017_v27 = vrot.slane %v1012_v16, 4  ;;  %v1020_v35 = vsel %vm390_vm0, %v1012_v16, %v1019_v23  ;;  %v1030_v28 = vsel %vm390_vm0, %v1029_v61, %v1004_v42 }
 0x17c   : > { %v968_v30 = vperm.slane %v962_v26, %v2653_v22  ;;  %v1028_v46 = vperm.slane %v1020_v35, %v2653_v22  ;;  %v975_v3 = vrot.slane %v948_v62, 4  ;;  %v2769_v5 = vperm.slane %v974_v49, %v2653_v22 }
 0x17d   : > { %v1018_v36 = vsel %vm390_vm0, %v1017_v27, %v1000_v8  ;;  %v2772_v6 = vperm.slane %v1030_v28, %v2653_v22  ;;  %v987_v1 = vrot.slane %v972_v44, 4  ;;  %v839_v8 = vrot.slane %v2693_v14, 4 }
 0x17e   : > { %v1024_v38 = vperm.slane %v1018_v36, %v2653_v22  ;;  %v985_v39 = vrot.slane %v968_v30, 4  ;;  %v1043_v2 = vrot.slane %v1028_v46, 4  ;;  %v976_v11 = vsel %vm390_vm0, %v960_v40, %v975_v3 }
 0x17f   : > { %v892_v13 = vperm.slane %v884_v51, %v2648_v7  ;;  %v840_v16 = vsel %vm390_vm0, %v2688_v10, %v839_v8  ;;  %v896_v20 = vsel %vm390_vm0, %v2695_v15, %v895_v9  ;;  %v989_v21 = vrot.slane %v2769_v5, 4 }
 0x180   : > { %2487 = vxpose.binary.xlu2.c.b16.start.end [1/2] (short) (narrow) %v1024_v38, %v968_v30, 16  ;;  %v1041_v53 = vrot.slane %v1024_v38, 4  ;;  %v986_v58 = vsel %vm390_vm0, 0, %v985_v39  ;;  %v1045_v14 = vrot.slane %v2772_v6, 4  ;;  %v988_v19 = vsel %vm390_vm0, 0, %v987_v1 }
 0x181   : > { %2481 = vxpose.binary.xlu0.c.b16.start.end [1/2] (short) (narrow) %v1028_v46, %v972_v44, 16  ;;  %v1044_v18 = vsel %vm390_vm0, 0, %v1043_v2  ;;  %v984_v23 = vperm.slane %v976_v11, %v2653_v22  ;;  %v1040_v24 = vperm.slane %v1032_v55, %v2653_v22  ;;  %v848_v26 = vperm.slane %v840_v16, %v2648_v7 }
 0x182   : > { %v1042_v59 = vsel %vm390_vm0, 0, %v1041_v53  ;;  %v904_v10 = vperm.slane %v896_v20, %v2648_v7  ;;  %v990_v15 = vsel %vm390_vm0, 0, %v989_v21  ;;  %v1046_v27 = vsel %vm390_vm0, 0, %v1045_v14 }
 0x183   : > { %2499 = vxpose.binary.xlu1.c.b16.start.end [1/2] (short) (narrow) %v1042_v59, %v986_v58, 16  ;;  %v863_v29 = vrot.slane %v836_v56, 4  ;;  %v919_v30 = vrot.slane %v892_v13, 4  ;;  %v991_v39 = vrot.slane %v984_v23, 4  ;;  %v1047_v40 = vrot.slane %v1040_v24, 4 }
 0x184   : > { %v861_v58 = vrot.slane %v848_v26, 4  ;;  %v917_v59 = vrot.slane %v904_v10, 4  ;;  %v850_v60 = vsel %vm390_vm0, %v849_v54, %v2691_v12  ;;  %v906_v61 = vsel %vm390_vm0, %v905_v57, %v2699_v17 }
 0x185   : > { %v864_v32 = vsel %vm390_vm0, %v848_v26, %v863_v29  ;;  %v920_v35 = vsel %vm390_vm0, %v904_v10, %v919_v30  ;;  %v992_v46 = vsel %vm390_vm0, 0, %v991_v39  ;;  %v1048_v47 = vsel %vm390_vm0, 0, %v1047_v40 }
 0x186   : > { %v872_v36 = vperm.slane %v864_v32, %v2653_v22  ;;  %v928_v38 = vperm.slane %v920_v35, %v2653_v22  ;;  %v862_v62 = vsel %vm390_vm0, %v861_v58, %v836_v56  ;;  %v918_v42 = vsel %vm390_vm0, %v917_v59, %v892_v13 }
 0x187   : > { %v856_v25 = vperm.slane %v850_v60, %v2653_v22  ;;  %v912_v31 = vperm.slane %v906_v61, %v2653_v22  ;;  %v868_v52 = vperm.slane %v862_v62, %v2653_v22  ;;  %v924_v63 = vperm.slane %v918_v42, %v2653_v22 }
 0x188   : > { %v879_v41 = vrot.slane %v872_v36, 4  ;;  %v935_v44 = vrot.slane %v928_v38, 4  ;;  %v370_v20 = vshrl.u32 %v2637_v0, 16  ;;  %v371_v21 = vshrl.u32 %v2668_v43, 16 }
 0x189   : > { %v873_v49 = vrot.slane %v856_v25, 4  ;;  %v933_v28 = vrot.slane %v924_v63, 4  ;;  %v369_v14 = vpack.i.b16 %v2668_v43, %v2637_v0 }
 0x18a   : > { %v880_v50 = vsel %vm390_vm0, 0, %v879_v41  ;;  %v936_v53 = vsel %vm390_vm0, 0, %v935_v44 }
 0x18b   : > { %v874_v12 = vsel %vm390_vm0, 0, %v873_v49  ;;  %v934_v51 = vsel %vm390_vm0, 0, %v933_v28  ;;  %v383_v10 = vperm.slane %v369_v14, %v2648_v7 }
 0x18d   : > { %v392_v32 = vrot.slane %v383_v10, 4 }
 0x190   : > { %2490 = vxpose.binary.xlu2.c.b16.start.end [1/2] (short) (narrow) %v1044_v18, %v988_v19, 16  ;;  %v377_v19 = vshrl.u32 %v2670_v45, 16  ;;  %v376_v18 = vshrl.u32 %v2672_v48, 16 }
 0x191   : > { %2484 = vxpose.binary.xlu0.c.b16.start.end [1/2] (short) (narrow) %v1040_v24, %v984_v23, 16  ;;  %v372_v24 = vpack.i.b16 %v371_v21, %v370_v20 }
 0x193   : > { %2502 = vxpose.binary.xlu1.c.b16.start.end [1/2] (short) (narrow) %v1046_v27, %v990_v15, 16  ;;  %v375_v15 = vpack.i.b16 %v2670_v45, %v2672_v48  ;;  %v378_v27 = vpack.i.b16 %v377_v19, %v376_v18  ;;  %v410_v30 = vperm.slane %v372_v24, %v2648_v7 }
 0x195   : > { %v388_v0 = vperm.slane %v375_v15, %v2648_v7  ;;  %v415_v43 = vperm.slane %v378_v27, %v2648_v7 }
 0x197   : > { %v389_v39 = vrot.slane %v388_v0, 4  ;;  %v393_v40 = vsel %vm390_vm0, %v388_v0, %v392_v32  ;;  %v416_v41 = vrot.slane %v415_v43, 4 }
 0x198   : > { %v401_v48 = vperm.slane %v393_v40, %v2653_v22 }
 0x19a   : > { %v404_v60 = vrot.slane %v401_v48, 4 }
 0x1a0   : > { %2493 = vxpose.binary.xlu2.c.b16.start.end [1/2] (short) (narrow) %v1048_v47, %v992_v46, 16  ;;  %v391_v46 = vsel %vm390_vm0, %v389_v39, %v383_v10 }
 0x1a1   : > { %2508 = vxpose.binary.xlu0.c.b16.start.end [1/2] (short) (narrow) %v936_v53, %v880_v50, 16  ;;  %v417_v50 = vsel %vm390_vm0, %v416_v41, %v410_v30  ;;  %v397_v59 = vperm.slane %v391_v46, %v2653_v22 }
 0x1a2   : > { %v423_v62 = vperm.slane %v417_v50, %v2653_v22 }
 0x1a3   : > { %2505 = vxpose.binary.xlu1.c.b16.start.end [1/2] (short) (narrow) %v2727_v37, %v2721_v33, 16  ;;  %v929_v33 = vrot.slane %v912_v31, 4  ;;  %v877_v37 = vrot.slane %v868_v52, 4  ;;  %v402_v49 = vrot.slane %v397_v59, 4 }
 0x1a4   : > { %v428_v28 = vrot.slane %v423_v62, 4 }
 0x1a5   : > { %v930_v17 = vsel %vm390_vm0, 0, %v929_v33  ;;  %v878_v34 = vsel %vm390_vm0, 0, %v877_v37  ;;  %v405_v33 = vsel %vm390_vm0, 0, %v404_v60 }
 0x1a6   : > { %v429_v21 = vsel %vm390_vm0, 0, %v428_v28 }
 0x1b0   : > { %2496 = vxpose.binary.xlu2.c.b16.start.end [1/2] (short) (narrow) %v930_v17, %v874_v12, 16 }
 0x1b1   : > { %2517 = vxpose.binary.xlu0.c.b16.start.end [1/2] (short) (narrow) %v934_v51, %v878_v34, 16 }
 0x1b3   : > { %2514 = vxpose.binary.xlu1.c.b16.start.end [1/2] (short) (narrow) %v912_v31, %v856_v25, 16 }
 0x1c0   : > { %2511 = vxpose.binary.xlu2.c.b16.start.end [1/2] (short) (narrow) %v2772_v6, %v2769_v5, 16 }
 0x1c3   : > { %2523 = vxpose.binary.xlu1.c.b16.start.end [1/2] (short) (narrow) %v924_v63, %v868_v52, 16 }
 0x1d0   : > { %2520 = vxpose.binary.xlu2.c.b16.start.end [1/2] (short) (narrow) %v928_v38, %v872_v36, 16  ;;  %v418_v36 = vrot.slane %v410_v30, 4 }
 0x1d2   : > { %v419_v45 = vsel %vm390_vm0, %v415_v43, %v418_v36 }
 0x1d3   : > { %v427_v53 = vperm.slane %v419_v45, %v2653_v22 }
 0x1d5   : > { %v430_v25 = vrot.slane %v427_v53, 4 }
 0x1d7   : > { %v431_v17 = vsel %vm390_vm0, 0, %v430_v25  ;;  %v2914_v46 = vsel %vm390_vm0, %v430_v25, %v423_v62 }
 0x1d8   : > { %v607_v14 = vrot.slane %v431_v17, 4 }
 0x1da   : > { %v608_v0 = vsel %vm390_vm0, %v607_v14, %v429_v21 }
 0x1db   : > { %v612_v53 = vperm.slane %v608_v0, %v2648_v7 }
 0x21d   : > { %v2822_v3 = vpop.trf.xlu0 }
 0x221   : > { %v2824_v4 = vpop.trf.xlu2 }
 0x225   : > { %v2826_v1 = vpop.trf.xlu0 }
 0x229   : > { %v2828_v2 = vpop.trf.xlu2 }
 0x22d   : > { %v2830_v8 = vpop.trf.xlu0 }
 0x22e   : > { %v1641_v31 = vrot.slane %v2830_v8, 4 }
 0x22f   : > { %v2500_v9 = vpop.trf.xlu1 }
 0x231   : > { %v2491_v11 = vpop.trf.xlu2 }
 0x232   : > { %v1647_v47 = vrot.slane %v2491_v11, 4  ;;  %v588_v11 = vrot.slane %v405_v33, 4 }
 0x234   : > { %v1648_v42 = vsel %vm390_vm0, %v1647_v47, %v2500_v9 }
 0x235   : > { %v2832_v56 = vpop.trf.xlu0  ;;  %v1652_v37 = vperm.slane %v1648_v42, %v2648_v7 }
 0x236   : > { %v1681_v12 = vrot.slane %v2832_v56, 4 }
 0x237   : > { %v2501_v55 = vpop.trf.xlu1  ;;  %v1665_v56 = vrot.slane %v1652_v37, 4  ;;  %v613_v37 = vrot.slane %v612_v53, 4 }
 0x238   : > { %v1682_v19 = vsel %vm390_vm0, %v1681_v12, %v2828_v2  ;;  %v2901_v2 = vsel %vm390_vm0, %v404_v60, %v397_v59  ;;  %v1607_v60 = vrot.slane %v2826_v1, 4 }
 0x239   : > { %v2492_v13 = vpop.trf.xlu2  ;;  %v1686_v27 = vperm.slane %v1682_v19, %v2648_v7  ;;  %v587_v48 = vperm.slane %v2901_v2, %v2648_v7 }
 0x23a   : > { %v1687_v57 = vrot.slane %v2492_v13, 4 }
 0x23c   : > { %v1688_v52 = vsel %vm390_vm0, %v1687_v57, %v2501_v55  ;;  %v1642_v55 = vsel %vm390_vm0, %v1641_v31, %v2824_v4 }
 0x23d   : > { %v2834_v6 = vpop.trf.xlu0  ;;  %v1692_v34 = vperm.slane %v1688_v52, %v2648_v7  ;;  %v1646_v24 = vperm.slane %v1642_v55, %v2648_v7 }
 0x23e   : > { %v1653_v13 = vrot.slane %v2834_v6, 4 }
 0x23f   : > { %v2503_v16 = vpop.trf.xlu1  ;;  %v1705_v10 = vrot.slane %v1692_v34, 4  ;;  %v1666_v30 = vsel %vm390_vm0, %v1665_v56, %v1646_v24 }
 0x240   : > { %v1670_v41 = vperm.slane %v1666_v30, %v2653_v22 }
 0x241   : > { %v2494_v5 = vpop.trf.xlu2  ;;  %v1706_v39 = vsel %vm390_vm0, %v1705_v10, %v1686_v27 }
 0x242   : > { %v1659_v58 = vrot.slane %v2494_v5, 4  ;;  %v403_v5 = vsel %vm390_vm0, 0, %v402_v49  ;;  %v1710_v59 = vperm.slane %v1706_v39, %v2653_v22  ;;  %v1679_v52 = vrot.slane %v1670_v41, 4  ;;  %v2930_v49 = vld [vmem:[%s328_s30] sm:$0xf] }
 0x243   : > { %508 = vrot.lane.b32.xlu1 %v2930_v49, %s2579_s26  ;;  %506 = vrot.lane.b32.xlu0 %v2930_v49, %s2577_s24 }
 0x244   : > { %v1660_v63 = vsel %vm390_vm0, %v1659_v58, %v2503_v16  ;;  %v1719_v17 = vrot.slane %v1710_v59, 4 }
 0x245   : > { %v2847_v29 = vpop.trf.xlu0  ;;  %v1664_v51 = vperm.slane %v1660_v63, %v2648_v7 }
 0x247   : > { %v2842_v23 = vpop.trf.xlu1  ;;  %v1671_v4 = vrot.slane %v1664_v51, 4 }
 0x249   : > { %v2495_v26 = vpop.trf.xlu2 }
 0x24a   : > { %v1699_v16 = vrot.slane %v2495_v26, 4  ;;  %v589_v26 = vsel %vm390_vm0, %v588_v11, %v403_v5 }
 0x24b   : > { %v593_v40 = vperm.slane %v589_v26, %v2648_v7 }
 0x24c   : > { %v1700_v15 = vsel %vm390_vm0, %v1699_v16, %v2842_v23  ;;  %v1693_v23 = vrot.slane %v2847_v29, 4  ;;  %v1567_v29 = vrot.slane %v2822_v3, 4  ;;  %v606_v3 = vperm.slane %v2914_v46, %v2648_v7 }
 0x24d   : > { %v2859_v44 = vpop.trf.xlu0  ;;  %v1704_v43 = vperm.slane %v1700_v15, %v2648_v7  ;;  %v594_v25 = vrot.slane %v593_v40, 4 }
 0x24e   : > { %v1579_v57 = vrot.slane %v2859_v44, 4  ;;  %v614_v40 = vsel %vm390_vm0, %v613_v37, %v606_v3 }
 0x24f   : > { %v2852_v35 = vpop.trf.xlu1  ;;  %v1711_v62 = vrot.slane %v1704_v43, 4  ;;  %v595_v39 = vsel %vm390_vm0, %v594_v25, %v587_v48  ;;  %v618_v2 = vperm.slane %v614_v40, %v2653_v22 }
 0x250   : > { %v1561_v44 = vrot.slane %v2852_v35, 4 }
 0x251   : > { %v2854_v38 = vpop.trf.xlu2 }
 0x252   : > { %v1568_v31 = vsel %vm390_vm0, %v1567_v29, %v2854_v38  ;;  %v599_v29 = vperm.slane %v595_v39, %v2653_v22 }
 0x253   : > { %v1572_v35 = vperm.slane %v1568_v31, %v2648_v7  ;;  %v619_v31 = vrot.slane %v618_v2, 4 }
 0x254   : > { %v600_v25 = vrot.slane %v599_v29, 4 }
 0x255   : > { %v2880_v9 = vpop.trf.xlu0  ;;  %v1585_v15 = vrot.slane %v1572_v35, 4 }
 0x256   : > { %v1619_v34 = vrot.slane %v2880_v9, 4  ;;  %v601_v37 = vsel %vm390_vm0, 0, %v600_v25 }
 0x257   : > { %v2864_v54 = vpop.trf.xlu1 }
 0x259   : > { %v2867_v61 = vpop.trf.xlu2 }
 0x25a   : > { %v1608_v33 = vsel %vm390_vm0, %v1607_v60, %v2867_v61  ;;  %v1601_v61 = vrot.slane %v2864_v54, 4 }
 0x25b   : > { %v1612_v55 = vperm.slane %v1608_v33, %v2648_v7 }
 0x25d   : > { %v2518_v47 = vpop.trf.xlu0 }
 0x25e   : > { %v1580_v38 = vsel %vm390_vm0, %v1579_v57, %v2518_v47 }
 0x25f   : > { %v2882_v8 = vpop.trf.xlu1  ;;  %v1584_v56 = vperm.slane %v1580_v38, %v2648_v7  ;;  %v620_v38 = vsel %vm390_vm0, 0, %v619_v31 }
 0x260   : > { %v1562_v51 = vsel %vm390_vm0, %v1561_v44, %v2882_v8 }
 0x261   : > { %v2512_v20 = vpop.trf.xlu2  ;;  %v1566_v54 = vperm.slane %v1562_v51, %v2648_v7  ;;  %v1591_v30 = vrot.slane %v1584_v56, 4 }
 0x262   : > { %v1654_v18 = vsel %vm390_vm0, %v1653_v13, %v2512_v20 }
 0x263   : > { %v1658_v6 = vperm.slane %v1654_v18, %v2648_v7 }
 0x265   : > { %v1672_v32 = vsel %vm390_vm0, %v1671_v4, %v1658_v6  ;;  %v2519_v24 = vpop.trf.xlu0 }
 0x266   : > { %v1676_v45 = vperm.slane %v1672_v32, %v2653_v22 }
 0x267   : > { %v2516_v36 = vpop.trf.xlu1 }
 0x268   : > { %v1677_v63 = vrot.slane %v1676_v45, 4  ;;  %v1680_v28 = vsel %vm390_vm0, %v1676_v45, %v1679_v52  ;;  %v1602_v9 = vsel %vm390_vm0, %v1601_v61, %v2516_v36  ;;  %v1620_v36 = vsel %vm390_vm0, %v1619_v34, %v2519_v24 }
 0x269   : > { %v2513_v50 = vpop.trf.xlu2  ;;  %v1749_v14 = vshrl.u32 %v1680_v28, 16  ;;  %v1606_v32 = vperm.slane %v1602_v9, %v2648_v7  ;;  %v1624_v47 = vperm.slane %v1620_v36, %v2648_v7 }
 0x26a   : > { %v1694_v58 = vsel %vm390_vm0, %v1693_v23, %v2513_v50  ;;  %v1678_v16 = vsel %vm390_vm0, %v1677_v63, %v1670_v41  ;;  %v1625_v23 = vrot.slane %v1612_v55, 4  ;;  %v1586_v41 = vsel %vm390_vm0, %v1585_v15, %v1566_v54 }
 0x26b   : > { %v1698_v42 = vperm.slane %v1694_v58, %v2648_v7  ;;  %v1741_v6 = vshrl.u32 %v1678_v16, 16  ;;  %v1590_v48 = vperm.slane %v1586_v41, %v2653_v22  ;;  %v631_v55 = vshrl.u32 %v620_v38, 16 }
 0x26c   : > { %v1626_v46 = vsel %vm390_vm0, %v1625_v23, %v1606_v32  ;;  %v623_v54 = vpack.i.b16 %v618_v2, %v599_v29 }
 0x26d   : > { %v1712_v1 = vsel %vm390_vm0, %v1711_v62, %v1698_v42  ;;  %v1631_v62 = vrot.slane %v1624_v47, 4  ;;  %v1599_v52 = vrot.slane %v1590_v48, 4 }
 0x26e   : > { %v1716_v12 = vperm.slane %v1712_v1, %v2653_v22 }
 0x26f   : > { %v2524_v11 = vpop.trf.xlu1 }
 0x270   : > { %v1720_v13 = vsel %vm390_vm0, %v1716_v12, %v1719_v17  ;;  %v1717_v5 = vrot.slane %v1716_v12, 4 }
 0x271   : > { %v2521_v20 = vpop.trf.xlu2  ;;  %v1747_v21 = vpack.i.b16 %v1720_v13, %v1680_v28  ;;  %v1750_v19 = vshrl.u32 %v1720_v13, 16 }
 0x272   : > { %v1573_v18 = vrot.slane %v2521_v20, 4  ;;  %v1718_v8 = vsel %vm390_vm0, %v1717_v5, %v1710_v59  ;;  %v1630_v59 = vperm.slane %v1626_v46, %v2653_v22  ;;  %v629_v20 = vpack.i.b16 %v620_v38, %v601_v37 }
 0x273   : > { %1795 = vmatpush.bf16.msra.mxu2 %v1747_v21  ;;  %v1739_v10 = vpack.i.b16 %v1718_v8, %v1678_v16  ;;  %v1751_v4 = vpack.i.b16 %v1750_v19, %v1749_v14  ;;  %v1742_v26 = vshrl.u32 %v1718_v8, 16  ;;  %v624_v21 = vshrl.u32 %v599_v29, 16 }
 0x274   : > { %v1574_v27 = vsel %vm390_vm0, %v1573_v18, %v2524_v11  ;;  %v1639_v1 = vrot.slane %v1630_v59, 4  ;;  %v630_v11 = vshrl.u32 %v601_v37, 16  ;;  %v625_v14 = vshrl.u32 %v618_v2, 16 }
 0x275   : > { %v1578_v0 = vperm.slane %v1574_v27, %v2648_v7  ;;  %1763 = vmatpush.bf16.msra.mxu0 %v1739_v10  ;;  %1811 = vmatpush.bf16.msra.mxu3 %v1751_v4  ;;  %v1743_v43 = vpack.i.b16 %v1742_v26, %v1741_v6  ;;  %v577_v8 = vlaneseq  ;;  %v2582_v10 = vmov -1e+30  }
 0x276   : > { %v632_v9 = vpack.i.b16 %v631_v55, %v630_v11  ;;  %v626_v18 = vpack.i.b16 %v625_v14, %v624_v21  ;;  %v2585_v29 = vmov 0.0  }
 0x277   : > { %v1592_v45 = vsel %vm390_vm0, %v1591_v30, %v1578_v0  ;;  %1779 = vmatpush.bf16.msra.mxu1 %v1743_v43  ;;  %v2525_v53 = vpop.trf.xlu1  ;;  %v578_v24 = vand.u32 127, %v577_v8  ;;  %v2583_v30 = vmov -inf   ;;  %350 = vst.msk [vmem:[#allocation3] sm:$0xff] %vm345_vm4, %v2585_v29 }
 0x278   : > { %v1596_v58 = vperm.slane %v1592_v45, %v2653_v22  ;;  %346 = vst.msk [vmem:[#allocation2] sm:$0xff] %vm345_vm4, %v2583_v30 }
 0x279   : > { %v2522_v50 = vpop.trf.xlu2  ;;  %vm581_vm2 = vcmp.lt.s32.totalorder %v578_v24, 8  ;;  %347 = vst.msk [vmem:[#allocation2 + $0x8] sm:$0xff] %vm345_vm4, %v2583_v30 }
 0x27a   : > { %v1613_v57 = vrot.slane %v2522_v50, 4  ;;  %v1597_v63 = vrot.slane %v1596_v58, 4  ;;  %v1600_v44 = vsel %vm390_vm0, %v1596_v58, %v1599_v52  ;;  %v582_v4 = vsel %vm581_vm2, 0.0, %v2582_v10  ;;  %348 = vst.msk [vmem:[#allocation2 + $0x10] sm:$0xff] %vm345_vm4, %v2583_v30 }
 0x27b   : > { %v1733_v61 = vshrl.u32 %v1600_v44, 16  ;;  %349 = vst.msk [vmem:[#allocation2 + $0x18] sm:$0xff] %vm345_vm4, %v2583_v30 }
 0x27c   : > { %v1614_v60 = vsel %vm390_vm0, %v1613_v57, %v2525_v53  ;;  %v1598_v12 = vsel %vm390_vm0, %v1597_v63, %v1590_v48  ;;  %v2584_v53 = vmov 0   ;;  %351 = vst.msk [vmem:[#allocation3 + $0x8] sm:$0xff] %vm345_vm4, %v2585_v29 }
 0x27d   : > { %v1618_v42 = vperm.slane %v1614_v60, %v2648_v7  ;;  %v1725_v5 = vshrl.u32 %v1598_v12, 16  ;;  %2527 = vset.pattern.permute.xlu2 %v2584_v53  ;;  %2526 = vset.pattern.permute.xlu0 %v2584_v53  ;;  %352 = vst.msk [vmem:[#allocation3 + $0x10] sm:$0xff] %vm345_vm4, %v2585_v29 }
 0x27e   : > { %2528 = vset.pattern.permute.xlu1 %v2584_v53  ;;  %353 = vst.msk [vmem:[#allocation3 + $0x18] sm:$0xff] %vm345_vm4, %v2585_v29 }
 0x27f   : > { %v1632_v3 = vsel %vm390_vm0, %v1631_v62, %v1618_v42  ;;  %355 = vst.msk [vmem:[#allocation4] sm:$0xff] %vm354_vm1, %v2585_v29  ;;  %v3017_v57 = vld [vmem:[#allocation2] sm:$0xff] }
 0x280   : > { %v1636_v33 = vperm.slane %v1632_v3, %v2653_v22  ;;  %356 = vst.msk [vmem:[#allocation4 + $0x8] sm:$0xff] %vm354_vm1, %v2585_v29  ;;  %v3034_v63 = vld [vmem:[#allocation2 + $0x8] sm:$0xff]  ;;  %v515_v3 = vshrl.u32 %v2930_v49, 16 }
 0x281   : > { %357 = vst.msk [vmem:[#allocation4 + $0x10] sm:$0xff] %vm354_vm1, %v2585_v29  ;;  %v3022_v60 = vld [vmem:[#allocation2 + $0x10] sm:$0xff] }
 0x282   : > { %v1640_v28 = vsel %vm390_vm0, %v1636_v33, %v1639_v1  ;;  %v1637_v17 = vrot.slane %v1636_v33, 4  ;;  %358 = vst.msk [vmem:[#allocation4 + $0x18] sm:$0xff] %vm354_vm1, %v2585_v29  ;;  %v3029_v25 = vld [vmem:[#allocation2 + $0x18] sm:$0xff] }
 0x283   : > { %v1731_v35 = vpack.i.b16 %v1640_v28, %v1600_v44  ;;  %v1734_v34 = vshrl.u32 %v1640_v28, 16 }
 0x284   : > { %v1638_v51 = vsel %vm390_vm0, %v1637_v17, %v1630_v59 }
 0x285   : > { %1796 = vmatpush.bf16.msra.mxu2 %v1731_v35  ;;  %v1723_v13 = vpack.i.b16 %v1638_v51, %v1598_v12  ;;  %v1735_v16 = vpack.i.b16 %v1734_v34, %v1733_v61  ;;  %v1726_v56 = vshrl.u32 %v1638_v51, 16 }
 0x287   : > { %1764 = vmatpush.bf16.msra.mxu0 %v1723_v13  ;;  %1812 = vmatpush.bf16.msra.mxu3 %v1735_v16  ;;  %v1727_v19 = vpack.i.b16 %v1726_v56, %v1725_v5 }
 0x288   : > { %2410 = vmatmul.msk.bf16.vlgmr.msra.gmra.mxu2 %vm354_vm1, %v629_v20 }
 0x289   : > { %1780 = vmatpush.bf16.msra.mxu1 %v1727_v19 }
 0x28a   : > { %2408 = vmatmul.msk.bf16.vlgmr.msra.gmra.mxu0 %vm354_vm1, %v623_v54  ;;  %2411 = vmatmul.msk.bf16.vlgmr.msra.gmra.mxu3 %vm354_vm1, %v632_v9 }
 0x28c   : > { %2409 = vmatmul.msk.bf16.vlgmr.msra.gmra.mxu1 %vm354_vm1, %v626_v18 }
 0x2b5   : > { %v509_v2 = vpop.permute.xlu1 %508  ;;  %v507_v48 = vpop.permute.xlu0 %506 }
 0x2b6   : > { %v516_v44 = vshrl.u32 %v507_v48, 16  ;;  %v514_v38 = vpack.i.b16 %v507_v48, %v2930_v49  ;;  %v521_v51 = vshrl.u32 %v509_v2, 16 }
 0x2b8   : > { %v517_v17 = vpack.i.b16 %v516_v44, %v515_v3 }
 0x2ba   : > { %v554_v34 = vperm.slane %v517_v17, %v2648_v7 }
 0x2bc   : > { %v562_v56 = vrot.slane %v554_v34, 4 }
 0x307   : > { %v1766_v6 = vpop.f32.mrf.mxu0 }
 0x308   : > { %v2987_v26 = vadd.f32 %v1766_v6, %v582_v4 }
 0x309   : > { %v1782_v15 = vpop.f32.mrf.mxu1 }
 0x30a   : > { %v1823_v27 = vsel %vm1822_vm3, %v2987_v26, -inf  ;;  %v2997_v36 = vadd.f32 %v1782_v15, %v582_v4 }
 0x30b   : > { %1824 = vmax.xlane.f32.xlu1 %v1823_v27  ;;  %v1798_v32 = vpop.f32.mrf.mxu2 }
 0x30c   : > { %v2993_v0 = vadd.f32 %v1798_v32, %v582_v4  ;;  %v1826_v46 = vsel %vm1822_vm3, %v2997_v36, -inf }
 0x30d   : > { %v1814_v43 = vpop.f32.mrf.mxu3 }
 0x30e   : > { %v2999_v39 = vadd.f32 %v1814_v43, %v582_v4  ;;  %v1829_v40 = vsel %vm1822_vm3, %v2993_v0, -inf }
 0x30f   : > { %v1768_v23 = vpop.f32.mrf.mxu0  ;;  %1830 = vmax.xlane.f32.xlu0 %v1829_v40 }
 0x310   : > { %v1832_v41 = vsel %vm1822_vm3, %v2999_v39, -inf }
 0x311   : > { %v1784_v45 = vpop.f32.mrf.mxu1  ;;  %1833 = vmax.xlane.f32.xlu2 %v1832_v41 }
 0x313   : > { %1827 = vmax.xlane.f32.xlu1 %v1826_v46  ;;  %v1800_v47 = vpop.f32.mrf.mxu2 }
 0x315   : > { %v1816_v50 = vpop.f32.mrf.mxu3 }
 0x329   : > { %510 = vrot.lane.b32.xlu2 %v2930_v49, %s2578_s25  ;;  %v528_v49 = vperm.slane %v514_v38, %v2648_v7 }
 0x32b   : > { %v536_v13 = vrot.slane %v528_v49, 4 }
 0x37e   : > { %v1825_v58 = vpop.xlane.xlu1 %1824 }
 0x37f   : > { %v3020_v59 = vmax.f32 %v3017_v57, %v1825_v58 }
 0x381   : > { %v1839_v62 = vsub.f32 %v3017_v57, %v3020_v59  ;;  %2079 = vst.msk [vmem:[#allocation2] sm:$0xff] %vm345_vm4, %v3020_v59  ;;  %1853 = vperm.xlu2 %2527, %v3020_v59  }
 0x382   : > { %v1831_v42 = vpop.xlane.xlu0 %1830 }
 0x383   : > { %v3032_v31 = vmax.f32 %v3022_v60, %v1831_v42 }
 0x384   : > { %v1834_v52 = vpop.xlane.xlu2 %1833 }
 0x385   : > { %v1841_v33 = vsub.f32 %v3022_v60, %v3032_v31  ;;  %2081 = vst.msk [vmem:[#allocation2 + $0x10] sm:$0xff] %vm345_vm4, %v3032_v31  ;;  %v3042_v1 = vmax.f32 %v3029_v25, %v1834_v52  ;;  %1863 = vperm.xlu0 %2526, %v3032_v31  }
 0x386   : > { %v1828_v37 = vpop.xlane.xlu1 %1827 }
 0x387   : > { %v1842_v28 = vsub.f32 %v3029_v25, %v3042_v1  ;;  %2082 = vst.msk [vmem:[#allocation2 + $0x18] sm:$0xff] %vm345_vm4, %v3042_v1  ;;  %v3051_v12 = vmax.f32 %v3034_v63, %v1828_v37  ;;  %1868 = vperm.xlu1 %2528, %v3042_v1   ;;  %v1886_v25 = vld [vmem:[#allocation3 + $0x18] sm:$0xff] }
 0x389   : > { %v1840_v35 = vsub.f32 %v3034_v63, %v3051_v12  ;;  %2080 = vst.msk [vmem:[#allocation2 + $0x8] sm:$0xff] %vm345_vm4, %v3051_v12 }
 0x38c   : > { %v511_v61 = vpop.permute.xlu2 %510 }
 0x38d   : > { %v520_v11 = vpack.i.b16 %v511_v61, %v509_v2  ;;  %v522_v55 = vshrl.u32 %v511_v61, 16 }
 0x38f   : > { %v523_v16 = vpack.i.b16 %v522_v55, %v521_v51  ;;  %v533_v5 = vperm.slane %v520_v11, %v2648_v7  ;;  %1858 = vperm.xlu1 %2528, %v3051_v12  }
 0x391   : > { %v534_v20 = vrot.slane %v533_v5, 4  ;;  %v537_v21 = vsel %vm390_vm0, %v533_v5, %v536_v13  ;;  %v559_v14 = vperm.slane %v523_v16, %v2648_v7 }
 0x392   : > { %v545_v19 = vperm.slane %v537_v21, %v2653_v22 }
 0x393   : > { %v535_v54 = vsel %vm390_vm0, %v534_v20, %v528_v49  ;;  %v560_v9 = vrot.slane %v559_v14, 4  ;;  %v563_v18 = vsel %vm390_vm0, %v559_v14, %v562_v56 }
 0x394   : > { %v541_v8 = vperm.slane %v535_v54, %v2653_v22  ;;  %v548_v24 = vrot.slane %v545_v19, 4  ;;  %v571_v10 = vperm.slane %v563_v18, %v2653_v22 }
 0x395   : > { %v561_v4 = vsel %vm390_vm0, %v560_v9, %v554_v34 }
 0x396   : > { %v546_v6 = vrot.slane %v541_v8, 4  ;;  %v549_v15 = vsel %vm390_vm0, 0, %v548_v24  ;;  %v567_v27 = vperm.slane %v561_v4, %v2653_v22  ;;  %v574_v30 = vrot.slane %v571_v10, 4 }
 0x397   : > { %v1949_v32 = vrot.slane %v549_v15, 4  ;;  %v1944_v45 = vsel %vm390_vm0, %v548_v24, %v541_v8 }
 0x398   : > { %v547_v43 = vsel %vm390_vm0, 0, %v546_v6  ;;  %v572_v40 = vrot.slane %v567_v27, 4  ;;  %v575_v23 = vsel %vm390_vm0, 0, %v574_v30  ;;  %v1963_v53 = vsel %vm390_vm0, %v574_v30, %v567_v27 }
 0x399   : > { %v1968_v41 = vrot.slane %v575_v23, 4  ;;  %v1950_v46 = vsel %vm390_vm0, %v1949_v32, %v547_v43  ;;  %v1948_v2 = vperm.slane %v1944_v45, %v2648_v7  ;;  %v1967_v52 = vperm.slane %v1963_v53, %v2648_v7 }
 0x39a   : > { %v573_v47 = vsel %vm390_vm0, 0, %v572_v40  ;;  %v1954_v50 = vperm.slane %v1950_v46, %v2648_v7  ;;  %v1847_v6 = vmul.f32 1.442695, %v1841_v33  ;;  %v1845_v40 = vmul.f32 1.442695, %v1840_v35 }
 0x39b   : > { %v1969_v29 = vsel %vm390_vm0, %v1968_v41, %v573_v47  ;;  %v1849_v53 = vmul.f32 1.442695, %v1842_v28 }
 0x39c   : > { %v1955_v48 = vrot.slane %v1954_v50, 4  ;;  %v1973_v58 = vperm.slane %v1969_v29, %v2648_v7  ;;  %v1843_v50 = vmul.f32 1.442695, %v1839_v62  ;;  %v1885_v62 = vld [vmem:[#allocation3 + $0x10] sm:$0xff] }
 0x39e   : > { %v1956_v42 = vsel %vm390_vm0, %v1955_v48, %v1948_v2  ;;  %v1974_v3 = vrot.slane %v1973_v58, 4  ;;  %v1883_v48 = vld [vmem:[#allocation3] sm:$0xff] }
 0x39f   : > { %v1960_v44 = vperm.slane %v1956_v42, %v2653_v22 }
 0x3a0   : > { %v1975_v37 = vsel %vm390_vm0, %v1974_v3, %v1967_v52 }
 0x3a1   : > { %v1979_v38 = vperm.slane %v1975_v37, %v2653_v22  ;;  %v1961_v17 = vrot.slane %v1960_v44, 4  ;;  %v1985_v49 = vshrl.u32 %v1960_v44, 16 }
 0x3a3   : > { %v1984_v61 = vpack.i.b16 %v1979_v38, %v1960_v44  ;;  %v1986_v34 = vshrl.u32 %v1979_v38, 16  ;;  %v1962_v51 = vsel %vm390_vm0, 0, %v1961_v17  ;;  %v1980_v11 = vrot.slane %v1979_v38, 4 }
 0x3a4   : > { %v1991_v56 = vshrl.u32 %v1962_v51, 16 }
 0x3a5   : > { %v1999_v55 = vsel %vm1997_vm5, %v1984_v61, 0  ;;  %v1987_v13 = vpack.i.b16 %v1986_v34, %v1985_v49  ;;  %v1981_v16 = vsel %vm390_vm0, 0, %v1980_v11  ;;  %v1884_v61 = vld [vmem:[#allocation3 + $0x8] sm:$0xff] }
 0x3a6   : > { %2008 = vmatpush.bf16.msrb.mxu0 %v1999_v55  ;;  %v1990_v5 = vpack.i.b16 %v1981_v16, %v1962_v51  ;;  %v1992_v20 = vshrl.u32 %v1981_v16, 16 }
 0x3a7   : > { %v2018_v21 = vsel %vm1997_vm5, %v1987_v13, 0 }
 0x3a8   : > { %2027 = vmatpush.bf16.msrb.mxu1 %v2018_v21  ;;  %v2037_v14 = vsel %vm1997_vm5, %v1990_v5, 0  ;;  %v1993_v19 = vpack.i.b16 %v1992_v20, %v1991_v56  ;;  %v1914_v5 = vld [vmem:[#allocation4 + $0x10] sm:$0xff]  ;;  %v1913_v21 = vld [vmem:[#allocation4 + $0x8] sm:$0xff] }
 0x3a9   : > { %2046 = vmatpush.bf16.msrb.mxu2 %v2037_v14 }
 0x3aa   : > { %v2056_v54 = vsel %vm1997_vm5, %v1993_v19, 0 }
 0x3ab   : > { %2065 = vmatpush.bf16.msrb.mxu3 %v2056_v54 }
 0x3db   : > { %v1854_v9 = vpop.permute.xlu2 %1853 }
 0x3dc   : > { %v1871_v18 = vsub.f32 %v2987_v26, %v1854_v9 }
 0x3de   : > { %v1875_v8 = vmul.f32 1.442695, %v1871_v18 }
 0x3e0   : > { %2529 = vpow2.f32 %v1875_v8 }
 0x3e1   : > { %2531 = vpow2.f32 %v1847_v6  ;;  %v1912_v6 = vld [vmem:[#allocation4] sm:$0xff] }
 0x3e6   : > { %v2530_v24 = vpop.eup %2529 }
 0x3e7   : > { %v1891_v10 = vsel %vm1822_vm3, %v2530_v24, 0.0  ;;  %v1940_v4 = vpack.c.bf16 %v2530_v24, %v2530_v24  ;;  %v2532_v23 = vpop.eup %2531 }
 0x3e8   : > { %1892 = vadd.xlane.f32.xlu2 %v1891_v10  ;;  %v1889_v1 = vmul.f32 %v2532_v23, %v1885_v62 }
 0x3e9   : > { %2412 = vmatmul.msk.bf16.vlgmr.msrb.gmra.mxu0 %vm1822_vm3, %v1940_v4 }
 0x3f7   : > { %v1864_v15 = vpop.permute.xlu0 %1863 }
 0x3f8   : > { %v1873_v27 = vsub.f32 %v2993_v0, %v1864_v15 }
 0x3f9   : > { %v1869_v30 = vpop.permute.xlu1 %1868 }
 0x3fa   : > { %v1879_v32 = vmul.f32 1.442695, %v1873_v27  ;;  %v1874_v26 = vsub.f32 %v2999_v39, %v1869_v30 }
 0x3fc   : > { %2533 = vpow2.f32 %v1879_v32  ;;  %v1881_v43 = vmul.f32 1.442695, %v1874_v26 }
 0x3fe   : > { %2535 = vpow2.f32 %v1881_v43  ;;  %v1915_v43 = vld [vmem:[#allocation4 + $0x18] sm:$0xff] }
 0x3ff   : > { %2537 = vpow2.f32 %v1845_v40 }
 0x400   : > { %1928 = vperm.xlu2 %2527, %v2532_v23  }
 0x401   : > { %v1859_v60 = vpop.permute.xlu1 %1858 }
 0x402   : > { %v2534_v31 = vpop.eup %2533  ;;  %v1872_v33 = vsub.f32 %v2997_v36, %v1859_v60 }
 0x403   : > { %v1897_v0 = vsel %vm1822_vm3, %v2534_v31, 0.0  ;;  %v1942_v41 = vpack.c.bf16 %v2534_v31, %v2534_v31 }
 0x404   : > { %v2536_v45 = vpop.eup %2535  ;;  %v1877_v46 = vmul.f32 1.442695, %v1872_v33  ;;  %1898 = vadd.xlane.f32.xlu0 %v1897_v0 }
 0x405   : > { %2414 = vmatmul.msk.bf16.vlgmr.msrb.gmra.mxu2 %vm1822_vm3, %v1942_v41  ;;  %v1900_v39 = vsel %vm1822_vm3, %v2536_v45, 0.0  ;;  %v1943_v63 = vpack.c.bf16 %v2536_v45, %v2536_v45  ;;  %v2538_v12 = vpop.eup %2537 }
 0x406   : > { %2539 = vpow2.f32 %v1877_v46  ;;  %1901 = vadd.xlane.f32.xlu1 %v1900_v39  ;;  %v1888_v51 = vmul.f32 %v2538_v12, %v1884_v61 }
 0x407   : > { %2415 = vmatmul.msk.bf16.vlgmr.msrb.gmra.mxu3 %vm1822_vm3, %v1943_v63  ;;  %2541 = vpow2.f32 %v1843_v50 }
 0x408   : > { %1923 = vperm.xlu2 %2527, %v2538_v12   ;;  %2543 = vpow2.f32 %v1849_v53 }
 0x40c   : > { %v2540_v35 = vpop.eup %2539 }
 0x40d   : > { %v1894_v36 = vsel %vm1822_vm3, %v2540_v35, 0.0  ;;  %v1941_v47 = vpack.c.bf16 %v2540_v35, %v2540_v35  ;;  %v2542_v29 = vpop.eup %2541 }
 0x40e   : > { %1895 = vadd.xlane.f32.xlu0 %v1894_v36  ;;  %v2544_v2 = vpop.eup %2543  ;;  %v1887_v58 = vmul.f32 %v2542_v29, %v1883_v48 }
 0x40f   : > { %2413 = vmatmul.msk.bf16.vlgmr.msrb.gmra.mxu1 %vm1822_vm3, %v1941_v47  ;;  %v1890_v38 = vmul.f32 %v2544_v2, %v1886_v25 }
 0x41f   : > { %1918 = vperm.xlu1 %2528, %v2542_v29  }
 0x422   : > { %1933 = vperm.xlu0 %2526, %v2544_v2  }
 0x45b   : > { %v1893_v42 = vpop.xlane.xlu2 %1892 }
 0x45c   : > { %v1903_v52 = vadd.f32 %v1893_v42, %v1887_v58 }
 0x45e   : > { %1908 = vst.msk [vmem:[#allocation3] sm:$0xff] %vm345_vm4, %v1903_v52 }
 0x463   : > { %v1929_v34 = vpop.permute.xlu2 %1928 }
 0x464   : > { %v1938_v56 = vmul.f32 %v1929_v34, %v1914_v5 }
 0x465   : > { %v2086_v3 = vld [vmem:[#allocation3] sm:$0xff] }
 0x466   : > { %v2010_v44 = vpop.f32.mrf.mxu0  ;;  %2545 = vrcp.f32 %v2086_v3 }
 0x46b   : > { %v1924_v14 = vpop.permute.xlu2 %1923 }
 0x46c   : > { %v2546_v57 = vpop.eup %2545  ;;  %v1937_v8 = vmul.f32 %v1924_v14, %v1913_v21 }
 0x46d   : > { %2100 = vperm.xlu1 %2528, %v2546_v57  }
 0x46e   : > { %v2012_v59 = vpop.f32.mrf.mxu0 }
 0x477   : > { %v1899_v28 = vpop.xlane.xlu0 %1898 }
 0x478   : > { %v1905_v37 = vadd.f32 %v1899_v28, %v1889_v1 }
 0x479   : > { %v1902_v17 = vpop.xlane.xlu1 %1901 }
 0x47a   : > { %1910 = vst.msk [vmem:[#allocation3 + $0x10] sm:$0xff] %vm345_vm4, %v1905_v37  ;;  %v1906_v49 = vadd.f32 %v1902_v17, %v1890_v38 }
 0x47c   : > { %1911 = vst.msk [vmem:[#allocation3 + $0x18] sm:$0xff] %vm345_vm4, %v1906_v49 }
 0x481   : > { %v1896_v11 = vpop.xlane.xlu0 %1895  ;;  %v2088_v55 = vld [vmem:[#allocation3 + $0x10] sm:$0xff] }
 0x482   : > { %v1904_v13 = vadd.f32 %v1896_v11, %v1888_v51  ;;  %2547 = vrcp.f32 %v2088_v55 }
 0x483   : > { %v2089_v16 = vld [vmem:[#allocation3 + $0x18] sm:$0xff] }
 0x484   : > { %1909 = vst.msk [vmem:[#allocation3 + $0x8] sm:$0xff] %vm345_vm4, %v1904_v13  ;;  %2549 = vrcp.f32 %v2089_v16 }
 0x488   : > { %v2548_v20 = vpop.eup %2547  ;;  %v2048_v19 = vpop.f32.mrf.mxu2 }
 0x489   : > { %v2073_v54 = vadd.f32 %v2048_v19, %v1938_v56  ;;  %2110 = vperm.xlu0 %2526, %v2548_v20  }
 0x48a   : > { %v2550_v9 = vpop.eup %2549  ;;  %v2067_v18 = vpop.f32.mrf.mxu3 }
 0x48b   : > { %2077 = vst.msk [vmem:[#allocation4 + $0x10] sm:$0xff] %vm354_vm1, %v2073_v54  ;;  %2115 = vperm.xlu2 %2527, %v2550_v9   ;;  %v2087_v24 = vld [vmem:[#allocation3 + $0x8] sm:$0xff] }
 0x48c   : > { %v2029_v10 = vpop.f32.mrf.mxu1  ;;  %2551 = vrcp.f32 %v2087_v24 }
 0x48d   : > { %v2072_v4 = vadd.f32 %v2029_v10, %v1937_v8 }
 0x48f   : > { %2076 = vst.msk [vmem:[#allocation4 + $0x8] sm:$0xff] %vm354_vm1, %v2072_v4 }
 0x490   : > { %v2050_v15 = vpop.f32.mrf.mxu2 }
 0x491   : > { %v1919_v27 = vpop.permute.xlu1 %1918 }
 0x492   : > { %v2552_v30 = vpop.eup %2551  ;;  %v1936_v32 = vmul.f32 %v1919_v27, %v1912_v6  ;;  %v2069_v26 = vpop.f32.mrf.mxu3  ;;  %v2096_v41 = vld [vmem:[#allocation4 + $0x10] sm:$0xff] }
 0x493   : > { %2105 = vperm.xlu0 %2526, %v2552_v30  }
 0x494   : > { %v2071_v40 = vadd.f32 %v2010_v44, %v1936_v32  ;;  %v2031_v23 = vpop.f32.mrf.mxu1  ;;  %v1934_v60 = vpop.permute.xlu0 %1933 }
 0x495   : > { %v1939_v31 = vmul.f32 %v1934_v60, %v1915_v43 }
 0x496   : > { %2075 = vst.msk [vmem:[#allocation4] sm:$0xff] %vm354_vm1, %v2071_v40  ;;  %v2095_v48 = vld [vmem:[#allocation4 + $0x8] sm:$0xff] }
 0x497   : > { %v2074_v33 = vadd.f32 %v2067_v18, %v1939_v31 }
 0x499   : > { %2078 = vst.msk [vmem:[#allocation4 + $0x18] sm:$0xff] %vm354_vm1, %v2074_v33 }
 0x49d   : > { %v2094_v39 = vld [vmem:[#allocation4] sm:$0xff] }
 0x4a0   : > { %v2097_v36 = vld [vmem:[#allocation4 + $0x18] sm:$0xff] }
 0x4df   : > { %v2101_v0 = vpop.permute.xlu1 %2100 }
 0x4e0   : > { %v2118_v63 = vmul.f32 %v2101_v0, %v2094_v39 }
 0x4e2   : > { %v2125_v47 = vrot.slane %v2118_v63, 4 }
 0x4e5   : > { %v2116_v35 = vpop.permute.xlu2 %2115 }
 0x4e6   : > { %v2121_v50 = vmul.f32 %v2116_v35, %v2097_v36 }
 0x4e8   : > { %v2135_v42 = vrot.slane %v2121_v50, 4 }
 0x4fb   : > { %v2111_v45 = vpop.permute.xlu0 %2110 }
 0x4fc   : > { %v2120_v46 = vmul.f32 %v2111_v45, %v2096_v41 }
 0x4fe   : > { %v2122_v12 = vrot.slane %v2120_v46, 4  ;;  %v2126_v29 = vsel %vm390_vm0, %v2120_v46, %v2125_v47 }
 0x4ff   : > { %v2134_v3 = vperm.slane %v2126_v29, %v2648_v7 }
 0x500   : > { %v2124_v53 = vsel %vm390_vm0, %v2122_v12, %v2118_v63 }
 0x501   : > { %v2130_v2 = vperm.slane %v2124_v53, %v2648_v7  ;;  %v2161_v1 = vrot.slane %v2134_v3, 4 }
 0x503   : > { %v2149_v59 = vrot.slane %v2130_v2, 4 }
 0x505   : > { %v2106_v58 = vpop.permute.xlu0 %2105 }
 0x506   : > { %v2119_v52 = vmul.f32 %v2106_v58, %v2095_v48 }
 0x508   : > { %v2136_v44 = vsel %vm390_vm0, %v2135_v42, %v2119_v52  ;;  %v2137_v57 = vrot.slane %v2119_v52, 4 }
 0x509   : > { %v2142_v62 = vperm.slane %v2136_v44, %v2648_v7 }
 0x50a   : > { %v2138_v25 = vsel %vm390_vm0, %v2121_v50, %v2137_v57 }
 0x50b   : > { %v2146_v28 = vperm.slane %v2138_v25, %v2648_v7  ;;  %v2147_v37 = vrot.slane %v2142_v62, 4  ;;  %v2150_v38 = vsel %vm390_vm0, %v2142_v62, %v2149_v59 }
 0x50c   : > { %v2158_v17 = vperm.slane %v2150_v38, %v2653_v22 }
 0x50d   : > { %v2148_v49 = vsel %vm390_vm0, %v2147_v37, %v2130_v2  ;;  %v2159_v61 = vrot.slane %v2146_v28, 4  ;;  %v2162_v34 = vsel %vm390_vm0, %v2146_v28, %v2161_v1 }
 0x50e   : > { %v2154_v51 = vperm.slane %v2148_v49, %v2653_v22  ;;  %v2170_v11 = vperm.slane %v2162_v34, %v2653_v22  ;;  %v2173_v55 = vrot.slane %v2158_v17, 4 }
 0x50f   : > { %v2160_v13 = vsel %vm390_vm0, %v2159_v61, %v2134_v3 }
 0x510   : > { %v2166_v16 = vperm.slane %v2160_v13, %v2653_v22  ;;  %v2171_v5 = vrot.slane %v2154_v51, 4  ;;  %v2174_v56 = vsel %vm390_vm0, 0.0, %v2173_v55  ;;  %v2177_v20 = vrot.slane %v2170_v11, 4 }
 0x511   : > { %v2179_v21 = vsel %vm390_vm0, %v2173_v55, %v2154_v51  ;;  %v2184_v14 = vrot.slane %v2174_v56, 4 }
 0x512   : > { %v2178_v19 = vsel %vm390_vm0, 0.0, %v2177_v20  ;;  %v2172_v54 = vsel %vm390_vm0, 0.0, %v2171_v5  ;;  %v2175_v9 = vrot.slane %v2166_v16, 4  ;;  %v2183_v18 = vperm.slane %v2179_v21, %v2648_v7 }
 0x513   : > { %v2195_v8 = vrot.slane %v2178_v19, 4  ;;  %v2185_v24 = vsel %vm390_vm0, %v2184_v14, %v2172_v54  ;;  %v2190_v10 = vsel %vm390_vm0, %v2177_v20, %v2166_v16 }
 0x514   : > { %v2176_v4 = vsel %vm390_vm0, 0.0, %v2175_v9  ;;  %v2189_v6 = vperm.slane %v2185_v24, %v2648_v7  ;;  %v2194_v15 = vperm.slane %v2190_v10, %v2648_v7  ;;  %v2203_v27 = vrot.slane %v2183_v18, 4 }
 0x515   : > { %v2196_v30 = vsel %vm390_vm0, %v2195_v8, %v2176_v4 }
 0x516   : > { %v2200_v32 = vperm.slane %v2196_v30, %v2648_v7  ;;  %v2204_v26 = vsel %vm390_vm0, %v2189_v6, %v2203_v27  ;;  %v2215_v43 = vrot.slane %v2194_v15, 4  ;;  %v2201_v40 = vrot.slane %v2189_v6, 4 }
 0x517   : > { %v2212_v23 = vperm.slane %v2204_v26, %v2653_v22 }
 0x518   : > { %v2216_v60 = vsel %vm390_vm0, %v2200_v32, %v2215_v43  ;;  %v2202_v31 = vsel %vm390_vm0, %v2201_v40, %v2183_v18  ;;  %v2213_v33 = vrot.slane %v2200_v32, 4 }
 0x519   : > { %v2224_v0 = vperm.slane %v2216_v60, %v2653_v22  ;;  %v2231_v41 = vrot.slane %v2212_v23, 4  ;;  %v2208_v45 = vperm.slane %v2202_v31, %v2653_v22 }
 0x51a   : > { %v2214_v46 = vsel %vm390_vm0, %v2213_v33, %v2194_v15 }
 0x51b   : > { %v2232_v7 = vsel %vm390_vm0, %v2224_v0, %v2231_v41  ;;  %v2229_v39 = vrot.slane %v2224_v0, 4  ;;  %v2220_v63 = vperm.slane %v2214_v46, %v2653_v22  ;;  %v2227_v12 = vrot.slane %v2208_v45, 4 }
 0x51c   : > { %2242 = vrot.lane.b32.xlu0 %v2232_v7, %s2577_s24 }
 0x51d   : > { %v2230_v35 = vsel %vm390_vm0, %v2229_v39, %v2212_v23  ;;  %v2225_v36 = vrot.slane %v2220_v63, 4  ;;  %v2228_v47 = vsel %vm390_vm0, %v2220_v63, %v2227_v12 }
 0x51e   : > { %2238 = vrot.lane.b32.xlu2 %v2230_v35, %s2579_s26  ;;  %2234 = vrot.lane.b32.xlu1 %v2228_v47, %s2578_s25 }
 0x51f   : > { %v2226_v50 = vsel %vm390_vm0, %v2225_v36, %v2208_v45 }
 0x578   : > { %v2239_v29 = vpop.permute.xlu2 %2238 }
 0x58e   : > { %v2243_v2 = vpop.permute.xlu0 %2242 }
 0x590   : > { %v2235_v53 = vpop.permute.xlu1 %2234 }
 0x591   : > { %v2245_v22 = vsel %vm354_vm1, %v2226_v50, %v2235_v53 }
 0x592   : > { %v2247_v48 = vsel %vm2246_vm6, %v2245_v22, %v2239_v29 }
 0x593   : > { %v2249_v58 = vsel %vm2248_vm7, %v2247_v48, %v2243_v2 }
 0x594   : > { %v2250_v42 = vpack.c.bf16 %v2249_v58, %v2249_v58 }
 0x596   : > { %2251 = vst [vmem:[%s339_s7] sm:$0xf] %v2250_v42 }
 0x597 PF: > { %s13_s14 = sadd.s32 1, %s2575_s14   ;;  %s3186_s12 = smov %s2571_s13 }
 0x598   : > { %p10_p5 = scmp.ge.s32.totalorder %s13_s14, 4   ;;  %s3187_s13 = smov %s3189_s15 }
 0x59a   :  { %12 = sbr.rel (!%p10_p5) target bundleno = 2 (0x2), region = 76 }

// kernel: audio_encoder_forward.16
= control target key start
LH: loop header
LB: loop body
LE: loop exit
PB: predicated region body
PF: predicated region fallthrough
CT: control target
= control target key end

     0   :  { %12 = vsyncpa [#allocation5], 0  ;;  %s2047_s0 = inlined_call_operand.vmem [shape: bf16[2,8,128], index: 0, kind: input, shape index: {}, may-alias: {0,7}]   ;;  %s2048_s1 = inlined_call_operand.vmem [shape: f32[1,128], index: 1, kind: input, shape index: {}]   ;;  %s2049_s2 = inlined_call_operand.vmem [shape: f32[1,128], index: 2, kind: input, shape index: {}]   ;;  %s2050_s3 = inlined_call_operand.hbm [shape: bf16[128,512], index: 3, kind: input, shape index: {}]   ;;  %s2051_s4 = inlined_call_operand.vmem [shape: f32[1,512], index: 4, kind: input, shape index: {}]   ;;  %s2052_s5 = inlined_call_operand.hbm [shape: bf16[512,128], index: 5, kind: input, shape index: {}]   ;;  %s2053_s6 = inlined_call_operand.vmem [shape: f32[1,128], index: 6, kind: input, shape index: {}]   ;;  %s2054_s7 = inlined_call_operand.vmem [shape: bf16[2,8,128], index: 7, kind: output, shape index: {}, may-alias: {0,7}]  }
   0x1   :  { %13 = vsyncpa [#allocation7], 0  ;;  %s1837_s24 = smov 0   ;;  %s1839_s25 = smov 0  }
   0x2   :  { %s1841_s26 = smov 0  }
   0x3 LB: > { %s1289_s27 = sadd.s32 4294967295, %s1787_s26   ;;  %s38_s28 = sadd.s32 1, %s1783_s25  ;;  %s1787_s26 = sphi %s1841_s26, %s19_s26   ;;  %s1783_s25 = sphi %s1839_s25, %s2060_s25   ;;  %s1779_s24 = sphi %s1837_s24, %s2059_s24  }
   0x4   : > { %p40_p0 = scmp.ge.s32.totalorder %s38_s28, 2  ;;  %p1291_p1 = scmp.ge.s32.totalorder %s1787_s26, 1 }
   0x5   : > { %p240_p2 = scmp.lt.s32.totalorder %s1787_s26, 3  ;;  %p1862_p4 = scmp.eq.s32.totalorder %s1289_s27, 0 }
   0x6   : > { %s2062_s28 = smov (%p40_p0, %s38_s28), 0  ;;  %s260_s10 = sshll.u32 %s2050_s3, 4  ;;  %s261_s10 = int_to_ptr.hbm [resolvable:$true] %s260_s10 }
   0x7   : > { %p1858_p3 = pnand %p1291_p1, %p240_p2  ;;  %s1789_s11 = smov [#allocation4]  }
   0x8   : > { %s262_s12 = sshll.u32 %s1789_s11, 4  ;;  %s285_s15 = sshll.u32 %s2052_s5, 4  ;;  %s263_s12 = int_to_ptr.vmem [resolvable:$true] %s262_s12  ;;  %s286_s15 = int_to_ptr.hbm [resolvable:$true] %s285_s15 }
   0x9   : > { %p1631_p5 = pneg %p1858_p3  ;;  %s1790_s16 = smov 256  }
   0xa   : > { %s1791_s17 = smov 16   ;;  %s1792_s18 = smov [#allocation6]  }
   0xb   : > { %p1632_p6 = pnand %p1862_p4, %p1631_p5  ;;  %s287_s19 = sshll.u32 %s1792_s18, 4  ;;  %s288_s19 = int_to_ptr.vmem [resolvable:$true] %s287_s19 }
   0xc   : > { %s1793_s20 = smov 64   ;;  %s1794_s21 = smov 4  }
   0xd   : > { %1634 = dma.hbm_to_vmem [thread:$0]  (!%p1632_p6), %s261_s10, 4096, %s263_s12, [#allocation5], %s1790_s16, %s1790_s16, %s1791_s17  }
   0xe   : > { %1637 = dma.hbm_to_vmem [thread:$0]  (!%p1632_p6), %s286_s15, 4096, %s288_s19, [#allocation7], %s1793_s20, %s1793_s20, %s1794_s21  }
   0xf   : > { %316 = sbr.rel (%p1858_p3) target bundleno = 640 (0x280), region = 48 }
  0x14   : > { %1770 = dma.done.wait (%p1862_p4), [#allocation5], 4096  }
  0x15   : > { %1772 = vsyncadd (%p1862_p4), [#allocation5], 4294963200 }
  0x16   : > { %1774 = dma.done.wait (%p1862_p4), [#allocation7], 4096  }
  0x17   : > { %1776 = vsyncadd (%p1862_p4), [#allocation7], 4294963200  ;;  %p362_p7 = scmp.lt.s32.totalorder %s1779_s24, 1  ;;  %v1795_v2 = vmov 128.0   ;;  %v1415_v13 = vld [vmem:[#allocation4 + $0xe0] sm:$0xf] }
  0x18   : > { %1677 = vrcp.f32 %v1795_v2  ;;  %v1589_v14 = vld [vmem:[#allocation4 + $0xec] sm:$0xf0]  ;;  %v1587_v15 = vld [vmem:[#allocation4 + $0xe4] sm:$0xf]  ;;  %v1417_v17 = vld [vmem:[#allocation4 + $0xf0] sm:$0xf0] }
  0x19   : > { %s2064_s24 = smov (!%p362_p7, %s1779_s24), 1  ;;  %v1416_v16 = vor.u32 %v1589_v14, %v1415_v13  ;;  %v1423_v18 = vld [vmem:[#allocation4 + $0xe8] sm:$0xf]  ;;  %v1590_v19 = vld [vmem:[#allocation4 + $0xf4] sm:$0xf0]  ;;  %v1420_v20 = vor.u32 %v1587_v15, %v1417_v17 }
  0x1a   : > { %s1299_s22 = sshll.u32 %s2064_s24, 2  ;;  %v1424_v21 = vor.u32 %v1590_v19, %v1423_v18  ;;  %v1588_v22 = vld [vmem:[#allocation4 + $0xec] sm:$0xf]  ;;  %v1425_v23 = vld [vmem:[#allocation4 + $0xf8] sm:$0xf0] }
  0x1b   : > { %s1896_s29 = scalar_lea.vmem %s2047_s0, %s1299_s22  ;;  %632 = vmatpush.bf16.msra.mxu0 %v1416_v16  ;;  %v1428_v24 = vor.u32 %v1588_v22, %v1425_v23  ;;  %645 = vmatpush.bf16.msra.mxu1 %v1420_v20  ;;  %v1399_v25 = vld [vmem:[#allocation4 + $0xc0] sm:$0xf]  ;;  %v1585_v26 = vld [vmem:[#allocation4 + $0xcc] sm:$0xf0]  ;;  %v1583_v27 = vld [vmem:[#allocation4 + $0xc4] sm:$0xf]  ;;  %s382_s17 = scalar_lea.vmem %s2054_s7, %s1299_s22 }
  0x1c   : > { %v387_v0 = vld [vmem:[%s1896_s29] sm:$0xf]  ;;  %658 = vmatpush.bf16.msra.mxu2 %v1424_v21  ;;  %v1400_v28 = vor.u32 %v1585_v26, %v1399_v25  ;;  %v1401_v29 = vld [vmem:[#allocation4 + $0xd0] sm:$0xf0]  ;;  %v1407_v30 = vld [vmem:[#allocation4 + $0xc8] sm:$0xf] }
  0x1d   : > { %v388_v1 = vunpack.c.l.bf16 %v387_v0  ;;  %671 = vmatpush.bf16.msra.mxu3 %v1428_v24  ;;  %v1586_v31 = vld [vmem:[#allocation4 + $0xd4] sm:$0xf0]  ;;  %v1404_v32 = vor.u32 %v1583_v27, %v1401_v29  ;;  %v1584_v34 = vld [vmem:[#allocation4 + $0xcc] sm:$0xf]  ;;  %v1409_v35 = vld [vmem:[#allocation4 + $0xd8] sm:$0xf0] }
  0x1e   : > { %v1678_v3 = vpop.eup %1677  ;;  %v1408_v33 = vor.u32 %v1586_v31, %v1407_v30  ;;  %v1412_v36 = vor.u32 %v1584_v34, %v1409_v35  ;;  %v1383_v37 = vld [vmem:[#allocation4 + $0xa0] sm:$0xf]  ;;  %v1581_v38 = vld [vmem:[#allocation4 + $0xac] sm:$0xf0]  ;;  %v1579_v39 = vld [vmem:[#allocation4 + $0xa4] sm:$0xf] }
  0x1f   : > { %391 = vadd.xlane.f32.xlu0 %v388_v1  ;;  %v394_v4 = vmul.f32 128.0, %v1678_v3  ;;  %vm398_vm0 = vweird.f32 %v1678_v3  ;;  %633 = vmatpush.bf16.msra.mxu0 %v1400_v28  ;;  %v1384_v40 = vor.u32 %v1581_v38, %v1383_v37  ;;  %v1385_v41 = vld [vmem:[#allocation4 + $0xb0] sm:$0xf0]  ;;  %v1391_v42 = vld [vmem:[#allocation4 + $0xa8] sm:$0xf] }
  0x20   : > { %646 = vmatpush.bf16.msra.mxu1 %v1404_v32  ;;  %659 = vmatpush.bf16.msra.mxu2 %v1408_v33  ;;  %v1582_v43 = vld [vmem:[#allocation4 + $0xb4] sm:$0xf0]  ;;  %v1388_v44 = vor.u32 %v1579_v39, %v1385_v41  ;;  %v1580_v46 = vld [vmem:[#allocation4 + $0xac] sm:$0xf]  ;;  %v1393_v47 = vld [vmem:[#allocation4 + $0xb8] sm:$0xf0] }
  0x21   : > { %v395_v5 = vsub.f32 1.0, %v394_v4  ;;  %672 = vmatpush.bf16.msra.mxu3 %v1412_v36  ;;  %v1392_v45 = vor.u32 %v1582_v43, %v1391_v42  ;;  %v1396_v48 = vor.u32 %v1580_v46, %v1393_v47  ;;  %v1367_v49 = vld [vmem:[#allocation4 + $0x80] sm:$0xf]  ;;  %v1577_v50 = vld [vmem:[#allocation4 + $0x8c] sm:$0xf0] }
  0x22   : > { %v1575_v51 = vld [vmem:[#allocation4 + $0x84] sm:$0xf]  ;;  %v1368_v52 = vor.u32 %v1577_v50, %v1367_v49  ;;  %v1369_v53 = vld [vmem:[#allocation4 + $0x90] sm:$0xf0]  ;;  %v1375_v54 = vld [vmem:[#allocation4 + $0x88] sm:$0xf] }
  0x23   : > { %v396_v6 = vmul.f32 %v1678_v3, %v395_v5  ;;  %634 = vmatpush.bf16.msra.mxu0 %v1384_v40  ;;  %v1578_v55 = vld [vmem:[#allocation4 + $0x94] sm:$0xf0]  ;;  %v1372_v56 = vor.u32 %v1575_v51, %v1369_v53  ;;  %v1576_v58 = vld [vmem:[#allocation4 + $0x8c] sm:$0xf]  ;;  %v1377_v59 = vld [vmem:[#allocation4 + $0x98] sm:$0xf0] }
  0x24   : > { %647 = vmatpush.bf16.msra.mxu1 %v1388_v44  ;;  %660 = vmatpush.bf16.msra.mxu2 %v1392_v45  ;;  %v1376_v57 = vor.u32 %v1578_v55, %v1375_v54  ;;  %v1380_v60 = vor.u32 %v1576_v58, %v1377_v59  ;;  %v1351_v61 = vld [vmem:[#allocation4 + $0x60] sm:$0xf]  ;;  %v1573_v62 = vld [vmem:[#allocation4 + $0x6c] sm:$0xf0]  ;;  %v1571_v63 = vld [vmem:[#allocation4 + $0x64] sm:$0xf] }
  0x25   : > { %v397_v7 = vadd.f32 %v1678_v3, %v396_v6  ;;  %673 = vmatpush.bf16.msra.mxu3 %v1396_v48  ;;  %v1352_v0 = vor.u32 %v1573_v62, %v1351_v61  ;;  %v1359_v2 = vld [vmem:[#allocation4 + $0x68] sm:$0xf]  ;;  %v1572_v6 = vld [vmem:[#allocation4 + $0x6c] sm:$0xf]  ;;  %v1567_v13 = vld [vmem:[#allocation4 + $0x44] sm:$0xf] }
  0x26   : > { %v1337_v15 = vld [vmem:[#allocation4 + $0x50] sm:$0xf0]  ;;  %v1343_v16 = vld [vmem:[#allocation4 + $0x48] sm:$0xf]  ;;  %v1570_v17 = vld [vmem:[#allocation4 + $0x54] sm:$0xf0] }
  0x27   : > { %v1899_v8 = vsel %vm398_vm0, %v1678_v3, %v397_v7  ;;  %635 = vmatpush.bf16.msra.mxu0 %v1368_v52  ;;  %v1574_v3 = vld [vmem:[#allocation4 + $0x74] sm:$0xf0]  ;;  %v1361_v7 = vld [vmem:[#allocation4 + $0x78] sm:$0xf0]  ;;  %v1340_v18 = vor.u32 %v1567_v13, %v1337_v15  ;;  %v1344_v19 = vor.u32 %v1570_v17, %v1343_v16  ;;  %v1568_v20 = vld [vmem:[#allocation4 + $0x4c] sm:$0xf] }
  0x28   : > { %648 = vmatpush.bf16.msra.mxu1 %v1372_v56  ;;  %661 = vmatpush.bf16.msra.mxu2 %v1376_v57  ;;  %v1360_v5 = vor.u32 %v1574_v3, %v1359_v2  ;;  %v1345_v21 = vld [vmem:[#allocation4 + $0x58] sm:$0xf0]  ;;  %v1319_v23 = vld [vmem:[#allocation4 + $0x20] sm:$0xf]  ;;  %v1565_v24 = vld [vmem:[#allocation4 + $0x2c] sm:$0xf0] }
  0x29   : > { %674 = vmatpush.bf16.msra.mxu3 %v1380_v60  ;;  %v1348_v22 = vor.u32 %v1568_v20, %v1345_v21  ;;  %v1563_v25 = vld [vmem:[#allocation4 + $0x24] sm:$0xf]  ;;  %v1320_v26 = vor.u32 %v1565_v24, %v1319_v23  ;;  %v1321_v27 = vld [vmem:[#allocation4 + $0x30] sm:$0xf0]  ;;  %v1327_v28 = vld [vmem:[#allocation4 + $0x28] sm:$0xf] }
  0x2a   : > { %v1566_v29 = vld [vmem:[#allocation4 + $0x34] sm:$0xf0]  ;;  %v1324_v30 = vor.u32 %v1563_v25, %v1321_v27  ;;  %v1564_v32 = vld [vmem:[#allocation4 + $0x2c] sm:$0xf]  ;;  %v1329_v33 = vld [vmem:[#allocation4 + $0x38] sm:$0xf0] }
  0x2b   : > { %636 = vmatpush.bf16.msra.mxu0 %v1352_v0  ;;  %v1328_v31 = vor.u32 %v1566_v29, %v1327_v28  ;;  %v1303_v34 = vld [vmem:[#allocation4] sm:$0xf]  ;;  %v1332_v36 = vor.u32 %v1564_v32, %v1329_v33  ;;  %v1561_v37 = vld [vmem:[#allocation4 + $0xc] sm:$0xf0]  ;;  %v1559_v38 = vld [vmem:[#allocation4 + $0x4] sm:$0xf] }
  0x2c   : > { %662 = vmatpush.bf16.msra.mxu2 %v1360_v5  ;;  %v1305_v39 = vld [vmem:[#allocation4 + $0x10] sm:$0xf0]  ;;  %v1304_v41 = vor.u32 %v1561_v37, %v1303_v34  ;;  %v1311_v43 = vld [vmem:[#allocation4 + $0x8] sm:$0xf]  ;;  %v1562_v44 = vld [vmem:[#allocation4 + $0x14] sm:$0xf0] }
  0x2d   : > { %v1308_v42 = vor.u32 %v1559_v38, %v1305_v39  ;;  %v1560_v45 = vld [vmem:[#allocation4 + $0xc] sm:$0xf]  ;;  %v1312_v46 = vor.u32 %v1562_v44, %v1311_v43  ;;  %v1313_v47 = vld [vmem:[#allocation4 + $0x18] sm:$0xf0]  ;;  %v1597_v15 = vld [vmem:[#allocation6 + $0x30] sm:$0xff] }
  0x2e   : > { %v1316_v49 = vor.u32 %v1560_v45, %v1313_v47  ;;  %v1674_v55 = vld [vmem:[%s2048_s1] ss:$0 sm:$0xff]  ;;  %v1605_v16 = vld [vmem:[#allocation6 + $0x70] sm:$0xff]  ;;  %v1603_v37 = vld [vmem:[#allocation6 + $0x60] sm:$0xff] }
  0x2f   : > { %v1675_v57 = vld [vmem:[%s2049_s2] ss:$0 sm:$0xff]  ;;  %v1613_v33 = vld [vmem:[#allocation6 + $0xb0] sm:$0xff]  ;;  %v1612_v43 = vld [vmem:[#allocation6 + $0xa8] sm:$0xff] }
  0x30   : > { %663 = vmatpush.bf16.msra.mxu2 %v1344_v19  ;;  %v1598_v5 = vld [vmem:[#allocation6 + $0x38] sm:$0xff]  ;;  %v1621_v34 = vld [vmem:[#allocation6 + $0xf0] sm:$0xff]  ;;  %v1620_v44 = vld [vmem:[#allocation6 + $0xe8] sm:$0xff] }
  0x31   : > { %v1614_v25 = vld [vmem:[#allocation6 + $0xb8] sm:$0xff] }
  0x34   : > { %664 = vmatpush.bf16.msra.mxu2 %v1328_v31  ;;  %v1604_v31 = vld [vmem:[#allocation6 + $0x68] sm:$0xff] }
  0x38   : > { %665 = vmatpush.bf16.msra.mxu2 %v1312_v46 }
  0x3c   : > { %1131 = vmatpush.bf16.msrb.mxu2 %v1614_v25 }
  0x40   : > { %1132 = vmatpush.bf16.msrb.mxu2 %v1613_v33 }
  0x44   : > { %1133 = vmatpush.bf16.msrb.mxu2 %v1612_v43  ;;  %v1608_v43 = vld [vmem:[#allocation6 + $0x88] sm:$0xff] }
  0x92   : > { %v392_v9 = vpop.xlane.xlu0 %391 }
  0x93   : > { %v400_v10 = vmul.f32 %v1899_v8, %v392_v9  ;;  %v1364_v9 = vor.u32 %v1572_v6, %v1361_v7  ;;  %v1606_v6 = vld [vmem:[#allocation6 + $0x78] sm:$0xff] }
  0x95   : > { %v1902_v11 = vsub.f32 %v388_v1, %v400_v10  ;;  %v1353_v1 = vld [vmem:[#allocation4 + $0x70] sm:$0xf0]  ;;  %v1335_v10 = vld [vmem:[#allocation4 + $0x40] sm:$0xf]  ;;  %675 = vmatpush.bf16.msra.mxu3 %v1364_v9 }
  0x96   : > { %v1356_v4 = vor.u32 %v1571_v63, %v1353_v1  ;;  %v462_v63 = vld [vmem:[%s2051_s4] sm:$0xf] }
  0x97   : > { %v402_v12 = vmul.f32 %v1902_v11, %v1902_v11  ;;  %v464_v0 = vperm.slane %v462_v63, 0  ;;  %v465_v1 = vperm.slane %v462_v63, 1 }
  0x98   : > { %649 = vmatpush.bf16.msra.mxu1 %v1356_v4 }
  0x99   : > { %403 = vadd.xlane.f32.xlu0 %v402_v12  ;;  %v1569_v12 = vld [vmem:[#allocation4 + $0x4c] sm:$0xf0]  ;;  %676 = vmatpush.bf16.msra.mxu3 %v1348_v22 }
  0x9a   : > { %v1336_v14 = vor.u32 %v1569_v12, %v1335_v10  ;;  %v466_v10 = vperm.slane %v462_v63, 2  ;;  %v467_v12 = vperm.slane %v462_v63, 3 }
  0x9c   : > { %637 = vmatpush.bf16.msra.mxu0 %v1336_v14  ;;  %650 = vmatpush.bf16.msra.mxu1 %v1340_v18 }
  0x9d   : > { %677 = vmatpush.bf16.msra.mxu3 %v1332_v36  ;;  %v1595_v36 = vld [vmem:[#allocation6 + $0x20] sm:$0xff] }
  0xa0   : > { %638 = vmatpush.bf16.msra.mxu0 %v1320_v26  ;;  %651 = vmatpush.bf16.msra.mxu1 %v1324_v30  ;;  %v1622_v26 = vld [vmem:[#allocation6 + $0xf8] sm:$0xff]  ;;  %v1596_v30 = vld [vmem:[#allocation6 + $0x28] sm:$0xff] }
  0xa1   : > { %678 = vmatpush.bf16.msra.mxu3 %v1316_v49  ;;  %v1602_v49 = vld [vmem:[#allocation6 + $0x58] sm:$0xff] }
  0xa4   : > { %639 = vmatpush.bf16.msra.mxu0 %v1304_v41  ;;  %652 = vmatpush.bf16.msra.mxu1 %v1308_v42 }
  0xa5   : > { %1144 = vmatpush.bf16.msrb.mxu3 %v1622_v26 }
  0xa8   : > { %1105 = vmatpush.bf16.msrb.mxu0 %v1598_v5  ;;  %1118 = vmatpush.bf16.msrb.mxu1 %v1606_v6  ;;  %v1618_v5 = vld [vmem:[#allocation6 + $0xd8] sm:$0xff] }
  0xa9   : > { %1145 = vmatpush.bf16.msrb.mxu3 %v1621_v34 }
  0xac   : > { %1106 = vmatpush.bf16.msrb.mxu0 %v1597_v15  ;;  %1119 = vmatpush.bf16.msrb.mxu1 %v1605_v16 }
  0xad   : > { %1146 = vmatpush.bf16.msrb.mxu3 %v1620_v44  ;;  %v1616_v44 = vld [vmem:[#allocation6 + $0xc8] sm:$0xff] }
  0xb0   : > { %1107 = vmatpush.bf16.msrb.mxu0 %v1596_v30  ;;  %1120 = vmatpush.bf16.msrb.mxu1 %v1604_v31  ;;  %v1617_v30 = vld [vmem:[#allocation6 + $0xd0] sm:$0xff] }
  0xb4   : > { %1108 = vmatpush.bf16.msrb.mxu0 %v1595_v36  ;;  %1121 = vmatpush.bf16.msrb.mxu1 %v1603_v37 }
  0xb8   : > { %1122 = vmatpush.bf16.msrb.mxu1 %v1602_v49 }
 0x10c   : > { %v404_v35 = vpop.xlane.xlu0 %403 }
 0x10d   : > { %v405_v40 = vmul.f32 %v404_v35, %v1899_v8 }
 0x10f   : > { %v406_v48 = vadd.f32 1e-05, %v405_v40 }
 0x111   : > { %1679 = vrsqrt.f32 %v406_v48  ;;  %vm413_vm2 = vweird.f32 %v406_v48 }
 0x117   : > { %v1680_v50 = vpop.eup %1679 }
 0x118   : > { %v408_v51 = vmul.f32 %v1680_v50, %v406_v48  ;;  %vm414_vm1 = vweird.f32 %v1680_v50  ;;  %v1594_v48 = vld [vmem:[#allocation6 + $0x18] sm:$0xff] }
 0x119   : > { %vm415_vm3 = vmor %vm413_vm2, %vm414_vm1  ;;  %1109 = vmatpush.bf16.msrb.mxu0 %v1594_v48 }
 0x11a   : > { %v409_v8 = vmul.f32 %v1680_v50, %v408_v51 }
 0x11c   : > { %v410_v52 = vmul.f32 0.5, %v409_v8 }
 0x11e   : > { %v411_v53 = vsub.f32 1.5, %v410_v52  ;;  %v1611_v52 = vld [vmem:[#allocation6 + $0xa0] sm:$0xff] }
 0x11f   : > { %1134 = vmatpush.bf16.msrb.mxu2 %v1611_v52 }
 0x120   : > { %v412_v54 = vmul.f32 %v1680_v50, %v411_v53  ;;  %v1619_v53 = vld [vmem:[#allocation6 + $0xe0] sm:$0xff] }
 0x121   : > { %1147 = vmatpush.bf16.msrb.mxu3 %v1619_v53 }
 0x122   : > { %v416_v56 = vsel %vm415_vm3, %v1680_v50, %v412_v54 }
 0x123   : > { %v417_v58 = vmul.f32 %v416_v56, %v1902_v11 }
 0x125   : > { %v421_v59 = vmul.f32 %v1674_v55, %v417_v58  ;;  %1148 = vmatpush.bf16.msrb.mxu3 %v1618_v5 }
 0x127   : > { %v425_v60 = vadd.f32 %v1675_v57, %v421_v59 }
 0x129   : > { %v426_v61 = vpack.c.bf16 %v425_v60, %v425_v60  ;;  %v1593_v60 = vld [vmem:[#allocation6 + $0x10] sm:$0xff]  ;;  %1149 = vmatpush.bf16.msrb.mxu3 %v1617_v30 }
 0x12a   : > { %1110 = vmatpush.bf16.msrb.mxu0 %v1593_v60  ;;  %v1615_v60 = vld [vmem:[#allocation6 + $0xc0] sm:$0xff] }
 0x12b   : > { %427 = vst [vmem:[#allocation2] sm:$0xf] %v426_v61  ;;  %v1601_v61 = vld [vmem:[#allocation6 + $0x50] sm:$0xff] }
 0x12c   : > { %1123 = vmatpush.bf16.msrb.mxu1 %v1601_v61 }
 0x12d   : > { %1150 = vmatpush.bf16.msrb.mxu3 %v1616_v44  ;;  %v1796_v44 = vmov -1.0  }
 0x131   : > { %1151 = vmatpush.bf16.msrb.mxu3 %v1615_v60 }
 0x132   : > { %v429_v62 = vld [vmem:[#allocation2] sm:$0xf] }
 0x133   : > { %640 = vmatmul.bf16.vlgmr.msra.gmra.mxu0 %v429_v62  ;;  %653 = vmatmul.bf16.vlgmr.msra.gmra.mxu1 %v429_v62 }
 0x134   : > { %666 = vmatmul.bf16.vlgmr.msra.gmra.mxu2 %v429_v62  ;;  %679 = vmatmul.bf16.vlgmr.msra.gmra.mxu3 %v429_v62 }
 0x1b0   : > { %v641_v2 = vpop.f32.mrf.mxu0  ;;  %v654_v3 = vpop.f32.mrf.mxu1 }
 0x1b1   : > { %v1917_v4 = vadd.f32 %v641_v2, %v464_v0  ;;  %v1919_v11 = vadd.f32 %v654_v3, %v465_v1  ;;  %v1610_v3 = vld [vmem:[#allocation6 + $0x98] sm:$0xff] }
 0x1b2   : > { %1135 = vmatpush.bf16.msrb.mxu2 %v1610_v3 }
 0x1b3   : > { %v1922_v7 = vmul.f32 0.70710677, %v1917_v4  ;;  %v1925_v9 = vmul.f32 0.70710677, %v1919_v11 }
 0x1b5   : > { %v1928_v13 = vand.u32 2147483647, %v1922_v7  ;;  %v1931_v14 = vand.u32 2147483647, %v1925_v9 }
 0x1b7   : > { %v704_v17 = vmul.f32 0.3275911, %v1928_v13  ;;  %v705_v18 = vmul.f32 0.3275911, %v1931_v14  ;;  %v667_v19 = vpop.f32.mrf.mxu2  ;;  %v680_v20 = vpop.f32.mrf.mxu3  ;;  %v808_v62 = vsub.f32 0.0, %v1928_v13  ;;  %v809_v2 = vsub.f32 0.0, %v1931_v14 }
 0x1b8   : > { %v1935_v21 = vadd.f32 %v667_v19, %v466_v10  ;;  %v1937_v22 = vadd.f32 %v680_v20, %v467_v12  ;;  %v643_v23 = vpop.f32.mrf.mxu0  ;;  %v656_v24 = vpop.f32.mrf.mxu1 }
 0x1b9   : > { %v1939_v27 = vadd.f32 1.0, %v704_v17  ;;  %v1941_v28 = vadd.f32 1.0, %v705_v18  ;;  %v1592_v17 = vld [vmem:[#allocation6 + $0x8] sm:$0xff]  ;;  %v812_v25 = vmul.f32 %v808_v62, %v1928_v13 }
 0x1ba   : > { %v1944_v29 = vmul.f32 0.70710677, %v1935_v21  ;;  %v1949_v32 = vmul.f32 0.70710677, %v1937_v22  ;;  %v1600_v18 = vld [vmem:[#allocation6 + $0x48] sm:$0xff]  ;;  %1111 = vmatpush.bf16.msrb.mxu0 %v1592_v17 }
 0x1bb   : > { %1681 = vrcp.f32 %v1939_v27  ;;  %v723_v54 = vand.u32 2147483648, %v1939_v27  ;;  %v721_v58 = vand.u32 2147483647, %v1939_v27  ;;  %v738_v59 = vand.u32 2147483648, %v1941_v28  ;;  %1124 = vmatpush.bf16.msrb.mxu1 %v1600_v18 }
 0x1bc   : > { %1683 = vrcp.f32 %v1941_v28  ;;  %v1952_v35 = vand.u32 2147483647, %v1944_v29  ;;  %v1956_v41 = vand.u32 2147483647, %v1949_v32  ;;  %v736_v0 = vand.u32 2147483647, %v1941_v28 }
 0x1bd   : > { %vm717_vm6 = vweird.f32 %v1939_v27  ;;  %v724_v6 = vor.u32 1.1754944e-38, %v723_v54  ;;  %vm732_vm8 = vweird.f32 %v1941_v28  ;;  %vm722_vm9 = vcmp.eq.f32.partialorder %v721_v58, 8.507059e+37 }
 0x1be   : > { %v706_v40 = vmul.f32 0.3275911, %v1952_v35  ;;  %v707_v51 = vmul.f32 0.3275911, %v1956_v41  ;;  %v739_v16 = vor.u32 1.1754944e-38, %v738_v59  ;;  %vm737_vm11 = vcmp.eq.f32.partialorder %v736_v0, 8.507059e+37 }
 0x1bf   : > { %v669_v38 = vpop.f32.mrf.mxu2  ;;  %v682_v39 = vpop.f32.mrf.mxu3  ;;  %v1607_v59 = vld [vmem:[#allocation6 + $0x80] sm:$0xff]  ;;  %v811_v18 = vsub.f32 0.0, %v1956_v41 }
 0x1c0   : > { %v1959_v47 = vadd.f32 1.0, %v706_v40  ;;  %v1965_v56 = vadd.f32 1.0, %v707_v51  ;;  %v1591_v39 = vld [vmem:[#allocation6] sm:$0xff] }
 0x1c1   : > { %v1682_v42 = vpop.eup %1681  ;;  %v1599_v40 = vld [vmem:[#allocation6 + $0x40] sm:$0xff]  ;;  %1112 = vmatpush.bf16.msrb.mxu0 %v1591_v39 }
 0x1c2   : > { %v1684_v45 = vpop.eup %1683  ;;  %v713_v46 = vmul.f32 %v1682_v42, %v1939_v27  ;;  %1685 = vrcp.f32 %v1959_v47  ;;  %vm718_vm4 = vweird.f32 %v1682_v42  ;;  %v813_v27 = vmul.f32 %v809_v2, %v1931_v14  ;;  %1125 = vmatpush.bf16.msrb.mxu1 %v1599_v40 }
 0x1c3   : > { %v728_v50 = vmul.f32 %v1684_v45, %v1941_v28  ;;  %vm733_vm5 = vweird.f32 %v1684_v45  ;;  %1687 = vrcp.f32 %v1965_v56  ;;  %vm719_vm7 = vmor %vm717_vm6, %vm718_vm4  ;;  %v1609_v28 = vld [vmem:[#allocation6 + $0x90] sm:$0xff]  ;;  %v751_v34 = vand.u32 2147483647, %v1959_v47 }
 0x1c4   : > { %v714_v8 = vsub.f32 1.0, %v713_v46  ;;  %vm734_vm10 = vmor %vm732_vm8, %vm733_vm5  ;;  %v753_v38 = vand.u32 2147483648, %v1959_v47  ;;  %1136 = vmatpush.bf16.msrb.mxu2 %v1609_v28  ;;  %v816_v46 = vmul.f32 1.442695, %v812_v25  ;;  %v818_v48 = vmul.f32 1.442695, %v813_v27 }
 0x1c5   : > { %v729_v55 = vsub.f32 1.0, %v728_v50  ;;  %vm747_vm13 = vweird.f32 %v1959_v47  ;;  %vm1998_vm14 = vcmp.eq.f32.partialorder %v751_v34, 8.507059e+37  ;;  %v766_v54 = vand.u32 2147483647, %v1965_v56 }
 0x1c6   : > { %v715_v57 = vmul.f32 %v1682_v42, %v714_v8  ;;  %v754_v53 = vor.u32 1.1754944e-38, %v753_v38  ;;  %1689 = vpow2.f32 %v816_v46  ;;  %vm762_vm1 = vweird.f32 %v1965_v56 }
 0x1c7   : > { %v730_v63 = vmul.f32 %v1684_v45, %v729_v55  ;;  %1691 = vpow2.f32 %v818_v48  ;;  %vm767_vm3 = vcmp.eq.f32.partialorder %v766_v54, 8.507059e+37  ;;  %vm692_vm4 = vcmp.ge.f32.partialorder %v1922_v7, 0.0 }
 0x1c8   : > { %v716_v1 = vadd.f32 %v1682_v42, %v715_v57  ;;  %v1976_v12 = vpop.eup %1685  ;;  %1137 = vmatpush.bf16.msrb.mxu2 %v1608_v43  ;;  %vm693_vm5 = vcmp.ge.f32.partialorder %v1925_v9, 0.0  ;;  %v684_v7 = vmul.f32 0.5, %v1917_v4  ;;  %vm694_vm6 = vcmp.ge.f32.partialorder %v1944_v29, 0.0 }
 0x1c9   : > { %v731_v10 = vadd.f32 %v1684_v45, %v730_v63  ;;  %v743_v23 = vmul.f32 %v1976_v12, %v1959_v47  ;;  %v1688_v36 = vpop.eup %1687  ;;  %vm748_vm12 = vweird.f32 %v1976_v12  ;;  %v768_v47 = vand.u32 2147483648, %v1965_v56 }
 0x1ca   : > { %v720_v15 = vsel %vm719_vm7, %v1682_v42, %v716_v1  ;;  %v758_v14 = vmul.f32 %v1688_v36, %v1965_v56  ;;  %vm749_vm15 = vmor %vm747_vm13, %vm748_vm12  ;;  %vm763_vm0 = vweird.f32 %v1688_v36  ;;  %v810_v63 = vsub.f32 0.0, %v1952_v35 }
 0x1cb   : > { %v1979_v19 = vsel %vm722_vm9, %v724_v6, %v720_v15  ;;  %v735_v20 = vsel %vm734_vm10, %v1684_v45, %v731_v10  ;;  %v744_v33 = vsub.f32 1.0, %v743_v23  ;;  %vm764_vm2 = vmor %vm762_vm1, %vm763_vm0  ;;  %v769_v5 = vor.u32 1.1754944e-38, %v768_v47 }
 0x1cc   : > { %v772_v24 = vmul.f32 1.0614054, %v1979_v19  ;;  %v1985_v26 = vsel %vm737_vm11, %v739_v16, %v735_v20  ;;  %v759_v8 = vsub.f32 1.0, %v758_v14  ;;  %1138 = vmatpush.bf16.msrb.mxu2 %v1607_v59  ;;  %v814_v16 = vmul.f32 %v810_v63, %v1952_v35 }
 0x1cd   : > { %v773_v31 = vmul.f32 1.0614054, %v1985_v26  ;;  %v745_v42 = vmul.f32 %v1976_v12, %v744_v33  ;;  %v698_v4 = vsel %vm694_vm6, 1.0, %v1796_v44  ;;  %vm695_vm7 = vcmp.ge.f32.partialorder %v1949_v32, 0.0 }
 0x1ce   : > { %v776_v37 = vadd.f32 -1.4531521, %v772_v24  ;;  %v760_v58 = vmul.f32 %v1688_v36, %v759_v8  ;;  %v1690_v24 = vpop.eup %1689  ;;  %v820_v34 = vmul.f32 1.442695, %v814_v16  ;;  %v685_v8 = vmul.f32 0.5, %v1919_v11 }
 0x1cf   : > { %v777_v13 = vadd.f32 -1.4531521, %v773_v31  ;;  %v746_v50 = vadd.f32 %v1976_v12, %v745_v42  ;;  %v1692_v31 = vpop.eup %1691  ;;  %v699_v29 = vsel %vm695_vm7, 1.0, %v1796_v44 }
 0x1d0   : > { %v780_v45 = vmul.f32 %v776_v37, %v1979_v19  ;;  %v761_v2 = vadd.f32 %v1688_v36, %v760_v58  ;;  %1693 = vpow2.f32 %v820_v34 }
 0x1d1   : > { %v781_v49 = vmul.f32 %v777_v13, %v1985_v26  ;;  %v750_v57 = vsel %vm749_vm15, %v1976_v12, %v746_v50 }
 0x1d2   : > { %v784_v52 = vadd.f32 1.4214138, %v780_v45  ;;  %v755_v62 = vsel %vm1998_vm14, %v754_v53, %v750_v57  ;;  %v765_v12 = vsel %vm764_vm2, %v1688_v36, %v761_v2  ;;  %v815_v36 = vmul.f32 %v811_v18, %v1956_v41 }
 0x1d3   : > { %v785_v55 = vadd.f32 1.4214138, %v781_v49  ;;  %v774_v1 = vmul.f32 1.0614054, %v755_v62  ;;  %v770_v17 = vsel %vm767_vm3, %v769_v5, %v765_v12  ;;  %v687_v12 = vmul.f32 0.5, %v1937_v22 }
 0x1d4   : > { %v788_v61 = vmul.f32 %v784_v52, %v1979_v19  ;;  %v775_v23 = vmul.f32 1.0614054, %v770_v17  ;;  %v822_v43 = vmul.f32 1.442695, %v815_v36 }
 0x1d5   : > { %v789_v0 = vmul.f32 %v785_v55, %v1985_v26  ;;  %v778_v10 = vadd.f32 -1.4531521, %v774_v1 }
 0x1d6   : > { %v792_v3 = vadd.f32 -0.28449672, %v788_v61  ;;  %v779_v30 = vadd.f32 -1.4531521, %v775_v23  ;;  %1695 = vpow2.f32 %v822_v43  ;;  %v1694_v47 = vpop.eup %1693 }
 0x1d7   : > { %v793_v6 = vadd.f32 -0.28449672, %v789_v0  ;;  %v782_v20 = vmul.f32 %v778_v10, %v755_v62 }
 0x1d8   : > { %v796_v15 = vmul.f32 %v792_v3, %v1979_v19  ;;  %v783_v38 = vmul.f32 %v779_v30, %v770_v17 }
 0x1d9   : > { %v797_v56 = vmul.f32 %v793_v6, %v1985_v26  ;;  %v786_v28 = vadd.f32 1.4214138, %v782_v20 }
 0x1da   : > { %v800_v25 = vadd.f32 0.2548296, %v796_v15  ;;  %v787_v42 = vadd.f32 1.4214138, %v783_v38 }
 0x1db   : > { %v801_v27 = vadd.f32 0.2548296, %v797_v56  ;;  %v790_v37 = vmul.f32 %v786_v28, %v755_v62  ;;  %v1676_v28 = vld [vmem:[%s2053_s6] ss:$0 sm:$0xff] }
 0x1dc   : > { %v804_v33 = vmul.f32 %v800_v25, %v1979_v19  ;;  %v696_v19 = vsel %vm692_vm4, 1.0, %v1796_v44  ;;  %v791_v41 = vmul.f32 %v787_v42, %v770_v17  ;;  %v1696_v1 = vpop.eup %1695 }
 0x1dd   : > { %v805_v35 = vmul.f32 %v801_v27, %v1985_v26  ;;  %v794_v13 = vadd.f32 -0.28449672, %v790_v37  ;;  %v697_v26 = vsel %vm693_vm5, 1.0, %v1796_v44  ;;  %v1168_v27 = vld [vmem:[%s1896_s29] sm:$0xf] }
 0x1de   : > { %v824_v39 = vmul.f32 %v1690_v24, %v804_v33  ;;  %v795_v51 = vadd.f32 -0.28449672, %v791_v41  ;;  %v1169_v30 = vunpack.c.l.bf16 %v1168_v27 }
 0x1df   : > { %v825_v40 = vmul.f32 %v1692_v31, %v805_v35  ;;  %v798_v46 = vmul.f32 %v794_v13, %v755_v62 }
 0x1e0   : > { %v828_v14 = vsub.f32 1.0, %v824_v39  ;;  %v799_v53 = vmul.f32 %v795_v51, %v770_v17 }
 0x1e1   : > { %v829_v45 = vsub.f32 1.0, %v825_v40  ;;  %v802_v50 = vadd.f32 0.2548296, %v798_v46 }
 0x1e2   : > { %v832_v48 = vmul.f32 %v828_v14, %v696_v19  ;;  %v803_v58 = vadd.f32 0.2548296, %v799_v53 }
 0x1e3   : > { %v833_v49 = vmul.f32 %v829_v45, %v697_v26  ;;  %v806_v52 = vmul.f32 %v802_v50, %v755_v62  ;;  %v686_v62 = vmul.f32 0.5, %v1935_v21 }
 0x1e4   : > { %v836_v9 = vadd.f32 1.0, %v832_v48  ;;  %v807_v63 = vmul.f32 %v803_v58, %v770_v17 }
 0x1e5   : > { %v837_v54 = vadd.f32 1.0, %v833_v49  ;;  %v826_v57 = vmul.f32 %v1694_v47, %v806_v52 }
 0x1e6   : > { %v840_v55 = vmul.f32 %v836_v9, %v684_v7  ;;  %v827_v11 = vmul.f32 %v1696_v1, %v807_v63 }
 0x1e7   : > { %v841_v59 = vmul.f32 %v837_v54, %v685_v8  ;;  %v830_v61 = vsub.f32 1.0, %v826_v57 }
 0x1e8   : > { %v844_v60 = vpack.c.bf16 %v840_v55, %v840_v55  ;;  %v831_v3 = vsub.f32 1.0, %v827_v11 }
 0x1e9   : > { %v845_v0 = vpack.c.bf16 %v841_v59, %v841_v59  ;;  %v834_v2 = vmul.f32 %v830_v61, %v698_v4 }
 0x1ea   : > { %1113 = vmatmul.bf16.vlgmr.msrb.gmra.mxu0 %v844_v60  ;;  %v835_v6 = vmul.f32 %v831_v3, %v699_v29 }
 0x1eb   : > { %1126 = vmatmul.bf16.vlgmr.msrb.gmra.mxu1 %v845_v0  ;;  %v838_v5 = vadd.f32 1.0, %v834_v2 }
 0x1ec   : > { %v839_v16 = vadd.f32 1.0, %v835_v6 }
 0x1ed   : > { %v842_v10 = vmul.f32 %v838_v5, %v686_v62 }
 0x1ee   : > { %v843_v17 = vmul.f32 %v839_v16, %v687_v12 }
 0x1ef   : > { %v846_v15 = vpack.c.bf16 %v842_v10, %v842_v10 }
 0x1f0   : > { %v847_v18 = vpack.c.bf16 %v843_v17, %v843_v17 }
 0x1f1   : > { %1139 = vmatmul.bf16.vlgmr.msrb.gmra.mxu2 %v846_v15 }
 0x1f2   : > { %1152 = vmatmul.bf16.vlgmr.msrb.gmra.mxu3 %v847_v18 }
 0x267   : > { %v1114_v32 = vpop.f32.mrf.mxu0 }
 0x268   : > { %v1127_v56 = vpop.f32.mrf.mxu1 }
 0x269   : > { %v1128_v21 = vadd.f32 %v1127_v56, %v1114_v32 }
 0x26f   : > { %v1116_v20 = vpop.f32.mrf.mxu0 }
 0x270   : > { %v1129_v23 = vpop.f32.mrf.mxu1 }
 0x274   : > { %v1140_v24 = vpop.f32.mrf.mxu2 }
 0x275   : > { %v1141_v25 = vadd.f32 %v1140_v24, %v1128_v21  ;;  %v1153_v22 = vpop.f32.mrf.mxu3 }
 0x277   : > { %v1154_v31 = vadd.f32 %v1153_v22, %v1141_v25 }
 0x279   : > { %v1167_v33 = vadd.f32 %v1676_v28, %v1154_v31 }
 0x27b   : > { %v1170_v36 = vadd.f32 %v1169_v30, %v1167_v33 }
 0x27c   : > { %v1142_v34 = vpop.f32.mrf.mxu2 }
 0x27d   : > { %v1171_v35 = vpack.c.bf16 %v1170_v36, %v1170_v36  ;;  %v1155_v37 = vpop.f32.mrf.mxu3 }
 0x27f   : > { %1172 = vst [vmem:[%s382_s17] sm:$0xf] %v1171_v35 }
 0x280 PF: > { %s19_s26 = sadd.s32 1, %s1787_s26   ;;  %s2059_s24 = smov %s1783_s25 }
 0x281   : > { %p16_p8 = scmp.ge.s32.totalorder %s19_s26, 4   ;;  %s2060_s25 = smov %s2062_s28 }
 0x283   :  { %18 = sbr.rel (!%p16_p8) target bundleno = 3 (0x3), region = 100 }
 0x288   :  { %1198 = vsyncpa [#allocation5], 1 }
 0x289   :  { %1200 = vsyncpa [#allocation5 + $0x1], 1 }
 0x28a   :  { %1201 = vsyncpa [#allocation7], 1 }

</bundles_post_ra>
